<compile_context>
chip_gen: v7x
topology: tpu7x:2x2x1
jax: 0.10.0
libtpu: 0.0.40
codegen_flags: <defaults>
</compile_context>

<pallas_src>
import functools

import jax
import jax.numpy as jnp
from jax.experimental import pallas as pl
from jax.experimental.pallas import tpu as pltpu


# -----------------------------------------------------------------------------
# Kernel 1: one bidirectional GRU layer (both directions, full recurrence).
# -----------------------------------------------------------------------------
def _bigru_layer_kernel(x_ref, wih_ref, bih_ref, whh_ref, bhn_ref, out_ref,
                        xp_sc, of_sc, or_sc):
    """x_ref   : (S, B, Din)   time-major layer input
       wih_ref : (Din, 6H)     [W_ih_fwd^T | W_ih_rev^T] (BN folded for layer 0)
       bih_ref : (1, 6H)       b_ih (+ b_hh reset/update slices folded in)
       whh_ref : (H, 6H)       [W_hh_fwd^T | W_hh_rev^T]
       bhn_ref : (1, 2H)       [b_hn_fwd | b_hn_rev]
       out_ref : (S, B, 2H)    concatenated [h_fwd | h_rev] per timestep
    """
    S, B, _ = x_ref.shape
    H = whh_ref.shape[0]

    # Stacked input projection for both directions in a single matmul.
    xp = jnp.einsum("sbd,dg->sbg", x_ref[...], wih_ref[...],
                    preferred_element_type=jnp.float32) + bih_ref[...]
    xp_sc[...] = xp                                    # (S, B, 6H)

    whh = whh_ref[...]
    bhn_f = bhn_ref[:, :H]
    bhn_r = bhn_ref[:, H:]

    def step(t, h_all):                                # h_all: (2B, H)
        h_f = h_all[:B]
        h_r = h_all[B:]
        # one recurrent matmul for both directions (rows :B use fwd columns,
        # rows B: use rev columns)
        gates_h = jnp.dot(h_all, whh, preferred_element_type=jnp.float32)

        tr = S - 1 - t
        xg_t = xp_sc[t]                                # (B, 6H)
        xg_tr = xp_sc[tr]                              # (B, 6H)

        # ---- forward direction consumes position t ----
        r = jax.nn.sigmoid(xg_t[:, 0:H] + gates_h[:B, 0:H])
        z = jax.nn.sigmoid(xg_t[:, H:2 * H] + gates_h[:B, H:2 * H])
        n = jnp.tanh(xg_t[:, 2 * H:3 * H]
                     + r * (gates_h[:B, 2 * H:3 * H] + bhn_f))
        h_f_new = (1.0 - z) * n + z * h_f
        of_sc[t] = h_f_new

        # ---- reverse direction consumes position S-1-t ----
        r2 = jax.nn.sigmoid(xg_tr[:, 3 * H:4 * H] + gates_h[B:, 3 * H:4 * H])
        z2 = jax.nn.sigmoid(xg_tr[:, 4 * H:5 * H] + gates_h[B:, 4 * H:5 * H])
        n2 = jnp.tanh(xg_tr[:, 5 * H:6 * H]
                      + r2 * (gates_h[B:, 5 * H:6 * H] + bhn_r))
        h_r_new = (1.0 - z2) * n2 + z2 * h_r
        or_sc[tr] = h_r_new

        return jnp.concatenate([h_f_new, h_r_new], axis=0)

    h0 = jnp.zeros((2 * B, H), jnp.float32)
    jax.lax.fori_loop(0, S, step, h0, unroll=S <= 32)

    # single lane-dense store of the whole layer output
    out_ref[...] = jnp.concatenate([of_sc[...], or_sc[...]], axis=-1)


def bigru_layer(x_sbd, w_ih_t, b_ih, w_hh_t, b_hn):
    S, B, _ = x_sbd.shape
    H = w_hh_t.shape[0]
    return pl.pallas_call(
        _bigru_layer_kernel,
        out_shape=jax.ShapeDtypeStruct((S, B, 2 * H), jnp.float32),
        in_specs=[pl.BlockSpec(memory_space=pltpu.MemorySpace.VMEM)] * 5,
        out_specs=pl.BlockSpec(memory_space=pltpu.MemorySpace.VMEM),
        scratch_shapes=[
            pltpu.VMEM((S, B, 6 * H), jnp.float32),   # input projections
            pltpu.VMEM((S, B, H), jnp.float32),       # forward hidden seq
            pltpu.VMEM((S, B, H), jnp.float32),       # reverse hidden seq
        ],
    )(x_sbd, w_ih_t, b_ih, w_hh_t, b_hn)


# -----------------------------------------------------------------------------
# Kernel 2: attention pooling + MLP head (fc1/relu/[bn2 folded]/fc2/relu/fc3).
# -----------------------------------------------------------------------------
def _head_kernel(x_ref, aw_ref, ab_ref, w1_ref, b1_ref, w2_ref, b2_ref,
                 w3_ref, b3_ref, o_ref):
    x = x_ref[...]                                                # (S, B, 2H)
    # attention scores: Linear(2H -> 1) then tanh, softmax over the seq axis
    s = jnp.sum(x * aw_ref[...], axis=-1, keepdims=True) + ab_ref[...]
    s = jnp.tanh(s)                                               # in [-1, 1]
    e = jnp.exp(s)                       # no max-subtraction needed (bounded)
    denom = jnp.sum(e, axis=0, keepdims=True)                     # (1, B, 1)
    a = e * pl.reciprocal(denom, approx=True)
    att = jnp.sum(a * x, axis=0)                                  # (B, 2H)

    h1 = jnp.dot(att, w1_ref[...], preferred_element_type=jnp.float32)
    h1 = jnp.maximum(h1 + b1_ref[...], 0.0)                       # fc1 + relu
    h2 = jnp.dot(h1, w2_ref[...], preferred_element_type=jnp.float32)
    h2 = jnp.maximum(h2 + b2_ref[...], 0.0)           # (bn2 folded) fc2 + relu
    out = jnp.dot(h2, w3_ref[...], preferred_element_type=jnp.float32)
    o_ref[...] = (out + b3_ref[...]).astype(o_ref.dtype)          # fc3


def attention_mlp_head(gru_out, hp):
    _, B, _ = gru_out.shape
    num_classes = hp["w3"].shape[1]
    return pl.pallas_call(
        _head_kernel,
        out_shape=jax.ShapeDtypeStruct((B, num_classes), jnp.float32),
        in_specs=[pl.BlockSpec(memory_space=pltpu.MemorySpace.VMEM)] * 9,
        out_specs=pl.BlockSpec(memory_space=pltpu.MemorySpace.VMEM),
    )(gru_out, hp["aw"], hp["ab"], hp["w1"], hp["b1"],
      hp["w2"], hp["b2"], hp["w3"], hp["b3"])


# -----------------------------------------------------------------------------
# Parameters (PyTorch-style raw params) + folding / packing
# -----------------------------------------------------------------------------
def init_params(key, input_dim, hidden_dim, num_layers, num_classes):
    H = hidden_dim
    params = {}
    keys = iter(jax.random.split(key, 8 * num_layers + 16))

    def nrm(k, shape, fan_in):
        return jax.random.normal(k, shape, jnp.float32) / jnp.sqrt(fan_in)

    # eval-mode BatchNorm running stats / affine params
    params["bn_in"] = dict(gamma=jnp.ones((input_dim,), jnp.float32),
                           beta=jnp.zeros((input_dim,), jnp.float32),
                           mean=jnp.zeros((input_dim,), jnp.float32),
                           var=jnp.ones((input_dim,), jnp.float32))
    params["bn2"] = dict(gamma=jnp.ones((H,), jnp.float32),
                         beta=jnp.zeros((H,), jnp.float32),
                         mean=jnp.zeros((H,), jnp.float32),
                         var=jnp.ones((H,), jnp.float32))

    # GRU weights (stored transposed: W^T), PyTorch gate order r, z, n
    for l in range(num_layers):
        in_dim = input_dim if l == 0 else 2 * H
        for d in range(2):  # 0 = forward, 1 = reverse
            params[f"gru_{l}_{d}"] = dict(
                w_ih_t=nrm(next(keys), (in_dim, 3 * H), in_dim),
                w_hh_t=nrm(next(keys), (H, 3 * H), H),
                b_ih=nrm(next(keys), (3 * H,), H),
                b_hh=nrm(next(keys), (3 * H,), H),
            )

    params["att_w"] = nrm(next(keys), (2 * H,), 2 * H)
    params["att_b"] = nrm(next(keys), (1,), 2 * H)
    params["fc1_w"] = nrm(next(keys), (2 * H, H), 2 * H)
    params["fc1_b"] = nrm(next(keys), (H,), 2 * H)
    params["fc2_w"] = nrm(next(keys), (H, H // 2), H)
    params["fc2_b"] = nrm(next(keys), (H // 2,), H)
    params["fc3_w"] = nrm(next(keys), (H // 2, num_classes), H // 2)
    params["fc3_b"] = nrm(next(keys), (num_classes,), H // 2)
    return params


def _fold_bn(bn, eps=1e-5):
    scale = bn["gamma"] * jax.lax.rsqrt(bn["var"] + eps)
    shift = bn["beta"] - bn["mean"] * scale
    return scale, shift


def pack_params(params, hidden_dim, num_layers):
    """Fold BN into adjacent matmuls, stack both GRU directions, fold b_hh
    reset/update slices into the input-projection bias. Exact in eval mode."""
    H = hidden_dim
    scale_in, shift_in = _fold_bn(params["bn_in"])

    layers = []
    for l in range(num_layers):
        pf = params[f"gru_{l}_0"]
        pr = params[f"gru_{l}_1"]
        w_ih = jnp.concatenate([pf["w_ih_t"], pr["w_ih_t"]], axis=1)   # (Din,6H)

        def eff_b(p):
            return p["b_ih"] + jnp.concatenate(
                [p["b_hh"][:2 * H], jnp.zeros((H,), jnp.float32)])

        b_ih = jnp.concatenate([eff_b(pf), eff_b(pr)])                 # (6H,)
        if l == 0:  # fold the input BatchNorm (affine) into layer 0
            b_ih = b_ih + shift_in @ w_ih
            w_ih = scale_in[:, None] * w_ih
        w_hh = jnp.concatenate([pf["w_hh_t"], pr["w_hh_t"]], axis=1)   # (H, 6H)
        b_hn = jnp.concatenate([pf["b_hh"][2 * H:], pr["b_hh"][2 * H:]])
        layers.append(dict(w_ih=w_ih, b_ih=b_ih.reshape(1, 6 * H),
                           w_hh=w_hh, b_hn=b_hn.reshape(1, 2 * H)))

    # head: fold bn2 (which follows relu(fc1)) into fc2
    scale2, shift2 = _fold_bn(params["bn2"])
    w2 = scale2[:, None] * params["fc2_w"]
    b2 = params["fc2_b"] + shift2 @ params["fc2_w"]
    head = dict(
        aw=params["att_w"].reshape(1, 1, 2 * H),
        ab=params["att_b"].reshape(1, 1, 1),
        w1=params["fc1_w"], b1=params["fc1_b"].reshape(1, -1),
        w2=w2, b2=b2.reshape(1, -1),
        w3=params["fc3_w"], b3=params["fc3_b"].reshape(1, -1),
    )
    return layers, head


# -----------------------------------------------------------------------------
# Forward
# -----------------------------------------------------------------------------
@functools.partial(jax.jit, static_argnames=("hidden_dim", "num_layers"))
def attentive_bigru_forward(params, x, hidden_dim, num_layers):
    layers, head = pack_params(params, hidden_dim, num_layers)
    h = x.transpose(1, 0, 2)          # (S, B, Din): time-major, done once
    for lp in layers:                 # dropout between GRU layers = identity
        h = bigru_layer(h, lp["w_ih"], lp["b_ih"], lp["w_hh"], lp["b_hn"])
    return attention_mlp_head(h, head)


# -----------------------------------------------------------------------------
if __name__ == "__main__":
    # small shapes consistent with the module's (batch, seq, input_dim) input
    BATCH, SEQ, INPUT_DIM = 2, 8, 16
    HIDDEN_DIM, NUM_LAYERS, NUM_CLASSES = 32, 2, 2

    key = jax.random.PRNGKey(0)
    k_param, k_x = jax.random.split(key)

    params = init_params(k_param, INPUT_DIM, HIDDEN_DIM, NUM_LAYERS, NUM_CLASSES)
    x = jax.random.normal(k_x, (BATCH, SEQ, INPUT_DIM), jnp.float32)

    logits = attentive_bigru_forward(params, x, hidden_dim=HIDDEN_DIM,
                                     num_layers=NUM_LAYERS)
    jax.block_until_ready(logits)
    assert logits.shape == (BATCH, NUM_CLASSES)
    print("KERNEL_OK")
</pallas_src>

<mosaic_0001>
module attributes {stable_mosaic.version = 11 : i64} {
  func.func @_bigru_layer_kernel(%arg0: memref<8x2x16xf32, #tpu.memory_space<vmem>>, %arg1: memref<16x192xf32, #tpu.memory_space<vmem>>, %arg2: memref<1x192xf32, #tpu.memory_space<vmem>>, %arg3: memref<32x192xf32, #tpu.memory_space<vmem>>, %arg4: memref<1x64xf32, #tpu.memory_space<vmem>>, %arg5: memref<8x2x64xf32, #tpu.memory_space<vmem>>, %arg6: memref<8x2x192xf32, #tpu.memory_space<vmem>>, %arg7: memref<8x2x32xf32, #tpu.memory_space<vmem>>, %arg8: memref<8x2x32xf32, #tpu.memory_space<vmem>>) attributes {dimension_semantics = [], scalar_prefetch = 0 : i64, scratch_operands = 3 : i64, tpu.core_type = #tpu.core_type<tc>} {
    %c0 = arith.constant 0 : index
    %c0_0 = arith.constant 0 : index
    %c0_1 = arith.constant 0 : index
    %0 = vector.load %arg0[%c0, %c0_0, %c0_1] : memref<8x2x16xf32, #tpu.memory_space<vmem>>, vector<8x2x16xf32>
    %c0_2 = arith.constant 0 : index
    %c0_3 = arith.constant 0 : index
    %1 = vector.load %arg1[%c0_2, %c0_3] : memref<16x192xf32, #tpu.memory_space<vmem>>, vector<16x192xf32>
    "tpu.trace_start"() <{level = 10 : i32, message = "sbd,dg->sbg"}> : () -> ()
    %cst = arith.constant dense<0.000000e+00> : vector<8x2x192xf32>
    %2 = tpu.matmul %0, %1, %cst {dimension_numbers = #tpu.dot_dimension_numbers<[2], [0], [0, 1], [1], [0, 0, 0, 1, 1, 1], [], []>} : vector<8x2x16xf32>, vector<16x192xf32>, vector<8x2x192xf32> -> vector<8x2x192xf32>
    "tpu.trace_stop"() : () -> ()
    %c0_4 = arith.constant 0 : index
    %c0_5 = arith.constant 0 : index
    %3 = vector.load %arg2[%c0_4, %c0_5] : memref<1x192xf32, #tpu.memory_space<vmem>>, vector<1x192xf32>
    %4 = vector.shape_cast %3 : vector<1x192xf32> to vector<1x1x192xf32>
    %5 = vector.broadcast %4 : vector<1x1x192xf32> to vector<8x2x192xf32>
    %6 = arith.addf %2, %5 : vector<8x2x192xf32>
    %c0_6 = arith.constant 0 : index
    %c0_7 = arith.constant 0 : index
    %c0_8 = arith.constant 0 : index
    %7 = vector.load %arg6[%c0_6, %c0_7, %c0_8] : memref<8x2x192xf32, #tpu.memory_space<vmem>>, vector<8x2x192xf32>
    tpu.vector_store %arg6[%c0_6, %c0_7, %c0_8], %6 {strides = array<i32>} : memref<8x2x192xf32, #tpu.memory_space<vmem>>, vector<8x2x192xf32>,
    %c0_9 = arith.constant 0 : index
    %c0_10 = arith.constant 0 : index
    %8 = vector.load %arg3[%c0_9, %c0_10] : memref<32x192xf32, #tpu.memory_space<vmem>>, vector<32x192xf32>
    %c0_11 = arith.constant 0 : index
    %c0_12 = arith.constant 0 : index
    %9 = vector.load %arg4[%c0_11, %c0_12] : memref<1x64xf32, #tpu.memory_space<vmem>>, vector<1x32xf32>
    %c0_13 = arith.constant 0 : index
    %c32 = arith.constant 32 : index
    %10 = vector.load %arg4[%c0_13, %c32] : memref<1x64xf32, #tpu.memory_space<vmem>>, vector<1x32xf32>
    %cst_14 = arith.constant 0.000000e+00 : f32
    %11 = vector.broadcast %cst_14 : f32 to vector<4x32xf32>
    %c0_i32 = arith.constant 0 : i32
    %12 = vector.extract_strided_slice %11 {offsets = [0, 0], sizes = [2, 32], strides = [1, 1]} : vector<4x32xf32> to vector<2x32xf32>
    %13 = vector.extract_strided_slice %11 {offsets = [2, 0], sizes = [2, 32], strides = [1, 1]} : vector<4x32xf32> to vector<2x32xf32>
    %cst_15 = arith.constant dense<0.000000e+00> : vector<4x192xf32>
    %14 = tpu.matmul %11, %8, %cst_15 {dimension_numbers = #tpu.dot_dimension_numbers<[1], [0], [0], [1], [0, 0, 1, 1], [], []>} : vector<4x32xf32>, vector<32x192xf32>, vector<4x192xf32> -> vector<4x192xf32>
    %c7_i32 = arith.constant 7 : i32
    %15 = arith.subi %c7_i32, %c0_i32 : i32
    %16 = arith.index_cast %c0_i32 : i32 to index
    %c0_16 = arith.constant 0 : index
    %c0_17 = arith.constant 0 : index
    %17 = vector.load %arg6[%16, %c0_16, %c0_17] : memref<8x2x192xf32, #tpu.memory_space<vmem>>, vector<1x2x192xf32>
    %18 = vector.shape_cast %17 : vector<1x2x192xf32> to vector<2x192xf32>
    %19 = arith.index_cast %15 : i32 to index
    %c0_18 = arith.constant 0 : index
    %c0_19 = arith.constant 0 : index
    %20 = vector.load %arg6[%19, %c0_18, %c0_19] : memref<8x2x192xf32, #tpu.memory_space<vmem>>, vector<1x2x192xf32>
    %21 = vector.shape_cast %20 : vector<1x2x192xf32> to vector<2x192xf32>
    %22 = vector.extract_strided_slice %18 {offsets = [0, 0], sizes = [2, 32], strides = [1, 1]} : vector<2x192xf32> to vector<2x32xf32>
    %23 = vector.extract_strided_slice %14 {offsets = [0, 0], sizes = [2, 32], strides = [1, 1]} : vector<4x192xf32> to vector<2x32xf32>
    %24 = arith.addf %22, %23 : vector<2x32xf32>
    %25 = arith.negf %24 : vector<2x32xf32>
    %26 = math.exp %25 : vector<2x32xf32>
    %cst_20 = arith.constant 1.000000e+00 : f32
    %27 = vector.broadcast %cst_20 : f32 to vector<2x32xf32>
    %28 = arith.addf %27, %26 : vector<2x32xf32>
    %29 = arith.divf %27, %28 : vector<2x32xf32>
    %30 = vector.extract_strided_slice %18 {offsets = [0, 32], sizes = [2, 32], strides = [1, 1]} : vector<2x192xf32> to vector<2x32xf32>
    %31 = vector.extract_strided_slice %14 {offsets = [0, 32], sizes = [2, 32], strides = [1, 1]} : vector<4x192xf32> to vector<2x32xf32>
    %32 = arith.addf %30, %31 : vector<2x32xf32>
    %33 = arith.negf %32 : vector<2x32xf32>
    %34 = math.exp %33 : vector<2x32xf32>
    %cst_21 = arith.constant 1.000000e+00 : f32
    %35 = vector.broadcast %cst_21 : f32 to vector<2x32xf32>
    %36 = arith.addf %35, %34 : vector<2x32xf32>
    %37 = arith.divf %35, %36 : vector<2x32xf32>
    %38 = vector.extract_strided_slice %18 {offsets = [0, 64], sizes = [2, 32], strides = [1, 1]} : vector<2x192xf32> to vector<2x32xf32>
    %39 = vector.extract_strided_slice %14 {offsets = [0, 64], sizes = [2, 32], strides = [1, 1]} : vector<4x192xf32> to vector<2x32xf32>
    %40 = vector.broadcast %9 : vector<1x32xf32> to vector<2x32xf32>
    %41 = arith.addf %39, %40 : vector<2x32xf32>
    %42 = arith.mulf %29, %41 : vector<2x32xf32>
    %43 = arith.addf %38, %42 : vector<2x32xf32>
    %44 = math.tanh %43 : vector<2x32xf32>
    %cst_22 = arith.constant 1.000000e+00 : f32
    %45 = vector.broadcast %cst_22 : f32 to vector<2x32xf32>
    %46 = arith.subf %45, %37 : vector<2x32xf32>
    %47 = arith.mulf %46, %44 : vector<2x32xf32>
    %48 = arith.mulf %37, %12 : vector<2x32xf32>
    %49 = arith.addf %47, %48 : vector<2x32xf32>
    %50 = arith.index_cast %c0_i32 : i32 to index
    %c0_23 = arith.constant 0 : index
    %c0_24 = arith.constant 0 : index
    %51 = vector.load %arg7[%50, %c0_23, %c0_24] : memref<8x2x32xf32, #tpu.memory_space<vmem>>, vector<1x2x32xf32>
    %52 = vector.shape_cast %51 : vector<1x2x32xf32> to vector<2x32xf32>
    %53 = vector.shape_cast %49 : vector<2x32xf32> to vector<1x2x32xf32>
    tpu.vector_store %arg7[%50, %c0_23, %c0_24], %53 {strides = array<i32>} : memref<8x2x32xf32, #tpu.memory_space<vmem>>, vector<1x2x32xf32>,
    %54 = vector.extract_strided_slice %21 {offsets = [0, 96], sizes = [2, 32], strides = [1, 1]} : vector<2x192xf32> to vector<2x32xf32>
    %55 = vector.extract_strided_slice %14 {offsets = [2, 96], sizes = [2, 32], strides = [1, 1]} : vector<4x192xf32> to vector<2x32xf32>
    %56 = arith.addf %54, %55 : vector<2x32xf32>
    %57 = arith.negf %56 : vector<2x32xf32>
    %58 = math.exp %57 : vector<2x32xf32>
    %cst_25 = arith.constant 1.000000e+00 : f32
    %59 = vector.broadcast %cst_25 : f32 to vector<2x32xf32>
    %60 = arith.addf %59, %58 : vector<2x32xf32>
    %61 = arith.divf %59, %60 : vector<2x32xf32>
    %62 = vector.extract_strided_slice %21 {offsets = [0, 128], sizes = [2, 32], strides = [1, 1]} : vector<2x192xf32> to vector<2x32xf32>
    %63 = vector.extract_strided_slice %14 {offsets = [2, 128], sizes = [2, 32], strides = [1, 1]} : vector<4x192xf32> to vector<2x32xf32>
    %64 = arith.addf %62, %63 : vector<2x32xf32>
    %65 = arith.negf %64 : vector<2x32xf32>
    %66 = math.exp %65 : vector<2x32xf32>
    %cst_26 = arith.constant 1.000000e+00 : f32
    %67 = vector.broadcast %cst_26 : f32 to vector<2x32xf32>
    %68 = arith.addf %67, %66 : vector<2x32xf32>
    %69 = arith.divf %67, %68 : vector<2x32xf32>
    %70 = vector.extract_strided_slice %21 {offsets = [0, 160], sizes = [2, 32], strides = [1, 1]} : vector<2x192xf32> to vector<2x32xf32>
    %71 = vector.extract_strided_slice %14 {offsets = [2, 160], sizes = [2, 32], strides = [1, 1]} : vector<4x192xf32> to vector<2x32xf32>
    %72 = vector.broadcast %10 : vector<1x32xf32> to vector<2x32xf32>
    %73 = arith.addf %71, %72 : vector<2x32xf32>
    %74 = arith.mulf %61, %73 : vector<2x32xf32>
    %75 = arith.addf %70, %74 : vector<2x32xf32>
    %76 = math.tanh %75 : vector<2x32xf32>
    %cst_27 = arith.constant 1.000000e+00 : f32
    %77 = vector.broadcast %cst_27 : f32 to vector<2x32xf32>
    %78 = arith.subf %77, %69 : vector<2x32xf32>
    %79 = arith.mulf %78, %76 : vector<2x32xf32>
    %80 = arith.mulf %69, %13 : vector<2x32xf32>
    %81 = arith.addf %79, %80 : vector<2x32xf32>
    %82 = arith.index_cast %15 : i32 to index
    %c0_28 = arith.constant 0 : index
    %c0_29 = arith.constant 0 : index
    %83 = vector.load %arg8[%82, %c0_28, %c0_29] : memref<8x2x32xf32, #tpu.memory_space<vmem>>, vector<1x2x32xf32>
    %84 = vector.shape_cast %83 : vector<1x2x32xf32> to vector<2x32xf32>
    %85 = vector.shape_cast %81 : vector<2x32xf32> to vector<1x2x32xf32>
    tpu.vector_store %arg8[%82, %c0_28, %c0_29], %85 {strides = array<i32>} : memref<8x2x32xf32, #tpu.memory_space<vmem>>, vector<1x2x32xf32>,
    %86 = tpu.concatenate %49, %81 in 0 : vector<2x32xf32>, vector<2x32xf32> -> vector<4x32xf32>
    %c1_i32 = arith.constant 1 : i32
    %87 = vector.extract_strided_slice %86 {offsets = [0, 0], sizes = [2, 32], strides = [1, 1]} : vector<4x32xf32> to vector<2x32xf32>
    %88 = vector.extract_strided_slice %86 {offsets = [2, 0], sizes = [2, 32], strides = [1, 1]} : vector<4x32xf32> to vector<2x32xf32>
    %cst_30 = arith.constant dense<0.000000e+00> : vector<4x192xf32>
    %89 = tpu.matmul %86, %8, %cst_30 {dimension_numbers = #tpu.dot_dimension_numbers<[1], [0], [0], [1], [0, 0, 1, 1], [], []>} : vector<4x32xf32>, vector<32x192xf32>, vector<4x192xf32> -> vector<4x192xf32>
    %c7_i32_31 = arith.constant 7 : i32
    %90 = arith.subi %c7_i32_31, %c1_i32 : i32
    %91 = arith.index_cast %c1_i32 : i32 to index
    %c0_32 = arith.constant 0 : index
    %c0_33 = arith.constant 0 : index
    %92 = vector.load %arg6[%91, %c0_32, %c0_33] : memref<8x2x192xf32, #tpu.memory_space<vmem>>, vector<1x2x192xf32>
    %93 = vector.shape_cast %92 : vector<1x2x192xf32> to vector<2x192xf32>
    %94 = arith.index_cast %90 : i32 to index
    %c0_34 = arith.constant 0 : index
    %c0_35 = arith.constant 0 : index
    %95 = vector.load %arg6[%94, %c0_34, %c0_35] : memref<8x2x192xf32, #tpu.memory_space<vmem>>, vector<1x2x192xf32>
    %96 = vector.shape_cast %95 : vector<1x2x192xf32> to vector<2x192xf32>
    %97 = vector.extract_strided_slice %93 {offsets = [0, 0], sizes = [2, 32], strides = [1, 1]} : vector<2x192xf32> to vector<2x32xf32>
    %98 = vector.extract_strided_slice %89 {offsets = [0, 0], sizes = [2, 32], strides = [1, 1]} : vector<4x192xf32> to vector<2x32xf32>
    %99 = arith.addf %97, %98 : vector<2x32xf32>
    %100 = arith.negf %99 : vector<2x32xf32>
    %101 = math.exp %100 : vector<2x32xf32>
    %cst_36 = arith.constant 1.000000e+00 : f32
    %102 = vector.broadcast %cst_36 : f32 to vector<2x32xf32>
    %103 = arith.addf %102, %101 : vector<2x32xf32>
    %104 = arith.divf %102, %103 : vector<2x32xf32>
    %105 = vector.extract_strided_slice %93 {offsets = [0, 32], sizes = [2, 32], strides = [1, 1]} : vector<2x192xf32> to vector<2x32xf32>
    %106 = vector.extract_strided_slice %89 {offsets = [0, 32], sizes = [2, 32], strides = [1, 1]} : vector<4x192xf32> to vector<2x32xf32>
    %107 = arith.addf %105, %106 : vector<2x32xf32>
    %108 = arith.negf %107 : vector<2x32xf32>
    %109 = math.exp %108 : vector<2x32xf32>
    %cst_37 = arith.constant 1.000000e+00 : f32
    %110 = vector.broadcast %cst_37 : f32 to vector<2x32xf32>
    %111 = arith.addf %110, %109 : vector<2x32xf32>
    %112 = arith.divf %110, %111 : vector<2x32xf32>
    %113 = vector.extract_strided_slice %93 {offsets = [0, 64], sizes = [2, 32], strides = [1, 1]} : vector<2x192xf32> to vector<2x32xf32>
    %114 = vector.extract_strided_slice %89 {offsets = [0, 64], sizes = [2, 32], strides = [1, 1]} : vector<4x192xf32> to vector<2x32xf32>
    %115 = vector.broadcast %9 : vector<1x32xf32> to vector<2x32xf32>
    %116 = arith.addf %114, %115 : vector<2x32xf32>
    %117 = arith.mulf %104, %116 : vector<2x32xf32>
    %118 = arith.addf %113, %117 : vector<2x32xf32>
    %119 = math.tanh %118 : vector<2x32xf32>
    %cst_38 = arith.constant 1.000000e+00 : f32
    %120 = vector.broadcast %cst_38 : f32 to vector<2x32xf32>
    %121 = arith.subf %120, %112 : vector<2x32xf32>
    %122 = arith.mulf %121, %119 : vector<2x32xf32>
    %123 = arith.mulf %112, %87 : vector<2x32xf32>
    %124 = arith.addf %122, %123 : vector<2x32xf32>
    %125 = arith.index_cast %c1_i32 : i32 to index
    %c0_39 = arith.constant 0 : index
    %c0_40 = arith.constant 0 : index
    %126 = vector.load %arg7[%125, %c0_39, %c0_40] : memref<8x2x32xf32, #tpu.memory_space<vmem>>, vector<1x2x32xf32>
    %127 = vector.shape_cast %126 : vector<1x2x32xf32> to vector<2x32xf32>
    %128 = vector.shape_cast %124 : vector<2x32xf32> to vector<1x2x32xf32>
    tpu.vector_store %arg7[%125, %c0_39, %c0_40], %128 {strides = array<i32>} : memref<8x2x32xf32, #tpu.memory_space<vmem>>, vector<1x2x32xf32>,
    %129 = vector.extract_strided_slice %96 {offsets = [0, 96], sizes = [2, 32], strides = [1, 1]} : vector<2x192xf32> to vector<2x32xf32>
    %130 = vector.extract_strided_slice %89 {offsets = [2, 96], sizes = [2, 32], strides = [1, 1]} : vector<4x192xf32> to vector<2x32xf32>
    %131 = arith.addf %129, %130 : vector<2x32xf32>
    %132 = arith.negf %131 : vector<2x32xf32>
    %133 = math.exp %132 : vector<2x32xf32>
    %cst_41 = arith.constant 1.000000e+00 : f32
    %134 = vector.broadcast %cst_41 : f32 to vector<2x32xf32>
    %135 = arith.addf %134, %133 : vector<2x32xf32>
    %136 = arith.divf %134, %135 : vector<2x32xf32>
    %137 = vector.extract_strided_slice %96 {offsets = [0, 128], sizes = [2, 32], strides = [1, 1]} : vector<2x192xf32> to vector<2x32xf32>
    %138 = vector.extract_strided_slice %89 {offsets = [2, 128], sizes = [2, 32], strides = [1, 1]} : vector<4x192xf32> to vector<2x32xf32>
    %139 = arith.addf %137, %138 : vector<2x32xf32>
    %140 = arith.negf %139 : vector<2x32xf32>
    %141 = math.exp %140 : vector<2x32xf32>
    %cst_42 = arith.constant 1.000000e+00 : f32
    %142 = vector.broadcast %cst_42 : f32 to vector<2x32xf32>
    %143 = arith.addf %142, %141 : vector<2x32xf32>
    %144 = arith.divf %142, %143 : vector<2x32xf32>
    %145 = vector.extract_strided_slice %96 {offsets = [0, 160], sizes = [2, 32], strides = [1, 1]} : vector<2x192xf32> to vector<2x32xf32>
    %146 = vector.extract_strided_slice %89 {offsets = [2, 160], sizes = [2, 32], strides = [1, 1]} : vector<4x192xf32> to vector<2x32xf32>
    %147 = vector.broadcast %10 : vector<1x32xf32> to vector<2x32xf32>
    %148 = arith.addf %146, %147 : vector<2x32xf32>
    %149 = arith.mulf %136, %148 : vector<2x32xf32>
    %150 = arith.addf %145, %149 : vector<2x32xf32>
    %151 = math.tanh %150 : vector<2x32xf32>
    %cst_43 = arith.constant 1.000000e+00 : f32
    %152 = vector.broadcast %cst_43 : f32 to vector<2x32xf32>
    %153 = arith.subf %152, %144 : vector<2x32xf32>
    %154 = arith.mulf %153, %151 : vector<2x32xf32>
    %155 = arith.mulf %144, %88 : vector<2x32xf32>
    %156 = arith.addf %154, %155 : vector<2x32xf32>
    %157 = arith.index_cast %90 : i32 to index
    %c0_44 = arith.constant 0 : index
    %c0_45 = arith.constant 0 : index
    %158 = vector.load %arg8[%157, %c0_44, %c0_45] : memref<8x2x32xf32, #tpu.memory_space<vmem>>, vector<1x2x32xf32>
    %159 = vector.shape_cast %158 : vector<1x2x32xf32> to vector<2x32xf32>
    %160 = vector.shape_cast %156 : vector<2x32xf32> to vector<1x2x32xf32>
    tpu.vector_store %arg8[%157, %c0_44, %c0_45], %160 {strides = array<i32>} : memref<8x2x32xf32, #tpu.memory_space<vmem>>, vector<1x2x32xf32>,
    %161 = tpu.concatenate %124, %156 in 0 : vector<2x32xf32>, vector<2x32xf32> -> vector<4x32xf32>
    %c2_i32 = arith.constant 2 : i32
    %162 = vector.extract_strided_slice %161 {offsets = [0, 0], sizes = [2, 32], strides = [1, 1]} : vector<4x32xf32> to vector<2x32xf32>
    %163 = vector.extract_strided_slice %161 {offsets = [2, 0], sizes = [2, 32], strides = [1, 1]} : vector<4x32xf32> to vector<2x32xf32>
    %cst_46 = arith.constant dense<0.000000e+00> : vector<4x192xf32>
    %164 = tpu.matmul %161, %8, %cst_46 {dimension_numbers = #tpu.dot_dimension_numbers<[1], [0], [0], [1], [0, 0, 1, 1], [], []>} : vector<4x32xf32>, vector<32x192xf32>, vector<4x192xf32> -> vector<4x192xf32>
    %c7_i32_47 = arith.constant 7 : i32
    %165 = arith.subi %c7_i32_47, %c2_i32 : i32
    %166 = arith.index_cast %c2_i32 : i32 to index
    %c0_48 = arith.constant 0 : index
    %c0_49 = arith.constant 0 : index
    %167 = vector.load %arg6[%166, %c0_48, %c0_49] : memref<8x2x192xf32, #tpu.memory_space<vmem>>, vector<1x2x192xf32>
    %168 = vector.shape_cast %167 : vector<1x2x192xf32> to vector<2x192xf32>
    %169 = arith.index_cast %165 : i32 to index
    %c0_50 = arith.constant 0 : index
    %c0_51 = arith.constant 0 : index
    %170 = vector.load %arg6[%169, %c0_50, %c0_51] : memref<8x2x192xf32, #tpu.memory_space<vmem>>, vector<1x2x192xf32>
    %171 = vector.shape_cast %170 : vector<1x2x192xf32> to vector<2x192xf32>
    %172 = vector.extract_strided_slice %168 {offsets = [0, 0], sizes = [2, 32], strides = [1, 1]} : vector<2x192xf32> to vector<2x32xf32>
    %173 = vector.extract_strided_slice %164 {offsets = [0, 0], sizes = [2, 32], strides = [1, 1]} : vector<4x192xf32> to vector<2x32xf32>
    %174 = arith.addf %172, %173 : vector<2x32xf32>
    %175 = arith.negf %174 : vector<2x32xf32>
    %176 = math.exp %175 : vector<2x32xf32>
    %cst_52 = arith.constant 1.000000e+00 : f32
    %177 = vector.broadcast %cst_52 : f32 to vector<2x32xf32>
    %178 = arith.addf %177, %176 : vector<2x32xf32>
    %179 = arith.divf %177, %178 : vector<2x32xf32>
    %180 = vector.extract_strided_slice %168 {offsets = [0, 32], sizes = [2, 32], strides = [1, 1]} : vector<2x192xf32> to vector<2x32xf32>
    %181 = vector.extract_strided_slice %164 {offsets = [0, 32], sizes = [2, 32], strides = [1, 1]} : vector<4x192xf32> to vector<2x32xf32>
    %182 = arith.addf %180, %181 : vector<2x32xf32>
    %183 = arith.negf %182 : vector<2x32xf32>
    %184 = math.exp %183 : vector<2x32xf32>
    %cst_53 = arith.constant 1.000000e+00 : f32
    %185 = vector.broadcast %cst_53 : f32 to vector<2x32xf32>
    %186 = arith.addf %185, %184 : vector<2x32xf32>
    %187 = arith.divf %185, %186 : vector<2x32xf32>
    %188 = vector.extract_strided_slice %168 {offsets = [0, 64], sizes = [2, 32], strides = [1, 1]} : vector<2x192xf32> to vector<2x32xf32>
    %189 = vector.extract_strided_slice %164 {offsets = [0, 64], sizes = [2, 32], strides = [1, 1]} : vector<4x192xf32> to vector<2x32xf32>
    %190 = vector.broadcast %9 : vector<1x32xf32> to vector<2x32xf32>
    %191 = arith.addf %189, %190 : vector<2x32xf32>
    %192 = arith.mulf %179, %191 : vector<2x32xf32>
    %193 = arith.addf %188, %192 : vector<2x32xf32>
    %194 = math.tanh %193 : vector<2x32xf32>
    %cst_54 = arith.constant 1.000000e+00 : f32
    %195 = vector.broadcast %cst_54 : f32 to vector<2x32xf32>
    %196 = arith.subf %195, %187 : vector<2x32xf32>
    %197 = arith.mulf %196, %194 : vector<2x32xf32>
    %198 = arith.mulf %187, %162 : vector<2x32xf32>
    %199 = arith.addf %197, %198 : vector<2x32xf32>
    %200 = arith.index_cast %c2_i32 : i32 to index
    %c0_55 = arith.constant 0 : index
    %c0_56 = arith.constant 0 : index
    %201 = vector.load %arg7[%200, %c0_55, %c0_56] : memref<8x2x32xf32, #tpu.memory_space<vmem>>, vector<1x2x32xf32>
    %202 = vector.shape_cast %201 : vector<1x2x32xf32> to vector<2x32xf32>
    %203 = vector.shape_cast %199 : vector<2x32xf32> to vector<1x2x32xf32>
    tpu.vector_store %arg7[%200, %c0_55, %c0_56], %203 {strides = array<i32>} : memref<8x2x32xf32, #tpu.memory_space<vmem>>, vector<1x2x32xf32>,
    %204 = vector.extract_strided_slice %171 {offsets = [0, 96], sizes = [2, 32], strides = [1, 1]} : vector<2x192xf32> to vector<2x32xf32>
    %205 = vector.extract_strided_slice %164 {offsets = [2, 96], sizes = [2, 32], strides = [1, 1]} : vector<4x192xf32> to vector<2x32xf32>
    %206 = arith.addf %204, %205 : vector<2x32xf32>
    %207 = arith.negf %206 : vector<2x32xf32>
    %208 = math.exp %207 : vector<2x32xf32>
    %cst_57 = arith.constant 1.000000e+00 : f32
    %209 = vector.broadcast %cst_57 : f32 to vector<2x32xf32>
    %210 = arith.addf %209, %208 : vector<2x32xf32>
    %211 = arith.divf %209, %210 : vector<2x32xf32>
    %212 = vector.extract_strided_slice %171 {offsets = [0, 128], sizes = [2, 32], strides = [1, 1]} : vector<2x192xf32> to vector<2x32xf32>
    %213 = vector.extract_strided_slice %164 {offsets = [2, 128], sizes = [2, 32], strides = [1, 1]} : vector<4x192xf32> to vector<2x32xf32>
    %214 = arith.addf %212, %213 : vector<2x32xf32>
    %215 = arith.negf %214 : vector<2x32xf32>
    %216 = math.exp %215 : vector<2x32xf32>
    %cst_58 = arith.constant 1.000000e+00 : f32
    %217 = vector.broadcast %cst_58 : f32 to vector<2x32xf32>
    %218 = arith.addf %217, %216 : vector<2x32xf32>
    %219 = arith.divf %217, %218 : vector<2x32xf32>
    %220 = vector.extract_strided_slice %171 {offsets = [0, 160], sizes = [2, 32], strides = [1, 1]} : vector<2x192xf32> to vector<2x32xf32>
    %221 = vector.extract_strided_slice %164 {offsets = [2, 160], sizes = [2, 32], strides = [1, 1]} : vector<4x192xf32> to vector<2x32xf32>
    %222 = vector.broadcast %10 : vector<1x32xf32> to vector<2x32xf32>
    %223 = arith.addf %221, %222 : vector<2x32xf32>
    %224 = arith.mulf %211, %223 : vector<2x32xf32>
    %225 = arith.addf %220, %224 : vector<2x32xf32>
    %226 = math.tanh %225 : vector<2x32xf32>
    %cst_59 = arith.constant 1.000000e+00 : f32
    %227 = vector.broadcast %cst_59 : f32 to vector<2x32xf32>
    %228 = arith.subf %227, %219 : vector<2x32xf32>
    %229 = arith.mulf %228, %226 : vector<2x32xf32>
    %230 = arith.mulf %219, %163 : vector<2x32xf32>
    %231 = arith.addf %229, %230 : vector<2x32xf32>
    %232 = arith.index_cast %165 : i32 to index
    %c0_60 = arith.constant 0 : index
    %c0_61 = arith.constant 0 : index
    %233 = vector.load %arg8[%232, %c0_60, %c0_61] : memref<8x2x32xf32, #tpu.memory_space<vmem>>, vector<1x2x32xf32>
    %234 = vector.shape_cast %233 : vector<1x2x32xf32> to vector<2x32xf32>
    %235 = vector.shape_cast %231 : vector<2x32xf32> to vector<1x2x32xf32>
    tpu.vector_store %arg8[%232, %c0_60, %c0_61], %235 {strides = array<i32>} : memref<8x2x32xf32, #tpu.memory_space<vmem>>, vector<1x2x32xf32>,
    %236 = tpu.concatenate %199, %231 in 0 : vector<2x32xf32>, vector<2x32xf32> -> vector<4x32xf32>
    %c3_i32 = arith.constant 3 : i32
    %237 = vector.extract_strided_slice %236 {offsets = [0, 0], sizes = [2, 32], strides = [1, 1]} : vector<4x32xf32> to vector<2x32xf32>
    %238 = vector.extract_strided_slice %236 {offsets = [2, 0], sizes = [2, 32], strides = [1, 1]} : vector<4x32xf32> to vector<2x32xf32>
    %cst_62 = arith.constant dense<0.000000e+00> : vector<4x192xf32>
    %239 = tpu.matmul %236, %8, %cst_62 {dimension_numbers = #tpu.dot_dimension_numbers<[1], [0], [0], [1], [0, 0, 1, 1], [], []>} : vector<4x32xf32>, vector<32x192xf32>, vector<4x192xf32> -> vector<4x192xf32>
    %c7_i32_63 = arith.constant 7 : i32
    %240 = arith.subi %c7_i32_63, %c3_i32 : i32
    %241 = arith.index_cast %c3_i32 : i32 to index
    %c0_64 = arith.constant 0 : index
    %c0_65 = arith.constant 0 : index
    %242 = vector.load %arg6[%241, %c0_64, %c0_65] : memref<8x2x192xf32, #tpu.memory_space<vmem>>, vector<1x2x192xf32>
    %243 = vector.shape_cast %242 : vector<1x2x192xf32> to vector<2x192xf32>
    %244 = arith.index_cast %240 : i32 to index
    %c0_66 = arith.constant 0 : index
    %c0_67 = arith.constant 0 : index
    %245 = vector.load %arg6[%244, %c0_66, %c0_67] : memref<8x2x192xf32, #tpu.memory_space<vmem>>, vector<1x2x192xf32>
    %246 = vector.shape_cast %245 : vector<1x2x192xf32> to vector<2x192xf32>
    %247 = vector.extract_strided_slice %243 {offsets = [0, 0], sizes = [2, 32], strides = [1, 1]} : vector<2x192xf32> to vector<2x32xf32>
    %248 = vector.extract_strided_slice %239 {offsets = [0, 0], sizes = [2, 32], strides = [1, 1]} : vector<4x192xf32> to vector<2x32xf32>
    %249 = arith.addf %247, %248 : vector<2x32xf32>
    %250 = arith.negf %249 : vector<2x32xf32>
    %251 = math.exp %250 : vector<2x32xf32>
    %cst_68 = arith.constant 1.000000e+00 : f32
    %252 = vector.broadcast %cst_68 : f32 to vector<2x32xf32>
    %253 = arith.addf %252, %251 : vector<2x32xf32>
    %254 = arith.divf %252, %253 : vector<2x32xf32>
    %255 = vector.extract_strided_slice %243 {offsets = [0, 32], sizes = [2, 32], strides = [1, 1]} : vector<2x192xf32> to vector<2x32xf32>
    %256 = vector.extract_strided_slice %239 {offsets = [0, 32], sizes = [2, 32], strides = [1, 1]} : vector<4x192xf32> to vector<2x32xf32>
    %257 = arith.addf %255, %256 : vector<2x32xf32>
    %258 = arith.negf %257 : vector<2x32xf32>
    %259 = math.exp %258 : vector<2x32xf32>
    %cst_69 = arith.constant 1.000000e+00 : f32
    %260 = vector.broadcast %cst_69 : f32 to vector<2x32xf32>
    %261 = arith.addf %260, %259 : vector<2x32xf32>
    %262 = arith.divf %260, %261 : vector<2x32xf32>
    %263 = vector.extract_strided_slice %243 {offsets = [0, 64], sizes = [2, 32], strides = [1, 1]} : vector<2x192xf32> to vector<2x32xf32>
    %264 = vector.extract_strided_slice %239 {offsets = [0, 64], sizes = [2, 32], strides = [1, 1]} : vector<4x192xf32> to vector<2x32xf32>
    %265 = vector.broadcast %9 : vector<1x32xf32> to vector<2x32xf32>
    %266 = arith.addf %264, %265 : vector<2x32xf32>
    %267 = arith.mulf %254, %266 : vector<2x32xf32>
    %268 = arith.addf %263, %267 : vector<2x32xf32>
    %269 = math.tanh %268 : vector<2x32xf32>
    %cst_70 = arith.constant 1.000000e+00 : f32
    %270 = vector.broadcast %cst_70 : f32 to vector<2x32xf32>
    %271 = arith.subf %270, %262 : vector<2x32xf32>
    %272 = arith.mulf %271, %269 : vector<2x32xf32>
    %273 = arith.mulf %262, %237 : vector<2x32xf32>
    %274 = arith.addf %272, %273 : vector<2x32xf32>
    %275 = arith.index_cast %c3_i32 : i32 to index
    %c0_71 = arith.constant 0 : index
    %c0_72 = arith.constant 0 : index
    %276 = vector.load %arg7[%275, %c0_71, %c0_72] : memref<8x2x32xf32, #tpu.memory_space<vmem>>, vector<1x2x32xf32>
    %277 = vector.shape_cast %276 : vector<1x2x32xf32> to vector<2x32xf32>
    %278 = vector.shape_cast %274 : vector<2x32xf32> to vector<1x2x32xf32>
    tpu.vector_store %arg7[%275, %c0_71, %c0_72], %278 {strides = array<i32>} : memref<8x2x32xf32, #tpu.memory_space<vmem>>, vector<1x2x32xf32>,
    %279 = vector.extract_strided_slice %246 {offsets = [0, 96], sizes = [2, 32], strides = [1, 1]} : vector<2x192xf32> to vector<2x32xf32>
    %280 = vector.extract_strided_slice %239 {offsets = [2, 96], sizes = [2, 32], strides = [1, 1]} : vector<4x192xf32> to vector<2x32xf32>
    %281 = arith.addf %279, %280 : vector<2x32xf32>
    %282 = arith.negf %281 : vector<2x32xf32>
    %283 = math.exp %282 : vector<2x32xf32>
    %cst_73 = arith.constant 1.000000e+00 : f32
    %284 = vector.broadcast %cst_73 : f32 to vector<2x32xf32>
    %285 = arith.addf %284, %283 : vector<2x32xf32>
    %286 = arith.divf %284, %285 : vector<2x32xf32>
    %287 = vector.extract_strided_slice %246 {offsets = [0, 128], sizes = [2, 32], strides = [1, 1]} : vector<2x192xf32> to vector<2x32xf32>
    %288 = vector.extract_strided_slice %239 {offsets = [2, 128], sizes = [2, 32], strides = [1, 1]} : vector<4x192xf32> to vector<2x32xf32>
    %289 = arith.addf %287, %288 : vector<2x32xf32>
    %290 = arith.negf %289 : vector<2x32xf32>
    %291 = math.exp %290 : vector<2x32xf32>
    %cst_74 = arith.constant 1.000000e+00 : f32
    %292 = vector.broadcast %cst_74 : f32 to vector<2x32xf32>
    %293 = arith.addf %292, %291 : vector<2x32xf32>
    %294 = arith.divf %292, %293 : vector<2x32xf32>
    %295 = vector.extract_strided_slice %246 {offsets = [0, 160], sizes = [2, 32], strides = [1, 1]} : vector<2x192xf32> to vector<2x32xf32>
    %296 = vector.extract_strided_slice %239 {offsets = [2, 160], sizes = [2, 32], strides = [1, 1]} : vector<4x192xf32> to vector<2x32xf32>
    %297 = vector.broadcast %10 : vector<1x32xf32> to vector<2x32xf32>
    %298 = arith.addf %296, %297 : vector<2x32xf32>
    %299 = arith.mulf %286, %298 : vector<2x32xf32>
    %300 = arith.addf %295, %299 : vector<2x32xf32>
    %301 = math.tanh %300 : vector<2x32xf32>
    %cst_75 = arith.constant 1.000000e+00 : f32
    %302 = vector.broadcast %cst_75 : f32 to vector<2x32xf32>
    %303 = arith.subf %302, %294 : vector<2x32xf32>
    %304 = arith.mulf %303, %301 : vector<2x32xf32>
    %305 = arith.mulf %294, %238 : vector<2x32xf32>
    %306 = arith.addf %304, %305 : vector<2x32xf32>
    %307 = arith.index_cast %240 : i32 to index
    %c0_76 = arith.constant 0 : index
    %c0_77 = arith.constant 0 : index
    %308 = vector.load %arg8[%307, %c0_76, %c0_77] : memref<8x2x32xf32, #tpu.memory_space<vmem>>, vector<1x2x32xf32>
    %309 = vector.shape_cast %308 : vector<1x2x32xf32> to vector<2x32xf32>
    %310 = vector.shape_cast %306 : vector<2x32xf32> to vector<1x2x32xf32>
    tpu.vector_store %arg8[%307, %c0_76, %c0_77], %310 {strides = array<i32>} : memref<8x2x32xf32, #tpu.memory_space<vmem>>, vector<1x2x32xf32>,
    %311 = tpu.concatenate %274, %306 in 0 : vector<2x32xf32>, vector<2x32xf32> -> vector<4x32xf32>
    %c4_i32 = arith.constant 4 : i32
    %312 = vector.extract_strided_slice %311 {offsets = [0, 0], sizes = [2, 32], strides = [1, 1]} : vector<4x32xf32> to vector<2x32xf32>
    %313 = vector.extract_strided_slice %311 {offsets = [2, 0], sizes = [2, 32], strides = [1, 1]} : vector<4x32xf32> to vector<2x32xf32>
    %cst_78 = arith.constant dense<0.000000e+00> : vector<4x192xf32>
    %314 = tpu.matmul %311, %8, %cst_78 {dimension_numbers = #tpu.dot_dimension_numbers<[1], [0], [0], [1], [0, 0, 1, 1], [], []>} : vector<4x32xf32>, vector<32x192xf32>, vector<4x192xf32> -> vector<4x192xf32>
    %c7_i32_79 = arith.constant 7 : i32
    %315 = arith.subi %c7_i32_79, %c4_i32 : i32
    %316 = arith.index_cast %c4_i32 : i32 to index
    %c0_80 = arith.constant 0 : index
    %c0_81 = arith.constant 0 : index
    %317 = vector.load %arg6[%316, %c0_80, %c0_81] : memref<8x2x192xf32, #tpu.memory_space<vmem>>, vector<1x2x192xf32>
    %318 = vector.shape_cast %317 : vector<1x2x192xf32> to vector<2x192xf32>
    %319 = arith.index_cast %315 : i32 to index
    %c0_82 = arith.constant 0 : index
    %c0_83 = arith.constant 0 : index
    %320 = vector.load %arg6[%319, %c0_82, %c0_83] : memref<8x2x192xf32, #tpu.memory_space<vmem>>, vector<1x2x192xf32>
    %321 = vector.shape_cast %320 : vector<1x2x192xf32> to vector<2x192xf32>
    %322 = vector.extract_strided_slice %318 {offsets = [0, 0], sizes = [2, 32], strides = [1, 1]} : vector<2x192xf32> to vector<2x32xf32>
    %323 = vector.extract_strided_slice %314 {offsets = [0, 0], sizes = [2, 32], strides = [1, 1]} : vector<4x192xf32> to vector<2x32xf32>
    %324 = arith.addf %322, %323 : vector<2x32xf32>
    %325 = arith.negf %324 : vector<2x32xf32>
    %326 = math.exp %325 : vector<2x32xf32>
    %cst_84 = arith.constant 1.000000e+00 : f32
    %327 = vector.broadcast %cst_84 : f32 to vector<2x32xf32>
    %328 = arith.addf %327, %326 : vector<2x32xf32>
    %329 = arith.divf %327, %328 : vector<2x32xf32>
    %330 = vector.extract_strided_slice %318 {offsets = [0, 32], sizes = [2, 32], strides = [1, 1]} : vector<2x192xf32> to vector<2x32xf32>
    %331 = vector.extract_strided_slice %314 {offsets = [0, 32], sizes = [2, 32], strides = [1, 1]} : vector<4x192xf32> to vector<2x32xf32>
    %332 = arith.addf %330, %331 : vector<2x32xf32>
    %333 = arith.negf %332 : vector<2x32xf32>
    %334 = math.exp %333 : vector<2x32xf32>
    %cst_85 = arith.constant 1.000000e+00 : f32
    %335 = vector.broadcast %cst_85 : f32 to vector<2x32xf32>
    %336 = arith.addf %335, %334 : vector<2x32xf32>
    %337 = arith.divf %335, %336 : vector<2x32xf32>
    %338 = vector.extract_strided_slice %318 {offsets = [0, 64], sizes = [2, 32], strides = [1, 1]} : vector<2x192xf32> to vector<2x32xf32>
    %339 = vector.extract_strided_slice %314 {offsets = [0, 64], sizes = [2, 32], strides = [1, 1]} : vector<4x192xf32> to vector<2x32xf32>
    %340 = vector.broadcast %9 : vector<1x32xf32> to vector<2x32xf32>
    %341 = arith.addf %339, %340 : vector<2x32xf32>
    %342 = arith.mulf %329, %341 : vector<2x32xf32>
    %343 = arith.addf %338, %342 : vector<2x32xf32>
    %344 = math.tanh %343 : vector<2x32xf32>
    %cst_86 = arith.constant 1.000000e+00 : f32
    %345 = vector.broadcast %cst_86 : f32 to vector<2x32xf32>
    %346 = arith.subf %345, %337 : vector<2x32xf32>
    %347 = arith.mulf %346, %344 : vector<2x32xf32>
    %348 = arith.mulf %337, %312 : vector<2x32xf32>
    %349 = arith.addf %347, %348 : vector<2x32xf32>
    %350 = arith.index_cast %c4_i32 : i32 to index
    %c0_87 = arith.constant 0 : index
    %c0_88 = arith.constant 0 : index
    %351 = vector.load %arg7[%350, %c0_87, %c0_88] : memref<8x2x32xf32, #tpu.memory_space<vmem>>, vector<1x2x32xf32>
    %352 = vector.shape_cast %351 : vector<1x2x32xf32> to vector<2x32xf32>
    %353 = vector.shape_cast %349 : vector<2x32xf32> to vector<1x2x32xf32>
    tpu.vector_store %arg7[%350, %c0_87, %c0_88], %353 {strides = array<i32>} : memref<8x2x32xf32, #tpu.memory_space<vmem>>, vector<1x2x32xf32>,
    %354 = vector.extract_strided_slice %321 {offsets = [0, 96], sizes = [2, 32], strides = [1, 1]} : vector<2x192xf32> to vector<2x32xf32>
    %355 = vector.extract_strided_slice %314 {offsets = [2, 96], sizes = [2, 32], strides = [1, 1]} : vector<4x192xf32> to vector<2x32xf32>
    %356 = arith.addf %354, %355 : vector<2x32xf32>
    %357 = arith.negf %356 : vector<2x32xf32>
    %358 = math.exp %357 : vector<2x32xf32>
    %cst_89 = arith.constant 1.000000e+00 : f32
    %359 = vector.broadcast %cst_89 : f32 to vector<2x32xf32>
    %360 = arith.addf %359, %358 : vector<2x32xf32>
    %361 = arith.divf %359, %360 : vector<2x32xf32>
    %362 = vector.extract_strided_slice %321 {offsets = [0, 128], sizes = [2, 32], strides = [1, 1]} : vector<2x192xf32> to vector<2x32xf32>
    %363 = vector.extract_strided_slice %314 {offsets = [2, 128], sizes = [2, 32], strides = [1, 1]} : vector<4x192xf32> to vector<2x32xf32>
    %364 = arith.addf %362, %363 : vector<2x32xf32>
    %365 = arith.negf %364 : vector<2x32xf32>
    %366 = math.exp %365 : vector<2x32xf32>
    %cst_90 = arith.constant 1.000000e+00 : f32
    %367 = vector.broadcast %cst_90 : f32 to vector<2x32xf32>
    %368 = arith.addf %367, %366 : vector<2x32xf32>
    %369 = arith.divf %367, %368 : vector<2x32xf32>
    %370 = vector.extract_strided_slice %321 {offsets = [0, 160], sizes = [2, 32], strides = [1, 1]} : vector<2x192xf32> to vector<2x32xf32>
    %371 = vector.extract_strided_slice %314 {offsets = [2, 160], sizes = [2, 32], strides = [1, 1]} : vector<4x192xf32> to vector<2x32xf32>
    %372 = vector.broadcast %10 : vector<1x32xf32> to vector<2x32xf32>
    %373 = arith.addf %371, %372 : vector<2x32xf32>
    %374 = arith.mulf %361, %373 : vector<2x32xf32>
    %375 = arith.addf %370, %374 : vector<2x32xf32>
    %376 = math.tanh %375 : vector<2x32xf32>
    %cst_91 = arith.constant 1.000000e+00 : f32
    %377 = vector.broadcast %cst_91 : f32 to vector<2x32xf32>
    %378 = arith.subf %377, %369 : vector<2x32xf32>
    %379 = arith.mulf %378, %376 : vector<2x32xf32>
    %380 = arith.mulf %369, %313 : vector<2x32xf32>
    %381 = arith.addf %379, %380 : vector<2x32xf32>
    %382 = arith.index_cast %315 : i32 to index
    %c0_92 = arith.constant 0 : index
    %c0_93 = arith.constant 0 : index
    %383 = vector.load %arg8[%382, %c0_92, %c0_93] : memref<8x2x32xf32, #tpu.memory_space<vmem>>, vector<1x2x32xf32>
    %384 = vector.shape_cast %383 : vector<1x2x32xf32> to vector<2x32xf32>
    %385 = vector.shape_cast %381 : vector<2x32xf32> to vector<1x2x32xf32>
    tpu.vector_store %arg8[%382, %c0_92, %c0_93], %385 {strides = array<i32>} : memref<8x2x32xf32, #tpu.memory_space<vmem>>, vector<1x2x32xf32>,
    %386 = tpu.concatenate %349, %381 in 0 : vector<2x32xf32>, vector<2x32xf32> -> vector<4x32xf32>
    %c5_i32 = arith.constant 5 : i32
    %387 = vector.extract_strided_slice %386 {offsets = [0, 0], sizes = [2, 32], strides = [1, 1]} : vector<4x32xf32> to vector<2x32xf32>
    %388 = vector.extract_strided_slice %386 {offsets = [2, 0], sizes = [2, 32], strides = [1, 1]} : vector<4x32xf32> to vector<2x32xf32>
    %cst_94 = arith.constant dense<0.000000e+00> : vector<4x192xf32>
    %389 = tpu.matmul %386, %8, %cst_94 {dimension_numbers = #tpu.dot_dimension_numbers<[1], [0], [0], [1], [0, 0, 1, 1], [], []>} : vector<4x32xf32>, vector<32x192xf32>, vector<4x192xf32> -> vector<4x192xf32>
    %c7_i32_95 = arith.constant 7 : i32
    %390 = arith.subi %c7_i32_95, %c5_i32 : i32
    %391 = arith.index_cast %c5_i32 : i32 to index
    %c0_96 = arith.constant 0 : index
    %c0_97 = arith.constant 0 : index
    %392 = vector.load %arg6[%391, %c0_96, %c0_97] : memref<8x2x192xf32, #tpu.memory_space<vmem>>, vector<1x2x192xf32>
    %393 = vector.shape_cast %392 : vector<1x2x192xf32> to vector<2x192xf32>
    %394 = arith.index_cast %390 : i32 to index
    %c0_98 = arith.constant 0 : index
    %c0_99 = arith.constant 0 : index
    %395 = vector.load %arg6[%394, %c0_98, %c0_99] : memref<8x2x192xf32, #tpu.memory_space<vmem>>, vector<1x2x192xf32>
    %396 = vector.shape_cast %395 : vector<1x2x192xf32> to vector<2x192xf32>
    %397 = vector.extract_strided_slice %393 {offsets = [0, 0], sizes = [2, 32], strides = [1, 1]} : vector<2x192xf32> to vector<2x32xf32>
    %398 = vector.extract_strided_slice %389 {offsets = [0, 0], sizes = [2, 32], strides = [1, 1]} : vector<4x192xf32> to vector<2x32xf32>
    %399 = arith.addf %397, %398 : vector<2x32xf32>
    %400 = arith.negf %399 : vector<2x32xf32>
    %401 = math.exp %400 : vector<2x32xf32>
    %cst_100 = arith.constant 1.000000e+00 : f32
    %402 = vector.broadcast %cst_100 : f32 to vector<2x32xf32>
    %403 = arith.addf %402, %401 : vector<2x32xf32>
    %404 = arith.divf %402, %403 : vector<2x32xf32>
    %405 = vector.extract_strided_slice %393 {offsets = [0, 32], sizes = [2, 32], strides = [1, 1]} : vector<2x192xf32> to vector<2x32xf32>
    %406 = vector.extract_strided_slice %389 {offsets = [0, 32], sizes = [2, 32], strides = [1, 1]} : vector<4x192xf32> to vector<2x32xf32>
    %407 = arith.addf %405, %406 : vector<2x32xf32>
    %408 = arith.negf %407 : vector<2x32xf32>
    %409 = math.exp %408 : vector<2x32xf32>
    %cst_101 = arith.constant 1.000000e+00 : f32
    %410 = vector.broadcast %cst_101 : f32 to vector<2x32xf32>
    %411 = arith.addf %410, %409 : vector<2x32xf32>
    %412 = arith.divf %410, %411 : vector<2x32xf32>
    %413 = vector.extract_strided_slice %393 {offsets = [0, 64], sizes = [2, 32], strides = [1, 1]} : vector<2x192xf32> to vector<2x32xf32>
    %414 = vector.extract_strided_slice %389 {offsets = [0, 64], sizes = [2, 32], strides = [1, 1]} : vector<4x192xf32> to vector<2x32xf32>
    %415 = vector.broadcast %9 : vector<1x32xf32> to vector<2x32xf32>
    %416 = arith.addf %414, %415 : vector<2x32xf32>
    %417 = arith.mulf %404, %416 : vector<2x32xf32>
    %418 = arith.addf %413, %417 : vector<2x32xf32>
    %419 = math.tanh %418 : vector<2x32xf32>
    %cst_102 = arith.constant 1.000000e+00 : f32
    %420 = vector.broadcast %cst_102 : f32 to vector<2x32xf32>
    %421 = arith.subf %420, %412 : vector<2x32xf32>
    %422 = arith.mulf %421, %419 : vector<2x32xf32>
    %423 = arith.mulf %412, %387 : vector<2x32xf32>
    %424 = arith.addf %422, %423 : vector<2x32xf32>
    %425 = arith.index_cast %c5_i32 : i32 to index
    %c0_103 = arith.constant 0 : index
    %c0_104 = arith.constant 0 : index
    %426 = vector.load %arg7[%425, %c0_103, %c0_104] : memref<8x2x32xf32, #tpu.memory_space<vmem>>, vector<1x2x32xf32>
    %427 = vector.shape_cast %426 : vector<1x2x32xf32> to vector<2x32xf32>
    %428 = vector.shape_cast %424 : vector<2x32xf32> to vector<1x2x32xf32>
    tpu.vector_store %arg7[%425, %c0_103, %c0_104], %428 {strides = array<i32>} : memref<8x2x32xf32, #tpu.memory_space<vmem>>, vector<1x2x32xf32>,
    %429 = vector.extract_strided_slice %396 {offsets = [0, 96], sizes = [2, 32], strides = [1, 1]} : vector<2x192xf32> to vector<2x32xf32>
    %430 = vector.extract_strided_slice %389 {offsets = [2, 96], sizes = [2, 32], strides = [1, 1]} : vector<4x192xf32> to vector<2x32xf32>
    %431 = arith.addf %429, %430 : vector<2x32xf32>
    %432 = arith.negf %431 : vector<2x32xf32>
    %433 = math.exp %432 : vector<2x32xf32>
    %cst_105 = arith.constant 1.000000e+00 : f32
    %434 = vector.broadcast %cst_105 : f32 to vector<2x32xf32>
    %435 = arith.addf %434, %433 : vector<2x32xf32>
    %436 = arith.divf %434, %435 : vector<2x32xf32>
    %437 = vector.extract_strided_slice %396 {offsets = [0, 128], sizes = [2, 32], strides = [1, 1]} : vector<2x192xf32> to vector<2x32xf32>
    %438 = vector.extract_strided_slice %389 {offsets = [2, 128], sizes = [2, 32], strides = [1, 1]} : vector<4x192xf32> to vector<2x32xf32>
    %439 = arith.addf %437, %438 : vector<2x32xf32>
    %440 = arith.negf %439 : vector<2x32xf32>
    %441 = math.exp %440 : vector<2x32xf32>
    %cst_106 = arith.constant 1.000000e+00 : f32
    %442 = vector.broadcast %cst_106 : f32 to vector<2x32xf32>
    %443 = arith.addf %442, %441 : vector<2x32xf32>
    %444 = arith.divf %442, %443 : vector<2x32xf32>
    %445 = vector.extract_strided_slice %396 {offsets = [0, 160], sizes = [2, 32], strides = [1, 1]} : vector<2x192xf32> to vector<2x32xf32>
    %446 = vector.extract_strided_slice %389 {offsets = [2, 160], sizes = [2, 32], strides = [1, 1]} : vector<4x192xf32> to vector<2x32xf32>
    %447 = vector.broadcast %10 : vector<1x32xf32> to vector<2x32xf32>
    %448 = arith.addf %446, %447 : vector<2x32xf32>
    %449 = arith.mulf %436, %448 : vector<2x32xf32>
    %450 = arith.addf %445, %449 : vector<2x32xf32>
    %451 = math.tanh %450 : vector<2x32xf32>
    %cst_107 = arith.constant 1.000000e+00 : f32
    %452 = vector.broadcast %cst_107 : f32 to vector<2x32xf32>
    %453 = arith.subf %452, %444 : vector<2x32xf32>
    %454 = arith.mulf %453, %451 : vector<2x32xf32>
    %455 = arith.mulf %444, %388 : vector<2x32xf32>
    %456 = arith.addf %454, %455 : vector<2x32xf32>
    %457 = arith.index_cast %390 : i32 to index
    %c0_108 = arith.constant 0 : index
    %c0_109 = arith.constant 0 : index
    %458 = vector.load %arg8[%457, %c0_108, %c0_109] : memref<8x2x32xf32, #tpu.memory_space<vmem>>, vector<1x2x32xf32>
    %459 = vector.shape_cast %458 : vector<1x2x32xf32> to vector<2x32xf32>
    %460 = vector.shape_cast %456 : vector<2x32xf32> to vector<1x2x32xf32>
    tpu.vector_store %arg8[%457, %c0_108, %c0_109], %460 {strides = array<i32>} : memref<8x2x32xf32, #tpu.memory_space<vmem>>, vector<1x2x32xf32>,
    %461 = tpu.concatenate %424, %456 in 0 : vector<2x32xf32>, vector<2x32xf32> -> vector<4x32xf32>
    %c6_i32 = arith.constant 6 : i32
    %462 = vector.extract_strided_slice %461 {offsets = [0, 0], sizes = [2, 32], strides = [1, 1]} : vector<4x32xf32> to vector<2x32xf32>
    %463 = vector.extract_strided_slice %461 {offsets = [2, 0], sizes = [2, 32], strides = [1, 1]} : vector<4x32xf32> to vector<2x32xf32>
    %cst_110 = arith.constant dense<0.000000e+00> : vector<4x192xf32>
    %464 = tpu.matmul %461, %8, %cst_110 {dimension_numbers = #tpu.dot_dimension_numbers<[1], [0], [0], [1], [0, 0, 1, 1], [], []>} : vector<4x32xf32>, vector<32x192xf32>, vector<4x192xf32> -> vector<4x192xf32>
    %c7_i32_111 = arith.constant 7 : i32
    %465 = arith.subi %c7_i32_111, %c6_i32 : i32
    %466 = arith.index_cast %c6_i32 : i32 to index
    %c0_112 = arith.constant 0 : index
    %c0_113 = arith.constant 0 : index
    %467 = vector.load %arg6[%466, %c0_112, %c0_113] : memref<8x2x192xf32, #tpu.memory_space<vmem>>, vector<1x2x192xf32>
    %468 = vector.shape_cast %467 : vector<1x2x192xf32> to vector<2x192xf32>
    %469 = arith.index_cast %465 : i32 to index
    %c0_114 = arith.constant 0 : index
    %c0_115 = arith.constant 0 : index
    %470 = vector.load %arg6[%469, %c0_114, %c0_115] : memref<8x2x192xf32, #tpu.memory_space<vmem>>, vector<1x2x192xf32>
    %471 = vector.shape_cast %470 : vector<1x2x192xf32> to vector<2x192xf32>
    %472 = vector.extract_strided_slice %468 {offsets = [0, 0], sizes = [2, 32], strides = [1, 1]} : vector<2x192xf32> to vector<2x32xf32>
    %473 = vector.extract_strided_slice %464 {offsets = [0, 0], sizes = [2, 32], strides = [1, 1]} : vector<4x192xf32> to vector<2x32xf32>
    %474 = arith.addf %472, %473 : vector<2x32xf32>
    %475 = arith.negf %474 : vector<2x32xf32>
    %476 = math.exp %475 : vector<2x32xf32>
    %cst_116 = arith.constant 1.000000e+00 : f32
    %477 = vector.broadcast %cst_116 : f32 to vector<2x32xf32>
    %478 = arith.addf %477, %476 : vector<2x32xf32>
    %479 = arith.divf %477, %478 : vector<2x32xf32>
    %480 = vector.extract_strided_slice %468 {offsets = [0, 32], sizes = [2, 32], strides = [1, 1]} : vector<2x192xf32> to vector<2x32xf32>
    %481 = vector.extract_strided_slice %464 {offsets = [0, 32], sizes = [2, 32], strides = [1, 1]} : vector<4x192xf32> to vector<2x32xf32>
    %482 = arith.addf %480, %481 : vector<2x32xf32>
    %483 = arith.negf %482 : vector<2x32xf32>
    %484 = math.exp %483 : vector<2x32xf32>
    %cst_117 = arith.constant 1.000000e+00 : f32
    %485 = vector.broadcast %cst_117 : f32 to vector<2x32xf32>
    %486 = arith.addf %485, %484 : vector<2x32xf32>
    %487 = arith.divf %485, %486 : vector<2x32xf32>
    %488 = vector.extract_strided_slice %468 {offsets = [0, 64], sizes = [2, 32], strides = [1, 1]} : vector<2x192xf32> to vector<2x32xf32>
    %489 = vector.extract_strided_slice %464 {offsets = [0, 64], sizes = [2, 32], strides = [1, 1]} : vector<4x192xf32> to vector<2x32xf32>
    %490 = vector.broadcast %9 : vector<1x32xf32> to vector<2x32xf32>
    %491 = arith.addf %489, %490 : vector<2x32xf32>
    %492 = arith.mulf %479, %491 : vector<2x32xf32>
    %493 = arith.addf %488, %492 : vector<2x32xf32>
    %494 = math.tanh %493 : vector<2x32xf32>
    %cst_118 = arith.constant 1.000000e+00 : f32
    %495 = vector.broadcast %cst_118 : f32 to vector<2x32xf32>
    %496 = arith.subf %495, %487 : vector<2x32xf32>
    %497 = arith.mulf %496, %494 : vector<2x32xf32>
    %498 = arith.mulf %487, %462 : vector<2x32xf32>
    %499 = arith.addf %497, %498 : vector<2x32xf32>
    %500 = arith.index_cast %c6_i32 : i32 to index
    %c0_119 = arith.constant 0 : index
    %c0_120 = arith.constant 0 : index
    %501 = vector.load %arg7[%500, %c0_119, %c0_120] : memref<8x2x32xf32, #tpu.memory_space<vmem>>, vector<1x2x32xf32>
    %502 = vector.shape_cast %501 : vector<1x2x32xf32> to vector<2x32xf32>
    %503 = vector.shape_cast %499 : vector<2x32xf32> to vector<1x2x32xf32>
    tpu.vector_store %arg7[%500, %c0_119, %c0_120], %503 {strides = array<i32>} : memref<8x2x32xf32, #tpu.memory_space<vmem>>, vector<1x2x32xf32>,
    %504 = vector.extract_strided_slice %471 {offsets = [0, 96], sizes = [2, 32], strides = [1, 1]} : vector<2x192xf32> to vector<2x32xf32>
    %505 = vector.extract_strided_slice %464 {offsets = [2, 96], sizes = [2, 32], strides = [1, 1]} : vector<4x192xf32> to vector<2x32xf32>
    %506 = arith.addf %504, %505 : vector<2x32xf32>
    %507 = arith.negf %506 : vector<2x32xf32>
    %508 = math.exp %507 : vector<2x32xf32>
    %cst_121 = arith.constant 1.000000e+00 : f32
    %509 = vector.broadcast %cst_121 : f32 to vector<2x32xf32>
    %510 = arith.addf %509, %508 : vector<2x32xf32>
    %511 = arith.divf %509, %510 : vector<2x32xf32>
    %512 = vector.extract_strided_slice %471 {offsets = [0, 128], sizes = [2, 32], strides = [1, 1]} : vector<2x192xf32> to vector<2x32xf32>
    %513 = vector.extract_strided_slice %464 {offsets = [2, 128], sizes = [2, 32], strides = [1, 1]} : vector<4x192xf32> to vector<2x32xf32>
    %514 = arith.addf %512, %513 : vector<2x32xf32>
    %515 = arith.negf %514 : vector<2x32xf32>
    %516 = math.exp %515 : vector<2x32xf32>
    %cst_122 = arith.constant 1.000000e+00 : f32
    %517 = vector.broadcast %cst_122 : f32 to vector<2x32xf32>
    %518 = arith.addf %517, %516 : vector<2x32xf32>
    %519 = arith.divf %517, %518 : vector<2x32xf32>
    %520 = vector.extract_strided_slice %471 {offsets = [0, 160], sizes = [2, 32], strides = [1, 1]} : vector<2x192xf32> to vector<2x32xf32>
    %521 = vector.extract_strided_slice %464 {offsets = [2, 160], sizes = [2, 32], strides = [1, 1]} : vector<4x192xf32> to vector<2x32xf32>
    %522 = vector.broadcast %10 : vector<1x32xf32> to vector<2x32xf32>
    %523 = arith.addf %521, %522 : vector<2x32xf32>
    %524 = arith.mulf %511, %523 : vector<2x32xf32>
    %525 = arith.addf %520, %524 : vector<2x32xf32>
    %526 = math.tanh %525 : vector<2x32xf32>
    %cst_123 = arith.constant 1.000000e+00 : f32
    %527 = vector.broadcast %cst_123 : f32 to vector<2x32xf32>
    %528 = arith.subf %527, %519 : vector<2x32xf32>
    %529 = arith.mulf %528, %526 : vector<2x32xf32>
    %530 = arith.mulf %519, %463 : vector<2x32xf32>
    %531 = arith.addf %529, %530 : vector<2x32xf32>
    %532 = arith.index_cast %465 : i32 to index
    %c0_124 = arith.constant 0 : index
    %c0_125 = arith.constant 0 : index
    %533 = vector.load %arg8[%532, %c0_124, %c0_125] : memref<8x2x32xf32, #tpu.memory_space<vmem>>, vector<1x2x32xf32>
    %534 = vector.shape_cast %533 : vector<1x2x32xf32> to vector<2x32xf32>
    %535 = vector.shape_cast %531 : vector<2x32xf32> to vector<1x2x32xf32>
    tpu.vector_store %arg8[%532, %c0_124, %c0_125], %535 {strides = array<i32>} : memref<8x2x32xf32, #tpu.memory_space<vmem>>, vector<1x2x32xf32>,
    %536 = tpu.concatenate %499, %531 in 0 : vector<2x32xf32>, vector<2x32xf32> -> vector<4x32xf32>
    %c7_i32_126 = arith.constant 7 : i32
    %537 = vector.extract_strided_slice %536 {offsets = [0, 0], sizes = [2, 32], strides = [1, 1]} : vector<4x32xf32> to vector<2x32xf32>
    %538 = vector.extract_strided_slice %536 {offsets = [2, 0], sizes = [2, 32], strides = [1, 1]} : vector<4x32xf32> to vector<2x32xf32>
    %cst_127 = arith.constant dense<0.000000e+00> : vector<4x192xf32>
    %539 = tpu.matmul %536, %8, %cst_127 {dimension_numbers = #tpu.dot_dimension_numbers<[1], [0], [0], [1], [0, 0, 1, 1], [], []>} : vector<4x32xf32>, vector<32x192xf32>, vector<4x192xf32> -> vector<4x192xf32>
    %c7_i32_128 = arith.constant 7 : i32
    %540 = arith.subi %c7_i32_128, %c7_i32_126 : i32
    %541 = arith.index_cast %c7_i32_126 : i32 to index
    %c0_129 = arith.constant 0 : index
    %c0_130 = arith.constant 0 : index
    %542 = vector.load %arg6[%541, %c0_129, %c0_130] : memref<8x2x192xf32, #tpu.memory_space<vmem>>, vector<1x2x192xf32>
    %543 = vector.shape_cast %542 : vector<1x2x192xf32> to vector<2x192xf32>
    %544 = arith.index_cast %540 : i32 to index
    %c0_131 = arith.constant 0 : index
    %c0_132 = arith.constant 0 : index
    %545 = vector.load %arg6[%544, %c0_131, %c0_132] : memref<8x2x192xf32, #tpu.memory_space<vmem>>, vector<1x2x192xf32>
    %546 = vector.shape_cast %545 : vector<1x2x192xf32> to vector<2x192xf32>
    %547 = vector.extract_strided_slice %543 {offsets = [0, 0], sizes = [2, 32], strides = [1, 1]} : vector<2x192xf32> to vector<2x32xf32>
    %548 = vector.extract_strided_slice %539 {offsets = [0, 0], sizes = [2, 32], strides = [1, 1]} : vector<4x192xf32> to vector<2x32xf32>
    %549 = arith.addf %547, %548 : vector<2x32xf32>
    %550 = arith.negf %549 : vector<2x32xf32>
    %551 = math.exp %550 : vector<2x32xf32>
    %cst_133 = arith.constant 1.000000e+00 : f32
    %552 = vector.broadcast %cst_133 : f32 to vector<2x32xf32>
    %553 = arith.addf %552, %551 : vector<2x32xf32>
    %554 = arith.divf %552, %553 : vector<2x32xf32>
    %555 = vector.extract_strided_slice %543 {offsets = [0, 32], sizes = [2, 32], strides = [1, 1]} : vector<2x192xf32> to vector<2x32xf32>
    %556 = vector.extract_strided_slice %539 {offsets = [0, 32], sizes = [2, 32], strides = [1, 1]} : vector<4x192xf32> to vector<2x32xf32>
    %557 = arith.addf %555, %556 : vector<2x32xf32>
    %558 = arith.negf %557 : vector<2x32xf32>
    %559 = math.exp %558 : vector<2x32xf32>
    %cst_134 = arith.constant 1.000000e+00 : f32
    %560 = vector.broadcast %cst_134 : f32 to vector<2x32xf32>
    %561 = arith.addf %560, %559 : vector<2x32xf32>
    %562 = arith.divf %560, %561 : vector<2x32xf32>
    %563 = vector.extract_strided_slice %543 {offsets = [0, 64], sizes = [2, 32], strides = [1, 1]} : vector<2x192xf32> to vector<2x32xf32>
    %564 = vector.extract_strided_slice %539 {offsets = [0, 64], sizes = [2, 32], strides = [1, 1]} : vector<4x192xf32> to vector<2x32xf32>
    %565 = vector.broadcast %9 : vector<1x32xf32> to vector<2x32xf32>
    %566 = arith.addf %564, %565 : vector<2x32xf32>
    %567 = arith.mulf %554, %566 : vector<2x32xf32>
    %568 = arith.addf %563, %567 : vector<2x32xf32>
    %569 = math.tanh %568 : vector<2x32xf32>
    %cst_135 = arith.constant 1.000000e+00 : f32
    %570 = vector.broadcast %cst_135 : f32 to vector<2x32xf32>
    %571 = arith.subf %570, %562 : vector<2x32xf32>
    %572 = arith.mulf %571, %569 : vector<2x32xf32>
    %573 = arith.mulf %562, %537 : vector<2x32xf32>
    %574 = arith.addf %572, %573 : vector<2x32xf32>
    %575 = arith.index_cast %c7_i32_126 : i32 to index
    %c0_136 = arith.constant 0 : index
    %c0_137 = arith.constant 0 : index
    %576 = vector.load %arg7[%575, %c0_136, %c0_137] : memref<8x2x32xf32, #tpu.memory_space<vmem>>, vector<1x2x32xf32>
    %577 = vector.shape_cast %576 : vector<1x2x32xf32> to vector<2x32xf32>
    %578 = vector.shape_cast %574 : vector<2x32xf32> to vector<1x2x32xf32>
    tpu.vector_store %arg7[%575, %c0_136, %c0_137], %578 {strides = array<i32>} : memref<8x2x32xf32, #tpu.memory_space<vmem>>, vector<1x2x32xf32>,
    %579 = vector.extract_strided_slice %546 {offsets = [0, 96], sizes = [2, 32], strides = [1, 1]} : vector<2x192xf32> to vector<2x32xf32>
    %580 = vector.extract_strided_slice %539 {offsets = [2, 96], sizes = [2, 32], strides = [1, 1]} : vector<4x192xf32> to vector<2x32xf32>
    %581 = arith.addf %579, %580 : vector<2x32xf32>
    %582 = arith.negf %581 : vector<2x32xf32>
    %583 = math.exp %582 : vector<2x32xf32>
    %cst_138 = arith.constant 1.000000e+00 : f32
    %584 = vector.broadcast %cst_138 : f32 to vector<2x32xf32>
    %585 = arith.addf %584, %583 : vector<2x32xf32>
    %586 = arith.divf %584, %585 : vector<2x32xf32>
    %587 = vector.extract_strided_slice %546 {offsets = [0, 128], sizes = [2, 32], strides = [1, 1]} : vector<2x192xf32> to vector<2x32xf32>
    %588 = vector.extract_strided_slice %539 {offsets = [2, 128], sizes = [2, 32], strides = [1, 1]} : vector<4x192xf32> to vector<2x32xf32>
    %589 = arith.addf %587, %588 : vector<2x32xf32>
    %590 = arith.negf %589 : vector<2x32xf32>
    %591 = math.exp %590 : vector<2x32xf32>
    %cst_139 = arith.constant 1.000000e+00 : f32
    %592 = vector.broadcast %cst_139 : f32 to vector<2x32xf32>
    %593 = arith.addf %592, %591 : vector<2x32xf32>
    %594 = arith.divf %592, %593 : vector<2x32xf32>
    %595 = vector.extract_strided_slice %546 {offsets = [0, 160], sizes = [2, 32], strides = [1, 1]} : vector<2x192xf32> to vector<2x32xf32>
    %596 = vector.extract_strided_slice %539 {offsets = [2, 160], sizes = [2, 32], strides = [1, 1]} : vector<4x192xf32> to vector<2x32xf32>
    %597 = vector.broadcast %10 : vector<1x32xf32> to vector<2x32xf32>
    %598 = arith.addf %596, %597 : vector<2x32xf32>
    %599 = arith.mulf %586, %598 : vector<2x32xf32>
    %600 = arith.addf %595, %599 : vector<2x32xf32>
    %601 = math.tanh %600 : vector<2x32xf32>
    %cst_140 = arith.constant 1.000000e+00 : f32
    %602 = vector.broadcast %cst_140 : f32 to vector<2x32xf32>
    %603 = arith.subf %602, %594 : vector<2x32xf32>
    %604 = arith.mulf %603, %601 : vector<2x32xf32>
    %605 = arith.mulf %594, %538 : vector<2x32xf32>
    %606 = arith.addf %604, %605 : vector<2x32xf32>
    %607 = arith.index_cast %540 : i32 to index
    %c0_141 = arith.constant 0 : index
    %c0_142 = arith.constant 0 : index
    %608 = vector.load %arg8[%607, %c0_141, %c0_142] : memref<8x2x32xf32, #tpu.memory_space<vmem>>, vector<1x2x32xf32>
    %609 = vector.shape_cast %608 : vector<1x2x32xf32> to vector<2x32xf32>
    %610 = vector.shape_cast %606 : vector<2x32xf32> to vector<1x2x32xf32>
    tpu.vector_store %arg8[%607, %c0_141, %c0_142], %610 {strides = array<i32>} : memref<8x2x32xf32, #tpu.memory_space<vmem>>, vector<1x2x32xf32>,
    %611 = tpu.concatenate %574, %606 in 0 : vector<2x32xf32>, vector<2x32xf32> -> vector<4x32xf32>
    %c8_i32 = arith.constant 8 : i32
    %c0_143 = arith.constant 0 : index
    %c0_144 = arith.constant 0 : index
    %c0_145 = arith.constant 0 : index
    %612 = vector.load %arg7[%c0_143, %c0_144, %c0_145] : memref<8x2x32xf32, #tpu.memory_space<vmem>>, vector<8x2x32xf32>
    %c0_146 = arith.constant 0 : index
    %c0_147 = arith.constant 0 : index
    %c0_148 = arith.constant 0 : index
    %613 = vector.load %arg8[%c0_146, %c0_147, %c0_148] : memref<8x2x32xf32, #tpu.memory_space<vmem>>, vector<8x2x32xf32>
    %614 = tpu.concatenate %612, %613 in 2 : vector<8x2x32xf32>, vector<8x2x32xf32> -> vector<8x2x64xf32>
    %c0_149 = arith.constant 0 : index
    %c0_150 = arith.constant 0 : index
    %c0_151 = arith.constant 0 : index
    %615 = vector.load %arg5[%c0_149, %c0_150, %c0_151] : memref<8x2x64xf32, #tpu.memory_space<vmem>>, vector<8x2x64xf32>
    tpu.vector_store %arg5[%c0_149, %c0_150, %c0_151], %614 {strides = array<i32>} : memref<8x2x64xf32, #tpu.memory_space<vmem>>, vector<8x2x64xf32>,
    return
  }
}

module attributes {stable_mosaic.version = 11 : i64} {
  func.func @_bigru_layer_kernel(%arg0: memref<8x2x64xf32, #tpu.memory_space<vmem>>, %arg1: memref<64x192xf32, #tpu.memory_space<vmem>>, %arg2: memref<1x192xf32, #tpu.memory_space<vmem>>, %arg3: memref<32x192xf32, #tpu.memory_space<vmem>>, %arg4: memref<1x64xf32, #tpu.memory_space<vmem>>, %arg5: memref<8x2x64xf32, #tpu.memory_space<vmem>>, %arg6: memref<8x2x192xf32, #tpu.memory_space<vmem>>, %arg7: memref<8x2x32xf32, #tpu.memory_space<vmem>>, %arg8: memref<8x2x32xf32, #tpu.memory_space<vmem>>) attributes {dimension_semantics = [], scalar_prefetch = 0 : i64, scratch_operands = 3 : i64, tpu.core_type = #tpu.core_type<tc>} {
    %c0 = arith.constant 0 : index
    %c0_0 = arith.constant 0 : index
    %c0_1 = arith.constant 0 : index
    %0 = vector.load %arg0[%c0, %c0_0, %c0_1] : memref<8x2x64xf32, #tpu.memory_space<vmem>>, vector<8x2x64xf32>
    %c0_2 = arith.constant 0 : index
    %c0_3 = arith.constant 0 : index
    %1 = vector.load %arg1[%c0_2, %c0_3] : memref<64x192xf32, #tpu.memory_space<vmem>>, vector<64x192xf32>
    "tpu.trace_start"() <{level = 10 : i32, message = "sbd,dg->sbg"}> : () -> ()
    %cst = arith.constant dense<0.000000e+00> : vector<8x2x192xf32>
    %2 = tpu.matmul %0, %1, %cst {dimension_numbers = #tpu.dot_dimension_numbers<[2], [0], [0, 1], [1], [0, 0, 0, 1, 1, 1], [], []>} : vector<8x2x64xf32>, vector<64x192xf32>, vector<8x2x192xf32> -> vector<8x2x192xf32>
    "tpu.trace_stop"() : () -> ()
    %c0_4 = arith.constant 0 : index
    %c0_5 = arith.constant 0 : index
    %3 = vector.load %arg2[%c0_4, %c0_5] : memref<1x192xf32, #tpu.memory_space<vmem>>, vector<1x192xf32>
    %4 = vector.shape_cast %3 : vector<1x192xf32> to vector<1x1x192xf32>
    %5 = vector.broadcast %4 : vector<1x1x192xf32> to vector<8x2x192xf32>
    %6 = arith.addf %2, %5 : vector<8x2x192xf32>
    %c0_6 = arith.constant 0 : index
    %c0_7 = arith.constant 0 : index
    %c0_8 = arith.constant 0 : index
    %7 = vector.load %arg6[%c0_6, %c0_7, %c0_8] : memref<8x2x192xf32, #tpu.memory_space<vmem>>, vector<8x2x192xf32>
    tpu.vector_store %arg6[%c0_6, %c0_7, %c0_8], %6 {strides = array<i32>} : memref<8x2x192xf32, #tpu.memory_space<vmem>>, vector<8x2x192xf32>,
    %c0_9 = arith.constant 0 : index
    %c0_10 = arith.constant 0 : index
    %8 = vector.load %arg3[%c0_9, %c0_10] : memref<32x192xf32, #tpu.memory_space<vmem>>, vector<32x192xf32>
    %c0_11 = arith.constant 0 : index
    %c0_12 = arith.constant 0 : index
    %9 = vector.load %arg4[%c0_11, %c0_12] : memref<1x64xf32, #tpu.memory_space<vmem>>, vector<1x32xf32>
    %c0_13 = arith.constant 0 : index
    %c32 = arith.constant 32 : index
    %10 = vector.load %arg4[%c0_13, %c32] : memref<1x64xf32, #tpu.memory_space<vmem>>, vector<1x32xf32>
    %cst_14 = arith.constant 0.000000e+00 : f32
    %11 = vector.broadcast %cst_14 : f32 to vector<4x32xf32>
    %c0_i32 = arith.constant 0 : i32
    %12 = vector.extract_strided_slice %11 {offsets = [0, 0], sizes = [2, 32], strides = [1, 1]} : vector<4x32xf32> to vector<2x32xf32>
    %13 = vector.extract_strided_slice %11 {offsets = [2, 0], sizes = [2, 32], strides = [1, 1]} : vector<4x32xf32> to vector<2x32xf32>
    %cst_15 = arith.constant dense<0.000000e+00> : vector<4x192xf32>
    %14 = tpu.matmul %11, %8, %cst_15 {dimension_numbers = #tpu.dot_dimension_numbers<[1], [0], [0], [1], [0, 0, 1, 1], [], []>} : vector<4x32xf32>, vector<32x192xf32>, vector<4x192xf32> -> vector<4x192xf32>
    %c7_i32 = arith.constant 7 : i32
    %15 = arith.subi %c7_i32, %c0_i32 : i32
    %16 = arith.index_cast %c0_i32 : i32 to index
    %c0_16 = arith.constant 0 : index
    %c0_17 = arith.constant 0 : index
    %17 = vector.load %arg6[%16, %c0_16, %c0_17] : memref<8x2x192xf32, #tpu.memory_space<vmem>>, vector<1x2x192xf32>
    %18 = vector.shape_cast %17 : vector<1x2x192xf32> to vector<2x192xf32>
    %19 = arith.index_cast %15 : i32 to index
    %c0_18 = arith.constant 0 : index
    %c0_19 = arith.constant 0 : index
    %20 = vector.load %arg6[%19, %c0_18, %c0_19] : memref<8x2x192xf32, #tpu.memory_space<vmem>>, vector<1x2x192xf32>
    %21 = vector.shape_cast %20 : vector<1x2x192xf32> to vector<2x192xf32>
    %22 = vector.extract_strided_slice %18 {offsets = [0, 0], sizes = [2, 32], strides = [1, 1]} : vector<2x192xf32> to vector<2x32xf32>
    %23 = vector.extract_strided_slice %14 {offsets = [0, 0], sizes = [2, 32], strides = [1, 1]} : vector<4x192xf32> to vector<2x32xf32>
    %24 = arith.addf %22, %23 : vector<2x32xf32>
    %25 = arith.negf %24 : vector<2x32xf32>
    %26 = math.exp %25 : vector<2x32xf32>
    %cst_20 = arith.constant 1.000000e+00 : f32
    %27 = vector.broadcast %cst_20 : f32 to vector<2x32xf32>
    %28 = arith.addf %27, %26 : vector<2x32xf32>
    %29 = arith.divf %27, %28 : vector<2x32xf32>
    %30 = vector.extract_strided_slice %18 {offsets = [0, 32], sizes = [2, 32], strides = [1, 1]} : vector<2x192xf32> to vector<2x32xf32>
    %31 = vector.extract_strided_slice %14 {offsets = [0, 32], sizes = [2, 32], strides = [1, 1]} : vector<4x192xf32> to vector<2x32xf32>
    %32 = arith.addf %30, %31 : vector<2x32xf32>
    %33 = arith.negf %32 : vector<2x32xf32>
    %34 = math.exp %33 : vector<2x32xf32>
    %cst_21 = arith.constant 1.000000e+00 : f32
    %35 = vector.broadcast %cst_21 : f32 to vector<2x32xf32>
    %36 = arith.addf %35, %34 : vector<2x32xf32>
    %37 = arith.divf %35, %36 : vector<2x32xf32>
    %38 = vector.extract_strided_slice %18 {offsets = [0, 64], sizes = [2, 32], strides = [1, 1]} : vector<2x192xf32> to vector<2x32xf32>
    %39 = vector.extract_strided_slice %14 {offsets = [0, 64], sizes = [2, 32], strides = [1, 1]} : vector<4x192xf32> to vector<2x32xf32>
    %40 = vector.broadcast %9 : vector<1x32xf32> to vector<2x32xf32>
    %41 = arith.addf %39, %40 : vector<2x32xf32>
    %42 = arith.mulf %29, %41 : vector<2x32xf32>
    %43 = arith.addf %38, %42 : vector<2x32xf32>
    %44 = math.tanh %43 : vector<2x32xf32>
    %cst_22 = arith.constant 1.000000e+00 : f32
    %45 = vector.broadcast %cst_22 : f32 to vector<2x32xf32>
    %46 = arith.subf %45, %37 : vector<2x32xf32>
    %47 = arith.mulf %46, %44 : vector<2x32xf32>
    %48 = arith.mulf %37, %12 : vector<2x32xf32>
    %49 = arith.addf %47, %48 : vector<2x32xf32>
    %50 = arith.index_cast %c0_i32 : i32 to index
    %c0_23 = arith.constant 0 : index
    %c0_24 = arith.constant 0 : index
    %51 = vector.load %arg7[%50, %c0_23, %c0_24] : memref<8x2x32xf32, #tpu.memory_space<vmem>>, vector<1x2x32xf32>
    %52 = vector.shape_cast %51 : vector<1x2x32xf32> to vector<2x32xf32>
    %53 = vector.shape_cast %49 : vector<2x32xf32> to vector<1x2x32xf32>
    tpu.vector_store %arg7[%50, %c0_23, %c0_24], %53 {strides = array<i32>} : memref<8x2x32xf32, #tpu.memory_space<vmem>>, vector<1x2x32xf32>,
    %54 = vector.extract_strided_slice %21 {offsets = [0, 96], sizes = [2, 32], strides = [1, 1]} : vector<2x192xf32> to vector<2x32xf32>
    %55 = vector.extract_strided_slice %14 {offsets = [2, 96], sizes = [2, 32], strides = [1, 1]} : vector<4x192xf32> to vector<2x32xf32>
    %56 = arith.addf %54, %55 : vector<2x32xf32>
    %57 = arith.negf %56 : vector<2x32xf32>
    %58 = math.exp %57 : vector<2x32xf32>
    %cst_25 = arith.constant 1.000000e+00 : f32
    %59 = vector.broadcast %cst_25 : f32 to vector<2x32xf32>
    %60 = arith.addf %59, %58 : vector<2x32xf32>
    %61 = arith.divf %59, %60 : vector<2x32xf32>
    %62 = vector.extract_strided_slice %21 {offsets = [0, 128], sizes = [2, 32], strides = [1, 1]} : vector<2x192xf32> to vector<2x32xf32>
    %63 = vector.extract_strided_slice %14 {offsets = [2, 128], sizes = [2, 32], strides = [1, 1]} : vector<4x192xf32> to vector<2x32xf32>
    %64 = arith.addf %62, %63 : vector<2x32xf32>
    %65 = arith.negf %64 : vector<2x32xf32>
    %66 = math.exp %65 : vector<2x32xf32>
    %cst_26 = arith.constant 1.000000e+00 : f32
    %67 = vector.broadcast %cst_26 : f32 to vector<2x32xf32>
    %68 = arith.addf %67, %66 : vector<2x32xf32>
    %69 = arith.divf %67, %68 : vector<2x32xf32>
    %70 = vector.extract_strided_slice %21 {offsets = [0, 160], sizes = [2, 32], strides = [1, 1]} : vector<2x192xf32> to vector<2x32xf32>
    %71 = vector.extract_strided_slice %14 {offsets = [2, 160], sizes = [2, 32], strides = [1, 1]} : vector<4x192xf32> to vector<2x32xf32>
    %72 = vector.broadcast %10 : vector<1x32xf32> to vector<2x32xf32>
    %73 = arith.addf %71, %72 : vector<2x32xf32>
    %74 = arith.mulf %61, %73 : vector<2x32xf32>
    %75 = arith.addf %70, %74 : vector<2x32xf32>
    %76 = math.tanh %75 : vector<2x32xf32>
    %cst_27 = arith.constant 1.000000e+00 : f32
    %77 = vector.broadcast %cst_27 : f32 to vector<2x32xf32>
    %78 = arith.subf %77, %69 : vector<2x32xf32>
    %79 = arith.mulf %78, %76 : vector<2x32xf32>
    %80 = arith.mulf %69, %13 : vector<2x32xf32>
    %81 = arith.addf %79, %80 : vector<2x32xf32>
    %82 = arith.index_cast %15 : i32 to index
    %c0_28 = arith.constant 0 : index
    %c0_29 = arith.constant 0 : index
    %83 = vector.load %arg8[%82, %c0_28, %c0_29] : memref<8x2x32xf32, #tpu.memory_space<vmem>>, vector<1x2x32xf32>
    %84 = vector.shape_cast %83 : vector<1x2x32xf32> to vector<2x32xf32>
    %85 = vector.shape_cast %81 : vector<2x32xf32> to vector<1x2x32xf32>
    tpu.vector_store %arg8[%82, %c0_28, %c0_29], %85 {strides = array<i32>} : memref<8x2x32xf32, #tpu.memory_space<vmem>>, vector<1x2x32xf32>,
    %86 = tpu.concatenate %49, %81 in 0 : vector<2x32xf32>, vector<2x32xf32> -> vector<4x32xf32>
    %c1_i32 = arith.constant 1 : i32
    %87 = vector.extract_strided_slice %86 {offsets = [0, 0], sizes = [2, 32], strides = [1, 1]} : vector<4x32xf32> to vector<2x32xf32>
    %88 = vector.extract_strided_slice %86 {offsets = [2, 0], sizes = [2, 32], strides = [1, 1]} : vector<4x32xf32> to vector<2x32xf32>
    %cst_30 = arith.constant dense<0.000000e+00> : vector<4x192xf32>
    %89 = tpu.matmul %86, %8, %cst_30 {dimension_numbers = #tpu.dot_dimension_numbers<[1], [0], [0], [1], [0, 0, 1, 1], [], []>} : vector<4x32xf32>, vector<32x192xf32>, vector<4x192xf32> -> vector<4x192xf32>
    %c7_i32_31 = arith.constant 7 : i32
    %90 = arith.subi %c7_i32_31, %c1_i32 : i32
    %91 = arith.index_cast %c1_i32 : i32 to index
    %c0_32 = arith.constant 0 : index
    %c0_33 = arith.constant 0 : index
    %92 = vector.load %arg6[%91, %c0_32, %c0_33] : memref<8x2x192xf32, #tpu.memory_space<vmem>>, vector<1x2x192xf32>
    %93 = vector.shape_cast %92 : vector<1x2x192xf32> to vector<2x192xf32>
    %94 = arith.index_cast %90 : i32 to index
    %c0_34 = arith.constant 0 : index
    %c0_35 = arith.constant 0 : index
    %95 = vector.load %arg6[%94, %c0_34, %c0_35] : memref<8x2x192xf32, #tpu.memory_space<vmem>>, vector<1x2x192xf32>
    %96 = vector.shape_cast %95 : vector<1x2x192xf32> to vector<2x192xf32>
    %97 = vector.extract_strided_slice %93 {offsets = [0, 0], sizes = [2, 32], strides = [1, 1]} : vector<2x192xf32> to vector<2x32xf32>
    %98 = vector.extract_strided_slice %89 {offsets = [0, 0], sizes = [2, 32], strides = [1, 1]} : vector<4x192xf32> to vector<2x32xf32>
    %99 = arith.addf %97, %98 : vector<2x32xf32>
    %100 = arith.negf %99 : vector<2x32xf32>
    %101 = math.exp %100 : vector<2x32xf32>
    %cst_36 = arith.constant 1.000000e+00 : f32
    %102 = vector.broadcast %cst_36 : f32 to vector<2x32xf32>
    %103 = arith.addf %102, %101 : vector<2x32xf32>
    %104 = arith.divf %102, %103 : vector<2x32xf32>
    %105 = vector.extract_strided_slice %93 {offsets = [0, 32], sizes = [2, 32], strides = [1, 1]} : vector<2x192xf32> to vector<2x32xf32>
    %106 = vector.extract_strided_slice %89 {offsets = [0, 32], sizes = [2, 32], strides = [1, 1]} : vector<4x192xf32> to vector<2x32xf32>
    %107 = arith.addf %105, %106 : vector<2x32xf32>
    %108 = arith.negf %107 : vector<2x32xf32>
    %109 = math.exp %108 : vector<2x32xf32>
    %cst_37 = arith.constant 1.000000e+00 : f32
    %110 = vector.broadcast %cst_37 : f32 to vector<2x32xf32>
    %111 = arith.addf %110, %109 : vector<2x32xf32>
    %112 = arith.divf %110, %111 : vector<2x32xf32>
    %113 = vector.extract_strided_slice %93 {offsets = [0, 64], sizes = [2, 32], strides = [1, 1]} : vector<2x192xf32> to vector<2x32xf32>
    %114 = vector.extract_strided_slice %89 {offsets = [0, 64], sizes = [2, 32], strides = [1, 1]} : vector<4x192xf32> to vector<2x32xf32>
    %115 = vector.broadcast %9 : vector<1x32xf32> to vector<2x32xf32>
    %116 = arith.addf %114, %115 : vector<2x32xf32>
    %117 = arith.mulf %104, %116 : vector<2x32xf32>
    %118 = arith.addf %113, %117 : vector<2x32xf32>
    %119 = math.tanh %118 : vector<2x32xf32>
    %cst_38 = arith.constant 1.000000e+00 : f32
    %120 = vector.broadcast %cst_38 : f32 to vector<2x32xf32>
    %121 = arith.subf %120, %112 : vector<2x32xf32>
    %122 = arith.mulf %121, %119 : vector<2x32xf32>
    %123 = arith.mulf %112, %87 : vector<2x32xf32>
    %124 = arith.addf %122, %123 : vector<2x32xf32>
    %125 = arith.index_cast %c1_i32 : i32 to index
    %c0_39 = arith.constant 0 : index
    %c0_40 = arith.constant 0 : index
    %126 = vector.load %arg7[%125, %c0_39, %c0_40] : memref<8x2x32xf32, #tpu.memory_space<vmem>>, vector<1x2x32xf32>
    %127 = vector.shape_cast %126 : vector<1x2x32xf32> to vector<2x32xf32>
    %128 = vector.shape_cast %124 : vector<2x32xf32> to vector<1x2x32xf32>
    tpu.vector_store %arg7[%125, %c0_39, %c0_40], %128 {strides = array<i32>} : memref<8x2x32xf32, #tpu.memory_space<vmem>>, vector<1x2x32xf32>,
    %129 = vector.extract_strided_slice %96 {offsets = [0, 96], sizes = [2, 32], strides = [1, 1]} : vector<2x192xf32> to vector<2x32xf32>
    %130 = vector.extract_strided_slice %89 {offsets = [2, 96], sizes = [2, 32], strides = [1, 1]} : vector<4x192xf32> to vector<2x32xf32>
    %131 = arith.addf %129, %130 : vector<2x32xf32>
    %132 = arith.negf %131 : vector<2x32xf32>
    %133 = math.exp %132 : vector<2x32xf32>
    %cst_41 = arith.constant 1.000000e+00 : f32
    %134 = vector.broadcast %cst_41 : f32 to vector<2x32xf32>
    %135 = arith.addf %134, %133 : vector<2x32xf32>
    %136 = arith.divf %134, %135 : vector<2x32xf32>
    %137 = vector.extract_strided_slice %96 {offsets = [0, 128], sizes = [2, 32], strides = [1, 1]} : vector<2x192xf32> to vector<2x32xf32>
    %138 = vector.extract_strided_slice %89 {offsets = [2, 128], sizes = [2, 32], strides = [1, 1]} : vector<4x192xf32> to vector<2x32xf32>
    %139 = arith.addf %137, %138 : vector<2x32xf32>
    %140 = arith.negf %139 : vector<2x32xf32>
    %141 = math.exp %140 : vector<2x32xf32>
    %cst_42 = arith.constant 1.000000e+00 : f32
    %142 = vector.broadcast %cst_42 : f32 to vector<2x32xf32>
    %143 = arith.addf %142, %141 : vector<2x32xf32>
    %144 = arith.divf %142, %143 : vector<2x32xf32>
    %145 = vector.extract_strided_slice %96 {offsets = [0, 160], sizes = [2, 32], strides = [1, 1]} : vector<2x192xf32> to vector<2x32xf32>
    %146 = vector.extract_strided_slice %89 {offsets = [2, 160], sizes = [2, 32], strides = [1, 1]} : vector<4x192xf32> to vector<2x32xf32>
    %147 = vector.broadcast %10 : vector<1x32xf32> to vector<2x32xf32>
    %148 = arith.addf %146, %147 : vector<2x32xf32>
    %149 = arith.mulf %136, %148 : vector<2x32xf32>
    %150 = arith.addf %145, %149 : vector<2x32xf32>
    %151 = math.tanh %150 : vector<2x32xf32>
    %cst_43 = arith.constant 1.000000e+00 : f32
    %152 = vector.broadcast %cst_43 : f32 to vector<2x32xf32>
    %153 = arith.subf %152, %144 : vector<2x32xf32>
    %154 = arith.mulf %153, %151 : vector<2x32xf32>
    %155 = arith.mulf %144, %88 : vector<2x32xf32>
    %156 = arith.addf %154, %155 : vector<2x32xf32>
    %157 = arith.index_cast %90 : i32 to index
    %c0_44 = arith.constant 0 : index
    %c0_45 = arith.constant 0 : index
    %158 = vector.load %arg8[%157, %c0_44, %c0_45] : memref<8x2x32xf32, #tpu.memory_space<vmem>>, vector<1x2x32xf32>
    %159 = vector.shape_cast %158 : vector<1x2x32xf32> to vector<2x32xf32>
    %160 = vector.shape_cast %156 : vector<2x32xf32> to vector<1x2x32xf32>
    tpu.vector_store %arg8[%157, %c0_44, %c0_45], %160 {strides = array<i32>} : memref<8x2x32xf32, #tpu.memory_space<vmem>>, vector<1x2x32xf32>,
    %161 = tpu.concatenate %124, %156 in 0 : vector<2x32xf32>, vector<2x32xf32> -> vector<4x32xf32>
    %c2_i32 = arith.constant 2 : i32
    %162 = vector.extract_strided_slice %161 {offsets = [0, 0], sizes = [2, 32], strides = [1, 1]} : vector<4x32xf32> to vector<2x32xf32>
    %163 = vector.extract_strided_slice %161 {offsets = [2, 0], sizes = [2, 32], strides = [1, 1]} : vector<4x32xf32> to vector<2x32xf32>
    %cst_46 = arith.constant dense<0.000000e+00> : vector<4x192xf32>
    %164 = tpu.matmul %161, %8, %cst_46 {dimension_numbers = #tpu.dot_dimension_numbers<[1], [0], [0], [1], [0, 0, 1, 1], [], []>} : vector<4x32xf32>, vector<32x192xf32>, vector<4x192xf32> -> vector<4x192xf32>
    %c7_i32_47 = arith.constant 7 : i32
    %165 = arith.subi %c7_i32_47, %c2_i32 : i32
    %166 = arith.index_cast %c2_i32 : i32 to index
    %c0_48 = arith.constant 0 : index
    %c0_49 = arith.constant 0 : index
    %167 = vector.load %arg6[%166, %c0_48, %c0_49] : memref<8x2x192xf32, #tpu.memory_space<vmem>>, vector<1x2x192xf32>
    %168 = vector.shape_cast %167 : vector<1x2x192xf32> to vector<2x192xf32>
    %169 = arith.index_cast %165 : i32 to index
    %c0_50 = arith.constant 0 : index
    %c0_51 = arith.constant 0 : index
    %170 = vector.load %arg6[%169, %c0_50, %c0_51] : memref<8x2x192xf32, #tpu.memory_space<vmem>>, vector<1x2x192xf32>
    %171 = vector.shape_cast %170 : vector<1x2x192xf32> to vector<2x192xf32>
    %172 = vector.extract_strided_slice %168 {offsets = [0, 0], sizes = [2, 32], strides = [1, 1]} : vector<2x192xf32> to vector<2x32xf32>
    %173 = vector.extract_strided_slice %164 {offsets = [0, 0], sizes = [2, 32], strides = [1, 1]} : vector<4x192xf32> to vector<2x32xf32>
    %174 = arith.addf %172, %173 : vector<2x32xf32>
    %175 = arith.negf %174 : vector<2x32xf32>
    %176 = math.exp %175 : vector<2x32xf32>
    %cst_52 = arith.constant 1.000000e+00 : f32
    %177 = vector.broadcast %cst_52 : f32 to vector<2x32xf32>
    %178 = arith.addf %177, %176 : vector<2x32xf32>
    %179 = arith.divf %177, %178 : vector<2x32xf32>
    %180 = vector.extract_strided_slice %168 {offsets = [0, 32], sizes = [2, 32], strides = [1, 1]} : vector<2x192xf32> to vector<2x32xf32>
    %181 = vector.extract_strided_slice %164 {offsets = [0, 32], sizes = [2, 32], strides = [1, 1]} : vector<4x192xf32> to vector<2x32xf32>
    %182 = arith.addf %180, %181 : vector<2x32xf32>
    %183 = arith.negf %182 : vector<2x32xf32>
    %184 = math.exp %183 : vector<2x32xf32>
    %cst_53 = arith.constant 1.000000e+00 : f32
    %185 = vector.broadcast %cst_53 : f32 to vector<2x32xf32>
    %186 = arith.addf %185, %184 : vector<2x32xf32>
    %187 = arith.divf %185, %186 : vector<2x32xf32>
    %188 = vector.extract_strided_slice %168 {offsets = [0, 64], sizes = [2, 32], strides = [1, 1]} : vector<2x192xf32> to vector<2x32xf32>
    %189 = vector.extract_strided_slice %164 {offsets = [0, 64], sizes = [2, 32], strides = [1, 1]} : vector<4x192xf32> to vector<2x32xf32>
    %190 = vector.broadcast %9 : vector<1x32xf32> to vector<2x32xf32>
    %191 = arith.addf %189, %190 : vector<2x32xf32>
    %192 = arith.mulf %179, %191 : vector<2x32xf32>
    %193 = arith.addf %188, %192 : vector<2x32xf32>
    %194 = math.tanh %193 : vector<2x32xf32>
    %cst_54 = arith.constant 1.000000e+00 : f32
    %195 = vector.broadcast %cst_54 : f32 to vector<2x32xf32>
    %196 = arith.subf %195, %187 : vector<2x32xf32>
    %197 = arith.mulf %196, %194 : vector<2x32xf32>
    %198 = arith.mulf %187, %162 : vector<2x32xf32>
    %199 = arith.addf %197, %198 : vector<2x32xf32>
    %200 = arith.index_cast %c2_i32 : i32 to index
    %c0_55 = arith.constant 0 : index
    %c0_56 = arith.constant 0 : index
    %201 = vector.load %arg7[%200, %c0_55, %c0_56] : memref<8x2x32xf32, #tpu.memory_space<vmem>>, vector<1x2x32xf32>
    %202 = vector.shape_cast %201 : vector<1x2x32xf32> to vector<2x32xf32>
    %203 = vector.shape_cast %199 : vector<2x32xf32> to vector<1x2x32xf32>
    tpu.vector_store %arg7[%200, %c0_55, %c0_56], %203 {strides = array<i32>} : memref<8x2x32xf32, #tpu.memory_space<vmem>>, vector<1x2x32xf32>,
    %204 = vector.extract_strided_slice %171 {offsets = [0, 96], sizes = [2, 32], strides = [1, 1]} : vector<2x192xf32> to vector<2x32xf32>
    %205 = vector.extract_strided_slice %164 {offsets = [2, 96], sizes = [2, 32], strides = [1, 1]} : vector<4x192xf32> to vector<2x32xf32>
    %206 = arith.addf %204, %205 : vector<2x32xf32>
    %207 = arith.negf %206 : vector<2x32xf32>
    %208 = math.exp %207 : vector<2x32xf32>
    %cst_57 = arith.constant 1.000000e+00 : f32
    %209 = vector.broadcast %cst_57 : f32 to vector<2x32xf32>
    %210 = arith.addf %209, %208 : vector<2x32xf32>
    %211 = arith.divf %209, %210 : vector<2x32xf32>
    %212 = vector.extract_strided_slice %171 {offsets = [0, 128], sizes = [2, 32], strides = [1, 1]} : vector<2x192xf32> to vector<2x32xf32>
    %213 = vector.extract_strided_slice %164 {offsets = [2, 128], sizes = [2, 32], strides = [1, 1]} : vector<4x192xf32> to vector<2x32xf32>
    %214 = arith.addf %212, %213 : vector<2x32xf32>
    %215 = arith.negf %214 : vector<2x32xf32>
    %216 = math.exp %215 : vector<2x32xf32>
    %cst_58 = arith.constant 1.000000e+00 : f32
    %217 = vector.broadcast %cst_58 : f32 to vector<2x32xf32>
    %218 = arith.addf %217, %216 : vector<2x32xf32>
    %219 = arith.divf %217, %218 : vector<2x32xf32>
    %220 = vector.extract_strided_slice %171 {offsets = [0, 160], sizes = [2, 32], strides = [1, 1]} : vector<2x192xf32> to vector<2x32xf32>
    %221 = vector.extract_strided_slice %164 {offsets = [2, 160], sizes = [2, 32], strides = [1, 1]} : vector<4x192xf32> to vector<2x32xf32>
    %222 = vector.broadcast %10 : vector<1x32xf32> to vector<2x32xf32>
    %223 = arith.addf %221, %222 : vector<2x32xf32>
    %224 = arith.mulf %211, %223 : vector<2x32xf32>
    %225 = arith.addf %220, %224 : vector<2x32xf32>
    %226 = math.tanh %225 : vector<2x32xf32>
    %cst_59 = arith.constant 1.000000e+00 : f32
    %227 = vector.broadcast %cst_59 : f32 to vector<2x32xf32>
    %228 = arith.subf %227, %219 : vector<2x32xf32>
    %229 = arith.mulf %228, %226 : vector<2x32xf32>
    %230 = arith.mulf %219, %163 : vector<2x32xf32>
    %231 = arith.addf %229, %230 : vector<2x32xf32>
    %232 = arith.index_cast %165 : i32 to index
    %c0_60 = arith.constant 0 : index
    %c0_61 = arith.constant 0 : index
    %233 = vector.load %arg8[%232, %c0_60, %c0_61] : memref<8x2x32xf32, #tpu.memory_space<vmem>>, vector<1x2x32xf32>
    %234 = vector.shape_cast %233 : vector<1x2x32xf32> to vector<2x32xf32>
    %235 = vector.shape_cast %231 : vector<2x32xf32> to vector<1x2x32xf32>
    tpu.vector_store %arg8[%232, %c0_60, %c0_61], %235 {strides = array<i32>} : memref<8x2x32xf32, #tpu.memory_space<vmem>>, vector<1x2x32xf32>,
    %236 = tpu.concatenate %199, %231 in 0 : vector<2x32xf32>, vector<2x32xf32> -> vector<4x32xf32>
    %c3_i32 = arith.constant 3 : i32
    %237 = vector.extract_strided_slice %236 {offsets = [0, 0], sizes = [2, 32], strides = [1, 1]} : vector<4x32xf32> to vector<2x32xf32>
    %238 = vector.extract_strided_slice %236 {offsets = [2, 0], sizes = [2, 32], strides = [1, 1]} : vector<4x32xf32> to vector<2x32xf32>
    %cst_62 = arith.constant dense<0.000000e+00> : vector<4x192xf32>
    %239 = tpu.matmul %236, %8, %cst_62 {dimension_numbers = #tpu.dot_dimension_numbers<[1], [0], [0], [1], [0, 0, 1, 1], [], []>} : vector<4x32xf32>, vector<32x192xf32>, vector<4x192xf32> -> vector<4x192xf32>
    %c7_i32_63 = arith.constant 7 : i32
    %240 = arith.subi %c7_i32_63, %c3_i32 : i32
    %241 = arith.index_cast %c3_i32 : i32 to index
    %c0_64 = arith.constant 0 : index
    %c0_65 = arith.constant 0 : index
    %242 = vector.load %arg6[%241, %c0_64, %c0_65] : memref<8x2x192xf32, #tpu.memory_space<vmem>>, vector<1x2x192xf32>
    %243 = vector.shape_cast %242 : vector<1x2x192xf32> to vector<2x192xf32>
    %244 = arith.index_cast %240 : i32 to index
    %c0_66 = arith.constant 0 : index
    %c0_67 = arith.constant 0 : index
    %245 = vector.load %arg6[%244, %c0_66, %c0_67] : memref<8x2x192xf32, #tpu.memory_space<vmem>>, vector<1x2x192xf32>
    %246 = vector.shape_cast %245 : vector<1x2x192xf32> to vector<2x192xf32>
    %247 = vector.extract_strided_slice %243 {offsets = [0, 0], sizes = [2, 32], strides = [1, 1]} : vector<2x192xf32> to vector<2x32xf32>
    %248 = vector.extract_strided_slice %239 {offsets = [0, 0], sizes = [2, 32], strides = [1, 1]} : vector<4x192xf32> to vector<2x32xf32>
    %249 = arith.addf %247, %248 : vector<2x32xf32>
    %250 = arith.negf %249 : vector<2x32xf32>
    %251 = math.exp %250 : vector<2x32xf32>
    %cst_68 = arith.constant 1.000000e+00 : f32
    %252 = vector.broadcast %cst_68 : f32 to vector<2x32xf32>
    %253 = arith.addf %252, %251 : vector<2x32xf32>
    %254 = arith.divf %252, %253 : vector<2x32xf32>
    %255 = vector.extract_strided_slice %243 {offsets = [0, 32], sizes = [2, 32], strides = [1, 1]} : vector<2x192xf32> to vector<2x32xf32>
    %256 = vector.extract_strided_slice %239 {offsets = [0, 32], sizes = [2, 32], strides = [1, 1]} : vector<4x192xf32> to vector<2x32xf32>
    %257 = arith.addf %255, %256 : vector<2x32xf32>
    %258 = arith.negf %257 : vector<2x32xf32>
    %259 = math.exp %258 : vector<2x32xf32>
    %cst_69 = arith.constant 1.000000e+00 : f32
    %260 = vector.broadcast %cst_69 : f32 to vector<2x32xf32>
    %261 = arith.addf %260, %259 : vector<2x32xf32>
    %262 = arith.divf %260, %261 : vector<2x32xf32>
    %263 = vector.extract_strided_slice %243 {offsets = [0, 64], sizes = [2, 32], strides = [1, 1]} : vector<2x192xf32> to vector<2x32xf32>
    %264 = vector.extract_strided_slice %239 {offsets = [0, 64], sizes = [2, 32], strides = [1, 1]} : vector<4x192xf32> to vector<2x32xf32>
    %265 = vector.broadcast %9 : vector<1x32xf32> to vector<2x32xf32>
    %266 = arith.addf %264, %265 : vector<2x32xf32>
    %267 = arith.mulf %254, %266 : vector<2x32xf32>
    %268 = arith.addf %263, %267 : vector<2x32xf32>
    %269 = math.tanh %268 : vector<2x32xf32>
    %cst_70 = arith.constant 1.000000e+00 : f32
    %270 = vector.broadcast %cst_70 : f32 to vector<2x32xf32>
    %271 = arith.subf %270, %262 : vector<2x32xf32>
    %272 = arith.mulf %271, %269 : vector<2x32xf32>
    %273 = arith.mulf %262, %237 : vector<2x32xf32>
    %274 = arith.addf %272, %273 : vector<2x32xf32>
    %275 = arith.index_cast %c3_i32 : i32 to index
    %c0_71 = arith.constant 0 : index
    %c0_72 = arith.constant 0 : index
    %276 = vector.load %arg7[%275, %c0_71, %c0_72] : memref<8x2x32xf32, #tpu.memory_space<vmem>>, vector<1x2x32xf32>
    %277 = vector.shape_cast %276 : vector<1x2x32xf32> to vector<2x32xf32>
    %278 = vector.shape_cast %274 : vector<2x32xf32> to vector<1x2x32xf32>
    tpu.vector_store %arg7[%275, %c0_71, %c0_72], %278 {strides = array<i32>} : memref<8x2x32xf32, #tpu.memory_space<vmem>>, vector<1x2x32xf32>,
    %279 = vector.extract_strided_slice %246 {offsets = [0, 96], sizes = [2, 32], strides = [1, 1]} : vector<2x192xf32> to vector<2x32xf32>
    %280 = vector.extract_strided_slice %239 {offsets = [2, 96], sizes = [2, 32], strides = [1, 1]} : vector<4x192xf32> to vector<2x32xf32>
    %281 = arith.addf %279, %280 : vector<2x32xf32>
    %282 = arith.negf %281 : vector<2x32xf32>
    %283 = math.exp %282 : vector<2x32xf32>
    %cst_73 = arith.constant 1.000000e+00 : f32
    %284 = vector.broadcast %cst_73 : f32 to vector<2x32xf32>
    %285 = arith.addf %284, %283 : vector<2x32xf32>
    %286 = arith.divf %284, %285 : vector<2x32xf32>
    %287 = vector.extract_strided_slice %246 {offsets = [0, 128], sizes = [2, 32], strides = [1, 1]} : vector<2x192xf32> to vector<2x32xf32>
    %288 = vector.extract_strided_slice %239 {offsets = [2, 128], sizes = [2, 32], strides = [1, 1]} : vector<4x192xf32> to vector<2x32xf32>
    %289 = arith.addf %287, %288 : vector<2x32xf32>
    %290 = arith.negf %289 : vector<2x32xf32>
    %291 = math.exp %290 : vector<2x32xf32>
    %cst_74 = arith.constant 1.000000e+00 : f32
    %292 = vector.broadcast %cst_74 : f32 to vector<2x32xf32>
    %293 = arith.addf %292, %291 : vector<2x32xf32>
    %294 = arith.divf %292, %293 : vector<2x32xf32>
    %295 = vector.extract_strided_slice %246 {offsets = [0, 160], sizes = [2, 32], strides = [1, 1]} : vector<2x192xf32> to vector<2x32xf32>
    %296 = vector.extract_strided_slice %239 {offsets = [2, 160], sizes = [2, 32], strides = [1, 1]} : vector<4x192xf32> to vector<2x32xf32>
    %297 = vector.broadcast %10 : vector<1x32xf32> to vector<2x32xf32>
    %298 = arith.addf %296, %297 : vector<2x32xf32>
    %299 = arith.mulf %286, %298 : vector<2x32xf32>
    %300 = arith.addf %295, %299 : vector<2x32xf32>
    %301 = math.tanh %300 : vector<2x32xf32>
    %cst_75 = arith.constant 1.000000e+00 : f32
    %302 = vector.broadcast %cst_75 : f32 to vector<2x32xf32>
    %303 = arith.subf %302, %294 : vector<2x32xf32>
    %304 = arith.mulf %303, %301 : vector<2x32xf32>
    %305 = arith.mulf %294, %238 : vector<2x32xf32>
    %306 = arith.addf %304, %305 : vector<2x32xf32>
    %307 = arith.index_cast %240 : i32 to index
    %c0_76 = arith.constant 0 : index
    %c0_77 = arith.constant 0 : index
    %308 = vector.load %arg8[%307, %c0_76, %c0_77] : memref<8x2x32xf32, #tpu.memory_space<vmem>>, vector<1x2x32xf32>
    %309 = vector.shape_cast %308 : vector<1x2x32xf32> to vector<2x32xf32>
    %310 = vector.shape_cast %306 : vector<2x32xf32> to vector<1x2x32xf32>
    tpu.vector_store %arg8[%307, %c0_76, %c0_77], %310 {strides = array<i32>} : memref<8x2x32xf32, #tpu.memory_space<vmem>>, vector<1x2x32xf32>,
    %311 = tpu.concatenate %274, %306 in 0 : vector<2x32xf32>, vector<2x32xf32> -> vector<4x32xf32>
    %c4_i32 = arith.constant 4 : i32
    %312 = vector.extract_strided_slice %311 {offsets = [0, 0], sizes = [2, 32], strides = [1, 1]} : vector<4x32xf32> to vector<2x32xf32>
    %313 = vector.extract_strided_slice %311 {offsets = [2, 0], sizes = [2, 32], strides = [1, 1]} : vector<4x32xf32> to vector<2x32xf32>
    %cst_78 = arith.constant dense<0.000000e+00> : vector<4x192xf32>
    %314 = tpu.matmul %311, %8, %cst_78 {dimension_numbers = #tpu.dot_dimension_numbers<[1], [0], [0], [1], [0, 0, 1, 1], [], []>} : vector<4x32xf32>, vector<32x192xf32>, vector<4x192xf32> -> vector<4x192xf32>
    %c7_i32_79 = arith.constant 7 : i32
    %315 = arith.subi %c7_i32_79, %c4_i32 : i32
    %316 = arith.index_cast %c4_i32 : i32 to index
    %c0_80 = arith.constant 0 : index
    %c0_81 = arith.constant 0 : index
    %317 = vector.load %arg6[%316, %c0_80, %c0_81] : memref<8x2x192xf32, #tpu.memory_space<vmem>>, vector<1x2x192xf32>
    %318 = vector.shape_cast %317 : vector<1x2x192xf32> to vector<2x192xf32>
    %319 = arith.index_cast %315 : i32 to index
    %c0_82 = arith.constant 0 : index
    %c0_83 = arith.constant 0 : index
    %320 = vector.load %arg6[%319, %c0_82, %c0_83] : memref<8x2x192xf32, #tpu.memory_space<vmem>>, vector<1x2x192xf32>
    %321 = vector.shape_cast %320 : vector<1x2x192xf32> to vector<2x192xf32>
    %322 = vector.extract_strided_slice %318 {offsets = [0, 0], sizes = [2, 32], strides = [1, 1]} : vector<2x192xf32> to vector<2x32xf32>
    %323 = vector.extract_strided_slice %314 {offsets = [0, 0], sizes = [2, 32], strides = [1, 1]} : vector<4x192xf32> to vector<2x32xf32>
    %324 = arith.addf %322, %323 : vector<2x32xf32>
    %325 = arith.negf %324 : vector<2x32xf32>
    %326 = math.exp %325 : vector<2x32xf32>
    %cst_84 = arith.constant 1.000000e+00 : f32
    %327 = vector.broadcast %cst_84 : f32 to vector<2x32xf32>
    %328 = arith.addf %327, %326 : vector<2x32xf32>
    %329 = arith.divf %327, %328 : vector<2x32xf32>
    %330 = vector.extract_strided_slice %318 {offsets = [0, 32], sizes = [2, 32], strides = [1, 1]} : vector<2x192xf32> to vector<2x32xf32>
    %331 = vector.extract_strided_slice %314 {offsets = [0, 32], sizes = [2, 32], strides = [1, 1]} : vector<4x192xf32> to vector<2x32xf32>
    %332 = arith.addf %330, %331 : vector<2x32xf32>
    %333 = arith.negf %332 : vector<2x32xf32>
    %334 = math.exp %333 : vector<2x32xf32>
    %cst_85 = arith.constant 1.000000e+00 : f32
    %335 = vector.broadcast %cst_85 : f32 to vector<2x32xf32>
    %336 = arith.addf %335, %334 : vector<2x32xf32>
    %337 = arith.divf %335, %336 : vector<2x32xf32>
    %338 = vector.extract_strided_slice %318 {offsets = [0, 64], sizes = [2, 32], strides = [1, 1]} : vector<2x192xf32> to vector<2x32xf32>
    %339 = vector.extract_strided_slice %314 {offsets = [0, 64], sizes = [2, 32], strides = [1, 1]} : vector<4x192xf32> to vector<2x32xf32>
    %340 = vector.broadcast %9 : vector<1x32xf32> to vector<2x32xf32>
    %341 = arith.addf %339, %340 : vector<2x32xf32>
    %342 = arith.mulf %329, %341 : vector<2x32xf32>
    %343 = arith.addf %338, %342 : vector<2x32xf32>
    %344 = math.tanh %343 : vector<2x32xf32>
    %cst_86 = arith.constant 1.000000e+00 : f32
    %345 = vector.broadcast %cst_86 : f32 to vector<2x32xf32>
    %346 = arith.subf %345, %337 : vector<2x32xf32>
    %347 = arith.mulf %346, %344 : vector<2x32xf32>
    %348 = arith.mulf %337, %312 : vector<2x32xf32>
    %349 = arith.addf %347, %348 : vector<2x32xf32>
    %350 = arith.index_cast %c4_i32 : i32 to index
    %c0_87 = arith.constant 0 : index
    %c0_88 = arith.constant 0 : index
    %351 = vector.load %arg7[%350, %c0_87, %c0_88] : memref<8x2x32xf32, #tpu.memory_space<vmem>>, vector<1x2x32xf32>
    %352 = vector.shape_cast %351 : vector<1x2x32xf32> to vector<2x32xf32>
    %353 = vector.shape_cast %349 : vector<2x32xf32> to vector<1x2x32xf32>
    tpu.vector_store %arg7[%350, %c0_87, %c0_88], %353 {strides = array<i32>} : memref<8x2x32xf32, #tpu.memory_space<vmem>>, vector<1x2x32xf32>,
    %354 = vector.extract_strided_slice %321 {offsets = [0, 96], sizes = [2, 32], strides = [1, 1]} : vector<2x192xf32> to vector<2x32xf32>
    %355 = vector.extract_strided_slice %314 {offsets = [2, 96], sizes = [2, 32], strides = [1, 1]} : vector<4x192xf32> to vector<2x32xf32>
    %356 = arith.addf %354, %355 : vector<2x32xf32>
    %357 = arith.negf %356 : vector<2x32xf32>
    %358 = math.exp %357 : vector<2x32xf32>
    %cst_89 = arith.constant 1.000000e+00 : f32
    %359 = vector.broadcast %cst_89 : f32 to vector<2x32xf32>
    %360 = arith.addf %359, %358 : vector<2x32xf32>
    %361 = arith.divf %359, %360 : vector<2x32xf32>
    %362 = vector.extract_strided_slice %321 {offsets = [0, 128], sizes = [2, 32], strides = [1, 1]} : vector<2x192xf32> to vector<2x32xf32>
    %363 = vector.extract_strided_slice %314 {offsets = [2, 128], sizes = [2, 32], strides = [1, 1]} : vector<4x192xf32> to vector<2x32xf32>
    %364 = arith.addf %362, %363 : vector<2x32xf32>
    %365 = arith.negf %364 : vector<2x32xf32>
    %366 = math.exp %365 : vector<2x32xf32>
    %cst_90 = arith.constant 1.000000e+00 : f32
    %367 = vector.broadcast %cst_90 : f32 to vector<2x32xf32>
    %368 = arith.addf %367, %366 : vector<2x32xf32>
    %369 = arith.divf %367, %368 : vector<2x32xf32>
    %370 = vector.extract_strided_slice %321 {offsets = [0, 160], sizes = [2, 32], strides = [1, 1]} : vector<2x192xf32> to vector<2x32xf32>
    %371 = vector.extract_strided_slice %314 {offsets = [2, 160], sizes = [2, 32], strides = [1, 1]} : vector<4x192xf32> to vector<2x32xf32>
    %372 = vector.broadcast %10 : vector<1x32xf32> to vector<2x32xf32>
    %373 = arith.addf %371, %372 : vector<2x32xf32>
    %374 = arith.mulf %361, %373 : vector<2x32xf32>
    %375 = arith.addf %370, %374 : vector<2x32xf32>
    %376 = math.tanh %375 : vector<2x32xf32>
    %cst_91 = arith.constant 1.000000e+00 : f32
    %377 = vector.broadcast %cst_91 : f32 to vector<2x32xf32>
    %378 = arith.subf %377, %369 : vector<2x32xf32>
    %379 = arith.mulf %378, %376 : vector<2x32xf32>
    %380 = arith.mulf %369, %313 : vector<2x32xf32>
    %381 = arith.addf %379, %380 : vector<2x32xf32>
    %382 = arith.index_cast %315 : i32 to index
    %c0_92 = arith.constant 0 : index
    %c0_93 = arith.constant 0 : index
    %383 = vector.load %arg8[%382, %c0_92, %c0_93] : memref<8x2x32xf32, #tpu.memory_space<vmem>>, vector<1x2x32xf32>
    %384 = vector.shape_cast %383 : vector<1x2x32xf32> to vector<2x32xf32>
    %385 = vector.shape_cast %381 : vector<2x32xf32> to vector<1x2x32xf32>
    tpu.vector_store %arg8[%382, %c0_92, %c0_93], %385 {strides = array<i32>} : memref<8x2x32xf32, #tpu.memory_space<vmem>>, vector<1x2x32xf32>,
    %386 = tpu.concatenate %349, %381 in 0 : vector<2x32xf32>, vector<2x32xf32> -> vector<4x32xf32>
    %c5_i32 = arith.constant 5 : i32
    %387 = vector.extract_strided_slice %386 {offsets = [0, 0], sizes = [2, 32], strides = [1, 1]} : vector<4x32xf32> to vector<2x32xf32>
    %388 = vector.extract_strided_slice %386 {offsets = [2, 0], sizes = [2, 32], strides = [1, 1]} : vector<4x32xf32> to vector<2x32xf32>
    %cst_94 = arith.constant dense<0.000000e+00> : vector<4x192xf32>
    %389 = tpu.matmul %386, %8, %cst_94 {dimension_numbers = #tpu.dot_dimension_numbers<[1], [0], [0], [1], [0, 0, 1, 1], [], []>} : vector<4x32xf32>, vector<32x192xf32>, vector<4x192xf32> -> vector<4x192xf32>
    %c7_i32_95 = arith.constant 7 : i32
    %390 = arith.subi %c7_i32_95, %c5_i32 : i32
    %391 = arith.index_cast %c5_i32 : i32 to index
    %c0_96 = arith.constant 0 : index
    %c0_97 = arith.constant 0 : index
    %392 = vector.load %arg6[%391, %c0_96, %c0_97] : memref<8x2x192xf32, #tpu.memory_space<vmem>>, vector<1x2x192xf32>
    %393 = vector.shape_cast %392 : vector<1x2x192xf32> to vector<2x192xf32>
    %394 = arith.index_cast %390 : i32 to index
    %c0_98 = arith.constant 0 : index
    %c0_99 = arith.constant 0 : index
    %395 = vector.load %arg6[%394, %c0_98, %c0_99] : memref<8x2x192xf32, #tpu.memory_space<vmem>>, vector<1x2x192xf32>
    %396 = vector.shape_cast %395 : vector<1x2x192xf32> to vector<2x192xf32>
    %397 = vector.extract_strided_slice %393 {offsets = [0, 0], sizes = [2, 32], strides = [1, 1]} : vector<2x192xf32> to vector<2x32xf32>
    %398 = vector.extract_strided_slice %389 {offsets = [0, 0], sizes = [2, 32], strides = [1, 1]} : vector<4x192xf32> to vector<2x32xf32>
    %399 = arith.addf %397, %398 : vector<2x32xf32>
    %400 = arith.negf %399 : vector<2x32xf32>
    %401 = math.exp %400 : vector<2x32xf32>
    %cst_100 = arith.constant 1.000000e+00 : f32
    %402 = vector.broadcast %cst_100 : f32 to vector<2x32xf32>
    %403 = arith.addf %402, %401 : vector<2x32xf32>
    %404 = arith.divf %402, %403 : vector<2x32xf32>
    %405 = vector.extract_strided_slice %393 {offsets = [0, 32], sizes = [2, 32], strides = [1, 1]} : vector<2x192xf32> to vector<2x32xf32>
    %406 = vector.extract_strided_slice %389 {offsets = [0, 32], sizes = [2, 32], strides = [1, 1]} : vector<4x192xf32> to vector<2x32xf32>
    %407 = arith.addf %405, %406 : vector<2x32xf32>
    %408 = arith.negf %407 : vector<2x32xf32>
    %409 = math.exp %408 : vector<2x32xf32>
    %cst_101 = arith.constant 1.000000e+00 : f32
    %410 = vector.broadcast %cst_101 : f32 to vector<2x32xf32>
    %411 = arith.addf %410, %409 : vector<2x32xf32>
    %412 = arith.divf %410, %411 : vector<2x32xf32>
    %413 = vector.extract_strided_slice %393 {offsets = [0, 64], sizes = [2, 32], strides = [1, 1]} : vector<2x192xf32> to vector<2x32xf32>
    %414 = vector.extract_strided_slice %389 {offsets = [0, 64], sizes = [2, 32], strides = [1, 1]} : vector<4x192xf32> to vector<2x32xf32>
    %415 = vector.broadcast %9 : vector<1x32xf32> to vector<2x32xf32>
    %416 = arith.addf %414, %415 : vector<2x32xf32>
    %417 = arith.mulf %404, %416 : vector<2x32xf32>
    %418 = arith.addf %413, %417 : vector<2x32xf32>
    %419 = math.tanh %418 : vector<2x32xf32>
    %cst_102 = arith.constant 1.000000e+00 : f32
    %420 = vector.broadcast %cst_102 : f32 to vector<2x32xf32>
    %421 = arith.subf %420, %412 : vector<2x32xf32>
    %422 = arith.mulf %421, %419 : vector<2x32xf32>
    %423 = arith.mulf %412, %387 : vector<2x32xf32>
    %424 = arith.addf %422, %423 : vector<2x32xf32>
    %425 = arith.index_cast %c5_i32 : i32 to index
    %c0_103 = arith.constant 0 : index
    %c0_104 = arith.constant 0 : index
    %426 = vector.load %arg7[%425, %c0_103, %c0_104] : memref<8x2x32xf32, #tpu.memory_space<vmem>>, vector<1x2x32xf32>
    %427 = vector.shape_cast %426 : vector<1x2x32xf32> to vector<2x32xf32>
    %428 = vector.shape_cast %424 : vector<2x32xf32> to vector<1x2x32xf32>
    tpu.vector_store %arg7[%425, %c0_103, %c0_104], %428 {strides = array<i32>} : memref<8x2x32xf32, #tpu.memory_space<vmem>>, vector<1x2x32xf32>,
    %429 = vector.extract_strided_slice %396 {offsets = [0, 96], sizes = [2, 32], strides = [1, 1]} : vector<2x192xf32> to vector<2x32xf32>
    %430 = vector.extract_strided_slice %389 {offsets = [2, 96], sizes = [2, 32], strides = [1, 1]} : vector<4x192xf32> to vector<2x32xf32>
    %431 = arith.addf %429, %430 : vector<2x32xf32>
    %432 = arith.negf %431 : vector<2x32xf32>
    %433 = math.exp %432 : vector<2x32xf32>
    %cst_105 = arith.constant 1.000000e+00 : f32
    %434 = vector.broadcast %cst_105 : f32 to vector<2x32xf32>
    %435 = arith.addf %434, %433 : vector<2x32xf32>
    %436 = arith.divf %434, %435 : vector<2x32xf32>
    %437 = vector.extract_strided_slice %396 {offsets = [0, 128], sizes = [2, 32], strides = [1, 1]} : vector<2x192xf32> to vector<2x32xf32>
    %438 = vector.extract_strided_slice %389 {offsets = [2, 128], sizes = [2, 32], strides = [1, 1]} : vector<4x192xf32> to vector<2x32xf32>
    %439 = arith.addf %437, %438 : vector<2x32xf32>
    %440 = arith.negf %439 : vector<2x32xf32>
    %441 = math.exp %440 : vector<2x32xf32>
    %cst_106 = arith.constant 1.000000e+00 : f32
    %442 = vector.broadcast %cst_106 : f32 to vector<2x32xf32>
    %443 = arith.addf %442, %441 : vector<2x32xf32>
    %444 = arith.divf %442, %443 : vector<2x32xf32>
    %445 = vector.extract_strided_slice %396 {offsets = [0, 160], sizes = [2, 32], strides = [1, 1]} : vector<2x192xf32> to vector<2x32xf32>
    %446 = vector.extract_strided_slice %389 {offsets = [2, 160], sizes = [2, 32], strides = [1, 1]} : vector<4x192xf32> to vector<2x32xf32>
    %447 = vector.broadcast %10 : vector<1x32xf32> to vector<2x32xf32>
    %448 = arith.addf %446, %447 : vector<2x32xf32>
    %449 = arith.mulf %436, %448 : vector<2x32xf32>
    %450 = arith.addf %445, %449 : vector<2x32xf32>
    %451 = math.tanh %450 : vector<2x32xf32>
    %cst_107 = arith.constant 1.000000e+00 : f32
    %452 = vector.broadcast %cst_107 : f32 to vector<2x32xf32>
    %453 = arith.subf %452, %444 : vector<2x32xf32>
    %454 = arith.mulf %453, %451 : vector<2x32xf32>
    %455 = arith.mulf %444, %388 : vector<2x32xf32>
    %456 = arith.addf %454, %455 : vector<2x32xf32>
    %457 = arith.index_cast %390 : i32 to index
    %c0_108 = arith.constant 0 : index
    %c0_109 = arith.constant 0 : index
    %458 = vector.load %arg8[%457, %c0_108, %c0_109] : memref<8x2x32xf32, #tpu.memory_space<vmem>>, vector<1x2x32xf32>
    %459 = vector.shape_cast %458 : vector<1x2x32xf32> to vector<2x32xf32>
    %460 = vector.shape_cast %456 : vector<2x32xf32> to vector<1x2x32xf32>
    tpu.vector_store %arg8[%457, %c0_108, %c0_109], %460 {strides = array<i32>} : memref<8x2x32xf32, #tpu.memory_space<vmem>>, vector<1x2x32xf32>,
    %461 = tpu.concatenate %424, %456 in 0 : vector<2x32xf32>, vector<2x32xf32> -> vector<4x32xf32>
    %c6_i32 = arith.constant 6 : i32
    %462 = vector.extract_strided_slice %461 {offsets = [0, 0], sizes = [2, 32], strides = [1, 1]} : vector<4x32xf32> to vector<2x32xf32>
    %463 = vector.extract_strided_slice %461 {offsets = [2, 0], sizes = [2, 32], strides = [1, 1]} : vector<4x32xf32> to vector<2x32xf32>
    %cst_110 = arith.constant dense<0.000000e+00> : vector<4x192xf32>
    %464 = tpu.matmul %461, %8, %cst_110 {dimension_numbers = #tpu.dot_dimension_numbers<[1], [0], [0], [1], [0, 0, 1, 1], [], []>} : vector<4x32xf32>, vector<32x192xf32>, vector<4x192xf32> -> vector<4x192xf32>
    %c7_i32_111 = arith.constant 7 : i32
    %465 = arith.subi %c7_i32_111, %c6_i32 : i32
    %466 = arith.index_cast %c6_i32 : i32 to index
    %c0_112 = arith.constant 0 : index
    %c0_113 = arith.constant 0 : index
    %467 = vector.load %arg6[%466, %c0_112, %c0_113] : memref<8x2x192xf32, #tpu.memory_space<vmem>>, vector<1x2x192xf32>
    %468 = vector.shape_cast %467 : vector<1x2x192xf32> to vector<2x192xf32>
    %469 = arith.index_cast %465 : i32 to index
    %c0_114 = arith.constant 0 : index
    %c0_115 = arith.constant 0 : index
    %470 = vector.load %arg6[%469, %c0_114, %c0_115] : memref<8x2x192xf32, #tpu.memory_space<vmem>>, vector<1x2x192xf32>
    %471 = vector.shape_cast %470 : vector<1x2x192xf32> to vector<2x192xf32>
    %472 = vector.extract_strided_slice %468 {offsets = [0, 0], sizes = [2, 32], strides = [1, 1]} : vector<2x192xf32> to vector<2x32xf32>
    %473 = vector.extract_strided_slice %464 {offsets = [0, 0], sizes = [2, 32], strides = [1, 1]} : vector<4x192xf32> to vector<2x32xf32>
    %474 = arith.addf %472, %473 : vector<2x32xf32>
    %475 = arith.negf %474 : vector<2x32xf32>
    %476 = math.exp %475 : vector<2x32xf32>
    %cst_116 = arith.constant 1.000000e+00 : f32
    %477 = vector.broadcast %cst_116 : f32 to vector<2x32xf32>
    %478 = arith.addf %477, %476 : vector<2x32xf32>
    %479 = arith.divf %477, %478 : vector<2x32xf32>
    %480 = vector.extract_strided_slice %468 {offsets = [0, 32], sizes = [2, 32], strides = [1, 1]} : vector<2x192xf32> to vector<2x32xf32>
    %481 = vector.extract_strided_slice %464 {offsets = [0, 32], sizes = [2, 32], strides = [1, 1]} : vector<4x192xf32> to vector<2x32xf32>
    %482 = arith.addf %480, %481 : vector<2x32xf32>
    %483 = arith.negf %482 : vector<2x32xf32>
    %484 = math.exp %483 : vector<2x32xf32>
    %cst_117 = arith.constant 1.000000e+00 : f32
    %485 = vector.broadcast %cst_117 : f32 to vector<2x32xf32>
    %486 = arith.addf %485, %484 : vector<2x32xf32>
    %487 = arith.divf %485, %486 : vector<2x32xf32>
    %488 = vector.extract_strided_slice %468 {offsets = [0, 64], sizes = [2, 32], strides = [1, 1]} : vector<2x192xf32> to vector<2x32xf32>
    %489 = vector.extract_strided_slice %464 {offsets = [0, 64], sizes = [2, 32], strides = [1, 1]} : vector<4x192xf32> to vector<2x32xf32>
    %490 = vector.broadcast %9 : vector<1x32xf32> to vector<2x32xf32>
    %491 = arith.addf %489, %490 : vector<2x32xf32>
    %492 = arith.mulf %479, %491 : vector<2x32xf32>
    %493 = arith.addf %488, %492 : vector<2x32xf32>
    %494 = math.tanh %493 : vector<2x32xf32>
    %cst_118 = arith.constant 1.000000e+00 : f32
    %495 = vector.broadcast %cst_118 : f32 to vector<2x32xf32>
    %496 = arith.subf %495, %487 : vector<2x32xf32>
    %497 = arith.mulf %496, %494 : vector<2x32xf32>
    %498 = arith.mulf %487, %462 : vector<2x32xf32>
    %499 = arith.addf %497, %498 : vector<2x32xf32>
    %500 = arith.index_cast %c6_i32 : i32 to index
    %c0_119 = arith.constant 0 : index
    %c0_120 = arith.constant 0 : index
    %501 = vector.load %arg7[%500, %c0_119, %c0_120] : memref<8x2x32xf32, #tpu.memory_space<vmem>>, vector<1x2x32xf32>
    %502 = vector.shape_cast %501 : vector<1x2x32xf32> to vector<2x32xf32>
    %503 = vector.shape_cast %499 : vector<2x32xf32> to vector<1x2x32xf32>
    tpu.vector_store %arg7[%500, %c0_119, %c0_120], %503 {strides = array<i32>} : memref<8x2x32xf32, #tpu.memory_space<vmem>>, vector<1x2x32xf32>,
    %504 = vector.extract_strided_slice %471 {offsets = [0, 96], sizes = [2, 32], strides = [1, 1]} : vector<2x192xf32> to vector<2x32xf32>
    %505 = vector.extract_strided_slice %464 {offsets = [2, 96], sizes = [2, 32], strides = [1, 1]} : vector<4x192xf32> to vector<2x32xf32>
    %506 = arith.addf %504, %505 : vector<2x32xf32>
    %507 = arith.negf %506 : vector<2x32xf32>
    %508 = math.exp %507 : vector<2x32xf32>
    %cst_121 = arith.constant 1.000000e+00 : f32
    %509 = vector.broadcast %cst_121 : f32 to vector<2x32xf32>
    %510 = arith.addf %509, %508 : vector<2x32xf32>
    %511 = arith.divf %509, %510 : vector<2x32xf32>
    %512 = vector.extract_strided_slice %471 {offsets = [0, 128], sizes = [2, 32], strides = [1, 1]} : vector<2x192xf32> to vector<2x32xf32>
    %513 = vector.extract_strided_slice %464 {offsets = [2, 128], sizes = [2, 32], strides = [1, 1]} : vector<4x192xf32> to vector<2x32xf32>
    %514 = arith.addf %512, %513 : vector<2x32xf32>
    %515 = arith.negf %514 : vector<2x32xf32>
    %516 = math.exp %515 : vector<2x32xf32>
    %cst_122 = arith.constant 1.000000e+00 : f32
    %517 = vector.broadcast %cst_122 : f32 to vector<2x32xf32>
    %518 = arith.addf %517, %516 : vector<2x32xf32>
    %519 = arith.divf %517, %518 : vector<2x32xf32>
    %520 = vector.extract_strided_slice %471 {offsets = [0, 160], sizes = [2, 32], strides = [1, 1]} : vector<2x192xf32> to vector<2x32xf32>
    %521 = vector.extract_strided_slice %464 {offsets = [2, 160], sizes = [2, 32], strides = [1, 1]} : vector<4x192xf32> to vector<2x32xf32>
    %522 = vector.broadcast %10 : vector<1x32xf32> to vector<2x32xf32>
    %523 = arith.addf %521, %522 : vector<2x32xf32>
    %524 = arith.mulf %511, %523 : vector<2x32xf32>
    %525 = arith.addf %520, %524 : vector<2x32xf32>
    %526 = math.tanh %525 : vector<2x32xf32>
    %cst_123 = arith.constant 1.000000e+00 : f32
    %527 = vector.broadcast %cst_123 : f32 to vector<2x32xf32>
    %528 = arith.subf %527, %519 : vector<2x32xf32>
    %529 = arith.mulf %528, %526 : vector<2x32xf32>
    %530 = arith.mulf %519, %463 : vector<2x32xf32>
    %531 = arith.addf %529, %530 : vector<2x32xf32>
    %532 = arith.index_cast %465 : i32 to index
    %c0_124 = arith.constant 0 : index
    %c0_125 = arith.constant 0 : index
    %533 = vector.load %arg8[%532, %c0_124, %c0_125] : memref<8x2x32xf32, #tpu.memory_space<vmem>>, vector<1x2x32xf32>
    %534 = vector.shape_cast %533 : vector<1x2x32xf32> to vector<2x32xf32>
    %535 = vector.shape_cast %531 : vector<2x32xf32> to vector<1x2x32xf32>
    tpu.vector_store %arg8[%532, %c0_124, %c0_125], %535 {strides = array<i32>} : memref<8x2x32xf32, #tpu.memory_space<vmem>>, vector<1x2x32xf32>,
    %536 = tpu.concatenate %499, %531 in 0 : vector<2x32xf32>, vector<2x32xf32> -> vector<4x32xf32>
    %c7_i32_126 = arith.constant 7 : i32
    %537 = vector.extract_strided_slice %536 {offsets = [0, 0], sizes = [2, 32], strides = [1, 1]} : vector<4x32xf32> to vector<2x32xf32>
    %538 = vector.extract_strided_slice %536 {offsets = [2, 0], sizes = [2, 32], strides = [1, 1]} : vector<4x32xf32> to vector<2x32xf32>
    %cst_127 = arith.constant dense<0.000000e+00> : vector<4x192xf32>
    %539 = tpu.matmul %536, %8, %cst_127 {dimension_numbers = #tpu.dot_dimension_numbers<[1], [0], [0], [1], [0, 0, 1, 1], [], []>} : vector<4x32xf32>, vector<32x192xf32>, vector<4x192xf32> -> vector<4x192xf32>
    %c7_i32_128 = arith.constant 7 : i32
    %540 = arith.subi %c7_i32_128, %c7_i32_126 : i32
    %541 = arith.index_cast %c7_i32_126 : i32 to index
    %c0_129 = arith.constant 0 : index
    %c0_130 = arith.constant 0 : index
    %542 = vector.load %arg6[%541, %c0_129, %c0_130] : memref<8x2x192xf32, #tpu.memory_space<vmem>>, vector<1x2x192xf32>
    %543 = vector.shape_cast %542 : vector<1x2x192xf32> to vector<2x192xf32>
    %544 = arith.index_cast %540 : i32 to index
    %c0_131 = arith.constant 0 : index
    %c0_132 = arith.constant 0 : index
    %545 = vector.load %arg6[%544, %c0_131, %c0_132] : memref<8x2x192xf32, #tpu.memory_space<vmem>>, vector<1x2x192xf32>
    %546 = vector.shape_cast %545 : vector<1x2x192xf32> to vector<2x192xf32>
    %547 = vector.extract_strided_slice %543 {offsets = [0, 0], sizes = [2, 32], strides = [1, 1]} : vector<2x192xf32> to vector<2x32xf32>
    %548 = vector.extract_strided_slice %539 {offsets = [0, 0], sizes = [2, 32], strides = [1, 1]} : vector<4x192xf32> to vector<2x32xf32>
    %549 = arith.addf %547, %548 : vector<2x32xf32>
    %550 = arith.negf %549 : vector<2x32xf32>
    %551 = math.exp %550 : vector<2x32xf32>
    %cst_133 = arith.constant 1.000000e+00 : f32
    %552 = vector.broadcast %cst_133 : f32 to vector<2x32xf32>
    %553 = arith.addf %552, %551 : vector<2x32xf32>
    %554 = arith.divf %552, %553 : vector<2x32xf32>
    %555 = vector.extract_strided_slice %543 {offsets = [0, 32], sizes = [2, 32], strides = [1, 1]} : vector<2x192xf32> to vector<2x32xf32>
    %556 = vector.extract_strided_slice %539 {offsets = [0, 32], sizes = [2, 32], strides = [1, 1]} : vector<4x192xf32> to vector<2x32xf32>
    %557 = arith.addf %555, %556 : vector<2x32xf32>
    %558 = arith.negf %557 : vector<2x32xf32>
    %559 = math.exp %558 : vector<2x32xf32>
    %cst_134 = arith.constant 1.000000e+00 : f32
    %560 = vector.broadcast %cst_134 : f32 to vector<2x32xf32>
    %561 = arith.addf %560, %559 : vector<2x32xf32>
    %562 = arith.divf %560, %561 : vector<2x32xf32>
    %563 = vector.extract_strided_slice %543 {offsets = [0, 64], sizes = [2, 32], strides = [1, 1]} : vector<2x192xf32> to vector<2x32xf32>
    %564 = vector.extract_strided_slice %539 {offsets = [0, 64], sizes = [2, 32], strides = [1, 1]} : vector<4x192xf32> to vector<2x32xf32>
    %565 = vector.broadcast %9 : vector<1x32xf32> to vector<2x32xf32>
    %566 = arith.addf %564, %565 : vector<2x32xf32>
    %567 = arith.mulf %554, %566 : vector<2x32xf32>
    %568 = arith.addf %563, %567 : vector<2x32xf32>
    %569 = math.tanh %568 : vector<2x32xf32>
    %cst_135 = arith.constant 1.000000e+00 : f32
    %570 = vector.broadcast %cst_135 : f32 to vector<2x32xf32>
    %571 = arith.subf %570, %562 : vector<2x32xf32>
    %572 = arith.mulf %571, %569 : vector<2x32xf32>
    %573 = arith.mulf %562, %537 : vector<2x32xf32>
    %574 = arith.addf %572, %573 : vector<2x32xf32>
    %575 = arith.index_cast %c7_i32_126 : i32 to index
    %c0_136 = arith.constant 0 : index
    %c0_137 = arith.constant 0 : index
    %576 = vector.load %arg7[%575, %c0_136, %c0_137] : memref<8x2x32xf32, #tpu.memory_space<vmem>>, vector<1x2x32xf32>
    %577 = vector.shape_cast %576 : vector<1x2x32xf32> to vector<2x32xf32>
    %578 = vector.shape_cast %574 : vector<2x32xf32> to vector<1x2x32xf32>
    tpu.vector_store %arg7[%575, %c0_136, %c0_137], %578 {strides = array<i32>} : memref<8x2x32xf32, #tpu.memory_space<vmem>>, vector<1x2x32xf32>,
    %579 = vector.extract_strided_slice %546 {offsets = [0, 96], sizes = [2, 32], strides = [1, 1]} : vector<2x192xf32> to vector<2x32xf32>
    %580 = vector.extract_strided_slice %539 {offsets = [2, 96], sizes = [2, 32], strides = [1, 1]} : vector<4x192xf32> to vector<2x32xf32>
    %581 = arith.addf %579, %580 : vector<2x32xf32>
    %582 = arith.negf %581 : vector<2x32xf32>
    %583 = math.exp %582 : vector<2x32xf32>
    %cst_138 = arith.constant 1.000000e+00 : f32
    %584 = vector.broadcast %cst_138 : f32 to vector<2x32xf32>
    %585 = arith.addf %584, %583 : vector<2x32xf32>
    %586 = arith.divf %584, %585 : vector<2x32xf32>
    %587 = vector.extract_strided_slice %546 {offsets = [0, 128], sizes = [2, 32], strides = [1, 1]} : vector<2x192xf32> to vector<2x32xf32>
    %588 = vector.extract_strided_slice %539 {offsets = [2, 128], sizes = [2, 32], strides = [1, 1]} : vector<4x192xf32> to vector<2x32xf32>
    %589 = arith.addf %587, %588 : vector<2x32xf32>
    %590 = arith.negf %589 : vector<2x32xf32>
    %591 = math.exp %590 : vector<2x32xf32>
    %cst_139 = arith.constant 1.000000e+00 : f32
    %592 = vector.broadcast %cst_139 : f32 to vector<2x32xf32>
    %593 = arith.addf %592, %591 : vector<2x32xf32>
    %594 = arith.divf %592, %593 : vector<2x32xf32>
    %595 = vector.extract_strided_slice %546 {offsets = [0, 160], sizes = [2, 32], strides = [1, 1]} : vector<2x192xf32> to vector<2x32xf32>
    %596 = vector.extract_strided_slice %539 {offsets = [2, 160], sizes = [2, 32], strides = [1, 1]} : vector<4x192xf32> to vector<2x32xf32>
    %597 = vector.broadcast %10 : vector<1x32xf32> to vector<2x32xf32>
    %598 = arith.addf %596, %597 : vector<2x32xf32>
    %599 = arith.mulf %586, %598 : vector<2x32xf32>
    %600 = arith.addf %595, %599 : vector<2x32xf32>
    %601 = math.tanh %600 : vector<2x32xf32>
    %cst_140 = arith.constant 1.000000e+00 : f32
    %602 = vector.broadcast %cst_140 : f32 to vector<2x32xf32>
    %603 = arith.subf %602, %594 : vector<2x32xf32>
    %604 = arith.mulf %603, %601 : vector<2x32xf32>
    %605 = arith.mulf %594, %538 : vector<2x32xf32>
    %606 = arith.addf %604, %605 : vector<2x32xf32>
    %607 = arith.index_cast %540 : i32 to index
    %c0_141 = arith.constant 0 : index
    %c0_142 = arith.constant 0 : index
    %608 = vector.load %arg8[%607, %c0_141, %c0_142] : memref<8x2x32xf32, #tpu.memory_space<vmem>>, vector<1x2x32xf32>
    %609 = vector.shape_cast %608 : vector<1x2x32xf32> to vector<2x32xf32>
    %610 = vector.shape_cast %606 : vector<2x32xf32> to vector<1x2x32xf32>
    tpu.vector_store %arg8[%607, %c0_141, %c0_142], %610 {strides = array<i32>} : memref<8x2x32xf32, #tpu.memory_space<vmem>>, vector<1x2x32xf32>,
    %611 = tpu.concatenate %574, %606 in 0 : vector<2x32xf32>, vector<2x32xf32> -> vector<4x32xf32>
    %c8_i32 = arith.constant 8 : i32
    %c0_143 = arith.constant 0 : index
    %c0_144 = arith.constant 0 : index
    %c0_145 = arith.constant 0 : index
    %612 = vector.load %arg7[%c0_143, %c0_144, %c0_145] : memref<8x2x32xf32, #tpu.memory_space<vmem>>, vector<8x2x32xf32>
    %c0_146 = arith.constant 0 : index
    %c0_147 = arith.constant 0 : index
    %c0_148 = arith.constant 0 : index
    %613 = vector.load %arg8[%c0_146, %c0_147, %c0_148] : memref<8x2x32xf32, #tpu.memory_space<vmem>>, vector<8x2x32xf32>
    %614 = tpu.concatenate %612, %613 in 2 : vector<8x2x32xf32>, vector<8x2x32xf32> -> vector<8x2x64xf32>
    %c0_149 = arith.constant 0 : index
    %c0_150 = arith.constant 0 : index
    %c0_151 = arith.constant 0 : index
    %615 = vector.load %arg5[%c0_149, %c0_150, %c0_151] : memref<8x2x64xf32, #tpu.memory_space<vmem>>, vector<8x2x64xf32>
    tpu.vector_store %arg5[%c0_149, %c0_150, %c0_151], %614 {strides = array<i32>} : memref<8x2x64xf32, #tpu.memory_space<vmem>>, vector<8x2x64xf32>,
    return
  }
}

module attributes {stable_mosaic.version = 11 : i64} {
  func.func @_head_kernel(%arg0: memref<8x2x64xf32, #tpu.memory_space<vmem>>, %arg1: memref<1x1x64xf32, #tpu.memory_space<vmem>>, %arg2: memref<1x1x1xf32, #tpu.memory_space<vmem>>, %arg3: memref<64x32xf32, #tpu.memory_space<vmem>>, %arg4: memref<1x32xf32, #tpu.memory_space<vmem>>, %arg5: memref<32x16xf32, #tpu.memory_space<vmem>>, %arg6: memref<1x16xf32, #tpu.memory_space<vmem>>, %arg7: memref<16x2xf32, #tpu.memory_space<vmem>>, %arg8: memref<1x2xf32, #tpu.memory_space<vmem>>, %arg9: memref<2x2xf32, #tpu.memory_space<vmem>>) attributes {dimension_semantics = [], scalar_prefetch = 0 : i64, scratch_operands = 0 : i64, tpu.core_type = #tpu.core_type<tc>} {
    %c0 = arith.constant 0 : index
    %c0_0 = arith.constant 0 : index
    %c0_1 = arith.constant 0 : index
    %0 = vector.load %arg0[%c0, %c0_0, %c0_1] : memref<8x2x64xf32, #tpu.memory_space<vmem>>, vector<8x2x64xf32>
    %c0_2 = arith.constant 0 : index
    %c0_3 = arith.constant 0 : index
    %c0_4 = arith.constant 0 : index
    %1 = vector.load %arg1[%c0_2, %c0_3, %c0_4] : memref<1x1x64xf32, #tpu.memory_space<vmem>>, vector<1x1x64xf32>
    %2 = vector.broadcast %1 : vector<1x1x64xf32> to vector<8x2x64xf32>
    %3 = arith.mulf %0, %2 : vector<8x2x64xf32>
    %cst = arith.constant dense<0.000000e+00> : vector<8x2xf32>
    %4 = vector.multi_reduction <add>, %3, %cst [2] : vector<8x2x64xf32> to vector<8x2xf32>
    %5 = vector.shape_cast %4 : vector<8x2xf32> to vector<8x2x1xf32>
    %c0_5 = arith.constant 0 : index
    %c0_6 = arith.constant 0 : index
    %c0_7 = arith.constant 0 : index
    %6 = vector.load %arg2[%c0_5, %c0_6, %c0_7] : memref<1x1x1xf32, #tpu.memory_space<vmem>>, vector<1x1x1xf32>
    %7 = vector.broadcast %6 : vector<1x1x1xf32> to vector<8x2x1xf32>
    %8 = arith.addf %5, %7 : vector<8x2x1xf32>
    %9 = math.tanh %8 : vector<8x2x1xf32>
    %10 = math.exp %9 : vector<8x2x1xf32>
    %cst_8 = arith.constant dense<0.000000e+00> : vector<2x1xf32>
    %11 = vector.multi_reduction <add>, %10, %cst_8 [0] : vector<8x2x1xf32> to vector<2x1xf32>
    %12 = vector.shape_cast %11 : vector<2x1xf32> to vector<1x2x1xf32>
    %13 = tpu.reciprocal %12 {approx = true} : vector<1x2x1xf32> -> vector<1x2x1xf32>
    %14 = vector.broadcast %13 : vector<1x2x1xf32> to vector<8x2x1xf32>
    %15 = arith.mulf %10, %14 : vector<8x2x1xf32>
    %16 = vector.broadcast %15 : vector<8x2x1xf32> to vector<8x2x64xf32>
    %17 = arith.mulf %16, %0 : vector<8x2x64xf32>
    %cst_9 = arith.constant dense<0.000000e+00> : vector<2x64xf32>
    %18 = vector.multi_reduction <add>, %17, %cst_9 [0] : vector<8x2x64xf32> to vector<2x64xf32>
    %c0_10 = arith.constant 0 : index
    %c0_11 = arith.constant 0 : index
    %19 = vector.load %arg3[%c0_10, %c0_11] : memref<64x32xf32, #tpu.memory_space<vmem>>, vector<64x32xf32>
    %cst_12 = arith.constant dense<0.000000e+00> : vector<2x32xf32>
    %20 = tpu.matmul %18, %19, %cst_12 {dimension_numbers = #tpu.dot_dimension_numbers<[1], [0], [0], [1], [0, 0, 1, 1], [], []>} : vector<2x64xf32>, vector<64x32xf32>, vector<2x32xf32> -> vector<2x32xf32>
    %c0_13 = arith.constant 0 : index
    %c0_14 = arith.constant 0 : index
    %21 = vector.load %arg4[%c0_13, %c0_14] : memref<1x32xf32, #tpu.memory_space<vmem>>, vector<1x32xf32>
    %22 = vector.broadcast %21 : vector<1x32xf32> to vector<2x32xf32>
    %23 = arith.addf %20, %22 : vector<2x32xf32>
    %cst_15 = arith.constant 0.000000e+00 : f32
    %24 = vector.broadcast %cst_15 : f32 to vector<2x32xf32>
    %25 = arith.maximumf %23, %24 : vector<2x32xf32>
    %c0_16 = arith.constant 0 : index
    %c0_17 = arith.constant 0 : index
    %26 = vector.load %arg5[%c0_16, %c0_17] : memref<32x16xf32, #tpu.memory_space<vmem>>, vector<32x16xf32>
    %cst_18 = arith.constant dense<0.000000e+00> : vector<2x16xf32>
    %27 = tpu.matmul %25, %26, %cst_18 {dimension_numbers = #tpu.dot_dimension_numbers<[1], [0], [0], [1], [0, 0, 1, 1], [], []>} : vector<2x32xf32>, vector<32x16xf32>, vector<2x16xf32> -> vector<2x16xf32>
    %c0_19 = arith.constant 0 : index
    %c0_20 = arith.constant 0 : index
    %28 = vector.load %arg6[%c0_19, %c0_20] : memref<1x16xf32, #tpu.memory_space<vmem>>, vector<1x16xf32>
    %29 = vector.broadcast %28 : vector<1x16xf32> to vector<2x16xf32>
    %30 = arith.addf %27, %29 : vector<2x16xf32>
    %cst_21 = arith.constant 0.000000e+00 : f32
    %31 = vector.broadcast %cst_21 : f32 to vector<2x16xf32>
    %32 = arith.maximumf %30, %31 : vector<2x16xf32>
    %c0_22 = arith.constant 0 : index
    %c0_23 = arith.constant 0 : index
    %33 = vector.load %arg7[%c0_22, %c0_23] : memref<16x2xf32, #tpu.memory_space<vmem>>, vector<16x2xf32>
    %cst_24 = arith.constant dense<0.000000e+00> : vector<2x2xf32>
    %34 = tpu.matmul %32, %33, %cst_24 {dimension_numbers = #tpu.dot_dimension_numbers<[1], [0], [0], [1], [0, 0, 1, 1], [], []>} : vector<2x16xf32>, vector<16x2xf32>, vector<2x2xf32> -> vector<2x2xf32>
    %c0_25 = arith.constant 0 : index
    %c0_26 = arith.constant 0 : index
    %35 = vector.load %arg8[%c0_25, %c0_26] : memref<1x2xf32, #tpu.memory_space<vmem>>, vector<1x2xf32>
    %36 = vector.broadcast %35 : vector<1x2xf32> to vector<2x2xf32>
    %37 = arith.addf %34, %36 : vector<2x2xf32>
    %c0_27 = arith.constant 0 : index
    %c0_28 = arith.constant 0 : index
    %38 = vector.load %arg9[%c0_27, %c0_28] : memref<2x2xf32, #tpu.memory_space<vmem>>, vector<2x2xf32>
    tpu.vector_store %arg9[%c0_27, %c0_28], %37 {strides = array<i32>} : memref<2x2xf32, #tpu.memory_space<vmem>>, vector<2x2xf32>,
    return
  }
}

</mosaic_0001>

<bundles_post_ra>
// kernel: attentive_bigru_forward.5
= control target key start
LH: loop header
LB: loop body
LE: loop exit
PB: predicated region body
PF: predicated region fallthrough
CT: control target
= control target key end

     0   :  { %s847_s0 = inlined_call_operand.vmem [shape: f32[8,2,64], index: 0, kind: input, shape index: {}]   ;;  %s848_s1 = inlined_call_operand.vmem [shape: f32[1,1,64], index: 1, kind: input, shape index: {}]   ;;  %s849_s2 = inlined_call_operand.<no memory space> [shape: f32[1,1,1], index: 2, kind: input, shape index: {}]   ;;  %s850_s3 = inlined_call_operand.vmem [shape: f32[64,32], index: 3, kind: input, shape index: {}]   ;;  %s851_s4 = inlined_call_operand.vmem [shape: f32[1,32], index: 4, kind: input, shape index: {}]   ;;  %s852_s5 = inlined_call_operand.vmem [shape: f32[32,16], index: 5, kind: input, shape index: {}]   ;;  %s853_s6 = inlined_call_operand.vmem [shape: f32[1,16], index: 6, kind: input, shape index: {}]   ;;  %s854_s7 = inlined_call_operand.vmem [shape: f32[16,2], index: 7, kind: input, shape index: {}]   ;;  %s855_s8 = inlined_call_operand.vmem [shape: f32[1,2], index: 8, kind: input, shape index: {}]   ;;  %s856_s9 = inlined_call_operand.hbm [shape: f32[2,2], index: 9, kind: output, shape index: {}]  }
   0x1   :  { %v14_v0 = vstv %s849_s2 }
   0x2   :  { %15 = vst [vmem:[#allocation2] sm:$0x1] %v14_v0 }
   0x3   :  { %v694_v1 = vld [vmem:[%s847_s0] sm:$0x3]  ;;  %vm58_vm0 = vcmask 517120   ;;  %v703_v4 = vld [vmem:[%s847_s0 + $0x4] sm:$0x3] }
   0x4   :  { %v485_v2 = vld [vmem:[%s848_s1] ss:$0 sm:$0xff]  ;;  %v708_v5 = vld [vmem:[%s847_s0 + $0x2] sm:$0x3]  ;;  %v713_v6 = vld [vmem:[%s847_s0 + $0x6] sm:$0x3] }
   0x5   :  { %v50_v3 = vmul.f32 %v485_v2, %v694_v1  ;;  %v52_v7 = vmul.f32 %v485_v2, %v703_v4  ;;  %v51_v8 = vmul.f32 %v485_v2, %v708_v5  ;;  %v53_v9 = vmul.f32 %v485_v2, %v713_v6  ;;  %v721_v10 = vld [vmem:[%s847_s0 + $0x8] sm:$0x3]  ;;  %v727_v12 = vld [vmem:[%s847_s0 + $0xa] sm:$0x3] }
   0x7   :  { %v59_v11 = vsel %vm58_vm0, %v50_v3, 0.0  ;;  %v65_v13 = vsel %vm58_vm0, %v52_v7, 0.0 }
   0x8   :  { %60 = vadd.xlane.f32.xlu0 %v59_v11 }
   0x9   :  { %16 = vsyncpa [#allocation4], 0  ;;  %66 = vadd.xlane.f32.xlu1 %v65_v13  ;;  %v62_v14 = vsel %vm58_vm0, %v51_v8, 0.0  ;;  %v54_v15 = vmul.f32 %v485_v2, %v721_v10  ;;  %v68_v16 = vsel %vm58_vm0, %v53_v9, 0.0  ;;  %v55_v17 = vmul.f32 %v485_v2, %v727_v12  ;;  %v737_v18 = vld [vmem:[%s847_s0 + $0xc] sm:$0x3] }
   0xa   :  { %v742_v19 = vld [vmem:[%s847_s0 + $0xe] sm:$0x3]  ;;  %v56_v21 = vmul.f32 %v485_v2, %v737_v18  ;;  %v633_v26 = vmov 0   ;;  %v486_v27 = vld [vmem:[#allocation2] ss:$0 sm:$0xff]  ;;  %vm122_vm1 = vcmask 1024  }
   0xb   :  { %v71_v20 = vsel %vm58_vm0, %v54_v15, 0.0  ;;  %v74_v22 = vsel %vm58_vm0, %v55_v17, 0.0  ;;  %v57_v23 = vmul.f32 %v485_v2, %v742_v19  ;;  %574 = vset.pattern.permute.xlu1 %v633_v26  ;;  %573 = vset.pattern.permute.xlu0 %v633_v26  ;;  %vm635_vm2 = vmmov 0   ;;  %s637_s12 = smov [#allocation3]  }
   0xc   :  { %63 = vadd.xlane.f32.xlu0 %v62_v14  ;;  %v77_v24 = vsel %vm58_vm0, %v56_v21, 0.0  ;;  %vm225_vm3 = vcmask 523264   ;;  %vm311_vm4 = vcmask 261120   ;;  %vm395_vm5 = vcmask 130048   ;;  %s477_s13 = sshll.u32 %s637_s12, 4  ;;  %s478_s13 = int_to_ptr.vmem [resolvable:$true] %s477_s13 }
   0xd   :  { %69 = vadd.xlane.f32.xlu1 %v68_v16  ;;  %v80_v25 = vsel %vm58_vm0, %v57_v23, 0.0  ;;  %vm469_vm6 = vcmask 9216   ;;  %p614_p1 = scmp.lt.s32.totalorder %s478_s13, %s478_s13 }
  0x10   :  { %72 = vadd.xlane.f32.xlu0 %v71_v20 }
  0x11   :  { %75 = vadd.xlane.f32.xlu1 %v74_v22 }
  0x14   :  { %78 = vadd.xlane.f32.xlu0 %v77_v24 }
  0x15   :  { %81 = vadd.xlane.f32.xlu1 %v80_v25 }
  0x95   :  { %v61_v28 = vpop.xlane.xlu0 %60 }
  0x96   :  { %v90_v29 = vadd.f32 %v486_v27, %v61_v28  ;;  %v67_v30 = vpop.xlane.xlu1 %66 }
  0x97   :  { %v92_v31 = vadd.f32 %v486_v27, %v67_v30 }
  0x98   :  { %575 = vtanh.f32 %v90_v29 }
  0x99   :  { %577 = vtanh.f32 %v92_v31  ;;  %v64_v32 = vpop.xlane.xlu0 %63 }
  0x9a   :  { %v91_v33 = vadd.f32 %v486_v27, %v64_v32  ;;  %v70_v34 = vpop.xlane.xlu1 %69 }
  0x9b   :  { %v93_v35 = vadd.f32 %v486_v27, %v70_v34  ;;  %v211_v34 = vld [vmem:[%s850_s3 + $0x8] sm:$0xff] }
  0x9c   :  { %579 = vtanh.f32 %v91_v33  ;;  %v210_v33 = vld [vmem:[%s850_s3] sm:$0xff] }
  0x9d   :  { %581 = vtanh.f32 %v93_v35  ;;  %v73_v36 = vpop.xlane.xlu0 %72  ;;  %v548_v35 = vpack.c.bf16 %v211_v34, %v210_v33 }
  0x9e   :  { %v94_v37 = vadd.f32 %v486_v27, %v73_v36  ;;  %v76_v38 = vpop.xlane.xlu1 %75 }
  0x9f   :  { %v95_v39 = vadd.f32 %v486_v27, %v76_v38  ;;  %v212_v38 = vld [vmem:[%s850_s3 + $0x10] sm:$0xff] }
  0xa0   :  { %583 = vtanh.f32 %v94_v37  ;;  %v634_v37 = vmov 0.0|0.0  }
  0xa1   :  { %585 = vtanh.f32 %v95_v39  ;;  %v79_v40 = vpop.xlane.xlu0 %78  ;;  %547 = vmatprep.subr.bf16.mxu0 %v634_v37  ;;  %559 = vmatprep.subr.bf16.mxu1 %v634_v37  ;;  %v213_v39 = vld [vmem:[%s850_s3 + $0x18] sm:$0xff] }
  0xa2   :  { %v576_v41 = vpop.eup %575  ;;  %v96_v42 = vadd.f32 %v486_v27, %v79_v40  ;;  %v82_v43 = vpop.xlane.xlu1 %81  ;;  %549 = vmatpush3.bf16.msra.mxu0 %v548_v35  ;;  %v551_v40 = vpack.c.bf16 %v213_v39, %v212_v38 }
  0xa3   :  { %v578_v44 = vpop.eup %577  ;;  %v106_v45 = vmul.f32 1.442695, %v576_v41  ;;  %v97_v46 = vadd.f32 %v486_v27, %v82_v43  ;;  %550 = vmatprep.subr.bf16.mxu0 %v634_v37  ;;  %v215_v43 = vld [vmem:[%s850_s3 + $0x28] sm:$0xff] }
  0xa4   :  { %v110_v47 = vmul.f32 1.442695, %v578_v44  ;;  %587 = vtanh.f32 %v96_v42  ;;  %v214_v42 = vld [vmem:[%s850_s3 + $0x20] sm:$0xff] }
  0xa5   :  { %589 = vpow2.f32 %v106_v45  ;;  %v554_v44 = vpack.c.bf16 %v215_v43, %v214_v42 }
  0xa6   :  { %v580_v48 = vpop.eup %579  ;;  %591 = vtanh.f32 %v97_v46  ;;  %552 = vmatpush3.bf16.msra.mxu0 %v551_v40  ;;  %v216_v46 = vld [vmem:[%s850_s3 + $0x30] sm:$0xff] }
  0xa7   :  { %v582_v49 = vpop.eup %581  ;;  %v108_v50 = vmul.f32 1.442695, %v580_v48  ;;  %593 = vpow2.f32 %v110_v47  ;;  %553 = vmatprep.subr.bf16.mxu0 %v634_v37  ;;  %v217_v47 = vld [vmem:[%s850_s3 + $0x38] sm:$0xff] }
  0xa8   :  { %v112_v51 = vmul.f32 1.442695, %v582_v49  ;;  %v557_v48 = vpack.c.bf16 %v217_v47, %v216_v46  ;;  %v636_v49 = vmov 0.0  }
  0xa9   :  { %595 = vpow2.f32 %v108_v50  ;;  %526 = vmatprep.mubr.msk.f32.mxu0 %vm635_vm2, %v636_v49  ;;  %537 = vmatprep.mubr.msk.f32.mxu1 %vm635_vm2, %v636_v49  ;;  %v300_v50 = vld [vmem:[%s852_s5] sm:$0xff] }
  0xaa   :  { %v584_v52 = vpop.eup %583  ;;  %597 = vpow2.f32 %v112_v51  ;;  %555 = vmatpush3.bf16.msra.mxu0 %v554_v44  ;;  %v301_v51 = vld [vmem:[%s852_s5 + $0x8] sm:$0xff] }
  0xab   :  { %v586_v53 = vpop.eup %585  ;;  %v114_v54 = vmul.f32 1.442695, %v584_v52  ;;  %556 = vmatprep.subr.bf16.mxu0 %v634_v37  ;;  %v560_v52 = vpack.c.bf16 %v301_v51, %v300_v50 }
  0xac   :  { %v116_v55 = vmul.f32 1.442695, %v586_v53 }
  0xad   :  { %599 = vpow2.f32 %v114_v54  ;;  %561 = vmatpush3.bf16.msra.mxu1 %v560_v52 }
  0xae   :  { %v588_v56 = vpop.eup %587  ;;  %601 = vpow2.f32 %v116_v55  ;;  %558 = vmatpush3.bf16.msra.mxu0 %v557_v48  ;;  %562 = vmatprep.subr.bf16.mxu1 %v634_v37 }
  0xaf   :  { %v118_v57 = vmul.f32 1.442695, %v588_v56  ;;  %v590_v58 = vpop.eup %589 }
  0xb0   :  { %v592_v59 = vpop.eup %591  ;;  %v123_v0 = vsel %vm122_vm1, %v590_v58, 0.0 }
  0xb1   :  { %603 = vpow2.f32 %v118_v57  ;;  %v594_v60 = vpop.eup %593  ;;  %v120_v61 = vmul.f32 1.442695, %v592_v59 }
  0xb2   :  { %v126_v7 = vsel %vm122_vm1, %v594_v60, 0.0 }
  0xb3   :  { %v596_v62 = vpop.eup %595  ;;  %605 = vpow2.f32 %v120_v61 }
  0xb4   :  { %v598_v63 = vpop.eup %597  ;;  %v124_v2 = vsel %vm122_vm1, %v596_v62, 0.0 }
  0xb5   :  { %v125_v3 = vadd.f32 %v124_v2, %v123_v0  ;;  %v128_v8 = vsel %vm122_vm1, %v598_v63, 0.0 }
  0xb7   :  { %v600_v9 = vpop.eup %599  ;;  %v127_v11 = vadd.f32 %v126_v7, %v125_v3 }
  0xb8   :  { %v602_v13 = vpop.eup %601  ;;  %v130_v14 = vsel %vm122_vm1, %v600_v9, 0.0 }
  0xb9   :  { %v129_v15 = vadd.f32 %v128_v8, %v127_v11  ;;  %v132_v16 = vsel %vm122_vm1, %v602_v13, 0.0 }
  0xbb   :  { %v604_v17 = vpop.eup %603  ;;  %v131_v20 = vadd.f32 %v130_v14, %v129_v15 }
  0xbc   :  { %v134_v21 = vsel %vm122_vm1, %v604_v17, 0.0 }
  0xbd   :  { %v133_v22 = vadd.f32 %v132_v16, %v131_v20  ;;  %v606_v23 = vpop.eup %605 }
  0xbe   :  { %v136_v25 = vsel %vm122_vm1, %v606_v23, 0.0 }
  0xbf   :  { %v135_v24 = vadd.f32 %v134_v21, %v133_v22  ;;  %v302_v22 = vld [vmem:[%s852_s5 + $0x10] sm:$0xff] }
  0xc1   :  { %v137_v26 = vadd.f32 %v136_v25, %v135_v24 }
  0xc3   :  { %607 = vrcp.f32 %v137_v26 }
  0xcd   :  { %v608_v27 = vpop.eup %607 }
  0xce   :  { %v140_v28 = vmul.f32 %v608_v27, %v596_v62  ;;  %v139_v29 = vmul.f32 %v608_v27, %v590_v58  ;;  %v141_v30 = vmul.f32 %v608_v27, %v594_v60  ;;  %v142_v31 = vmul.f32 %v608_v27, %v598_v63 }
  0xcf   :  { %v143_v32 = vmul.f32 %v608_v27, %v600_v9  ;;  %v144_v36 = vmul.f32 %v608_v27, %v602_v13  ;;  %v145_v41 = vmul.f32 %v608_v27, %v604_v17  ;;  %v146_v45 = vmul.f32 %v608_v27, %v606_v23 }
  0xd0   :  { %154 = vperm.xlu1 %574, %v140_v28   ;;  %149 = vperm.xlu0 %573, %v139_v29   ;;  %v386_v28 = vld [vmem:[%s854_s7] sm:$0xff]  ;;  %v387_v29 = vld [vmem:[%s854_s7 + $0x8] sm:$0xff]  ;;  %s609_s7 = scalar_lea.vmem %s478_s13, 32 }
  0xd1   :  { %p610_p0 = scmp.ne.s32.totalorder %s478_s13, %s609_s7  ;;  %p615_p2 = scmp.lt.s32.totalorder %s609_s7, %s609_s7 }
  0xd3   :  { %p616_p3 = por %p615_p2, %p614_p1 }
  0xd4   :  { %159 = vperm.xlu1 %574, %v141_v30   ;;  %v566_v30 = vpack.c.bf16 %v387_v29, %v386_v28 }
  0xd5   :  { %p617_p4 = pnand %p616_p3, %p610_p0 }
  0xd8   :  { %164 = vperm.xlu1 %574, %v142_v31   ;;  %v489_v31 = vld [vmem:[%s853_s6] ss:$0 sm:$0xff] }
  0xdc   :  { %169 = vperm.xlu1 %574, %v143_v32  }
  0xe0   :  { %174 = vperm.xlu1 %574, %v144_v36   ;;  %v491_v36 = vld [vmem:[%s855_s8] ss:$0 sm:$0xff] }
  0xe4   :  { %179 = vperm.xlu1 %574, %v145_v41  }
  0xe8   :  { %184 = vperm.xlu1 %574, %v146_v45  }
 0x14f   :  { %v155_v53 = vpop.permute.xlu1 %154  ;;  %v150_v55 = vpop.permute.xlu0 %149 }
 0x150   :  { %v188_v57 = vmul.f32 %v155_v53, %v708_v5  ;;  %v187_v58 = vmul.f32 %v150_v55, %v694_v1 }
 0x152   :  { %v196_v61 = vsel %vm58_vm0, %v188_v57, 0.0  ;;  %v195_v62 = vsel %vm58_vm0, %v187_v58, 0.0 }
 0x153   :  { %v160_v54 = vpop.permute.xlu1 %159  ;;  %v197_v3 = vadd.f32 %v196_v61, %v195_v62 }
 0x154   :  { %v189_v59 = vmul.f32 %v160_v54, %v703_v4 }
 0x156   :  { %v198_v0 = vsel %vm58_vm0, %v189_v59, 0.0 }
 0x157   :  { %v165_v56 = vpop.permute.xlu1 %164  ;;  %v199_v1 = vadd.f32 %v198_v0, %v197_v3 }
 0x158   :  { %v190_v63 = vmul.f32 %v165_v56, %v713_v6 }
 0x15a   :  { %v200_v8 = vsel %vm58_vm0, %v190_v63, 0.0 }
 0x15b   :  { %v170_v60 = vpop.permute.xlu1 %169  ;;  %v201_v9 = vadd.f32 %v200_v8, %v199_v1 }
 0x15c   :  { %v191_v2 = vmul.f32 %v170_v60, %v721_v10 }
 0x15e   :  { %v202_v4 = vsel %vm58_vm0, %v191_v2, 0.0 }
 0x15f   :  { %v175_v7 = vpop.permute.xlu1 %174  ;;  %v203_v6 = vadd.f32 %v202_v4, %v201_v9 }
 0x160   :  { %v192_v5 = vmul.f32 %v175_v7, %v727_v12 }
 0x162   :  { %v204_v13 = vsel %vm58_vm0, %v192_v5, 0.0 }
 0x163   :  { %v180_v11 = vpop.permute.xlu1 %179  ;;  %v205_v16 = vadd.f32 %v204_v13, %v203_v6 }
 0x164   :  { %v193_v14 = vmul.f32 %v180_v11, %v737_v18  ;;  %v303_v18 = vld [vmem:[%s852_s5 + $0x18] sm:$0xff] }
 0x165   :  { %v563_v23 = vpack.c.bf16 %v303_v18, %v302_v22 }
 0x166   :  { %v206_v15 = vsel %vm58_vm0, %v193_v14, 0.0 }
 0x167   :  { %v185_v10 = vpop.permute.xlu1 %184  ;;  %v207_v20 = vadd.f32 %v206_v15, %v205_v16  ;;  %564 = vmatpush3.bf16.msra.mxu1 %v563_v23 }
 0x168   :  { %v194_v17 = vmul.f32 %v185_v10, %v742_v19  ;;  %565 = vmatprep.subr.bf16.mxu1 %v634_v37  ;;  %v487_v19 = vld [vmem:[%s851_s4] ss:$0 sm:$0xff] }
 0x16a   :  { %v208_v21 = vsel %vm58_vm0, %v194_v17, 0.0 }
 0x16b   :  { %v209_v12 = vadd.f32 %v208_v21, %v207_v20 }
 0x16d   :  { %527 = vmatmul.mubr.msk.f32.vlgmr.msra.gmra.mrb[0].mxu0 %vm225_vm3, %v209_v12 }
 0x240   :  { %v295_v24 = vpop.f32.mrb[0].mxu0 }
 0x241   :  { %v296_v25 = vadd.f32 %v487_v19, %v295_v24  ;;  %v528_v26 = vpop.f32.mrb[1].mxu0 }
 0x243   :  { %v299_v27 = vmax.f32 %v296_v25, 0.0 }
 0x245   :  { %538 = vmatmul.mubr.msk.f32.vlgmr.msra.gmra.mrb[0].mxu1 %vm311_vm4, %v299_v27 }
 0x246   :  { %544 = vmatprep.mubr.msk.f32.mxu1 %vm635_vm2, %v636_v49  ;;  %567 = vmatpush3.bf16.msra.mxu1 %v566_v30 }
 0x318   :  { %v381_v32 = vpop.f32.mrb[0].mxu1 }
 0x319   :  { %v382_v33 = vadd.f32 %v489_v31, %v381_v32  ;;  %v539_v34 = vpop.f32.mrb[1].mxu1 }
 0x31b   :  { %v385_v35 = vmax.f32 %v382_v33, 0.0 }
 0x31d   :  { %545 = vmatmul.mubr.msk.f32.vlgmr.msra.gmra.mrb[2].mxu1 %vm395_vm5, %v385_v35 }
 0x3f0   :  { %v465_v37 = vpop.f32.mrb[2].mxu1 }
 0x3f1   :  { %v466_v38 = vadd.f32 %v491_v36, %v465_v37  ;;  %v546_v39 = vpop.f32.mrb[3].mxu1 }
 0x3f3   :  { %470 = vst.msk [vmem:[#allocation3] sm:$0x3] %vm469_vm6, %v466_v38 }
 0x3f4   :  { %620 = shalt.err (!%p617_p4)
}
 0x3f5   :  { %s621_s15 = scalar_lea.hbm %s856_s9, 32 }
 0x3f6   :  { %p622_p5 = scmp.ne.s32.totalorder %s856_s9, %s621_s15  ;;  %p625_p6 = scmp.lt.u32.totalorder %s621_s15, %s856_s9 }
 0x3f8   :  { %p627_p7 = pnand %p625_p6, %p622_p5 }
 0x3fa   :  { %630 = shalt.err (!%p627_p7)
}
 0x3fb   :  { %480 = dma.vmem_to_hbm [thread:$0]  %s478_s13, 32, %s856_s9, [#allocation4]  }
 0x3fc   :  { %631 = dma.done.wait [#allocation4], 32  }
 0x3fd   :  { %632 = vsyncadd [#allocation4], 4294967264 }
 0x3fe   :  { %484 = vsyncpa [#allocation4], 1 }

// kernel: attentive_bigru_forward.3
= control target key start
LH: loop header
LB: loop body
LE: loop exit
PB: predicated region body
PF: predicated region fallthrough
CT: control target
= control target key end

     0   :  { %v34_v0 = vlaneseq  ;;  %v2277_v4 = vmov 0.0   ;;  %v2278_v5 = vmov 1983009808   ;;  %s2279_s8 = smov 64   ;;  %vm104_vm0 = vcmask 130048   ;;  %s2281_s10 = smov 32   ;;  %s2771_s3 = inlined_call_operand.vmem [shape: f32[32,192], index: 3, kind: input, shape index: {}]   ;;  %s2772_s1 = inlined_call_operand.vmem [shape: f32[16,192], index: 1, kind: input, shape index: {}]   ;;  %s2773_s0 = inlined_call_operand.vmem [shape: f32[8,2,16], index: 0, kind: input, shape index: {}]   ;;  %s2774_s4 = inlined_call_operand.vmem [shape: f32[1,64], index: 4, kind: input, shape index: {}]   ;;  %s2775_s2 = inlined_call_operand.vmem [shape: f32[1,192], index: 2, kind: input, shape index: {}]   ;;  %s2776_s5 = inlined_call_operand.vmem [shape: f32[8,2,64], index: 5, kind: output, shape index: {}]  }
   0x1   :  { %v246_v1 = vld [vmem:[%s2771_s3 + $0x8] sm:$0xff]  ;;  %v248_v2 = vld [vmem:[%s2771_s3 + $0x18] sm:$0xff]  ;;  %v245_v3 = vld [vmem:[%s2771_s3] sm:$0xff]  ;;  %173 = vmatprep.mubr.f32.mxu0 %v2277_v4  ;;  %v44_v6 = vunpack.c.l.s4 %v2278_v5  ;;  %322 = vmatprep.mubr.f32.mxu1 %v2277_v4  ;;  %vm234_vm1 = vcmask 1041408   ;;  %vm235_vm2 = vcmask 519170   ;;  %vm385_vm4 = vcmask 254976  }
   0x2   :  { %v2323_v7 = vpack.c.bf16 %v248_v2, %v246_v1  ;;  %v247_v8 = vld [vmem:[%s2771_s3 + $0x10] sm:$0xff]  ;;  %v29_v9 = vld [vmem:[%s2772_s1 + $0x8] sm:$0xff]  ;;  %v31_v10 = vld [vmem:[%s2772_s1 + $0x18] sm:$0xff]  ;;  %v2334_v11 = vshrl.u32 %v34_v0, 7  ;;  %vm254_vm5 = vcmask 261120   ;;  %vm2028_vm6 = vcmask 517120  }
   0x3   :  { %v2336_v12 = vpack.c.bf16 %v247_v8, %v245_v3  ;;  %v2075_v13 = vpack.c.bf16 %v31_v10, %v29_v9  ;;  %v28_v14 = vld [vmem:[%s2772_s1] sm:$0xff]  ;;  %v30_v15 = vld [vmem:[%s2772_s1 + $0x10] sm:$0xff]  ;;  %v250_v16 = vld [vmem:[%s2771_s3 + $0x28] sm:$0xff]  ;;  %v45_v17 = vunpack.c.0.s8 %v44_v6 }
   0x4   :  { %2080 = vmatprep.subr.bf16.mxu1 %v2323_v7  ;;  %v2077_v18 = vpack.c.bf16 %v30_v15, %v28_v14  ;;  %v252_v19 = vld [vmem:[%s2771_s3 + $0x38] sm:$0xff]  ;;  %v249_v20 = vld [vmem:[%s2771_s3 + $0x20] sm:$0xff]  ;;  %v251_v21 = vld [vmem:[%s2771_s3 + $0x30] sm:$0xff]  ;;  %v36_v44 = vsub.s32 0, %v2334_v11  ;;  %v40_v45 = vsub.s32 1, %v2334_v11 }
   0x5   :  { %2082 = vmatpush1.bf16.msra.mxu1 %v2336_v12  ;;  %2076 = vmatprep.subr.bf16.mxu0 %v2075_v13  ;;  %v2358_v22 = vpack.c.bf16 %v252_v19, %v250_v16  ;;  %v2360_v23 = vpack.c.bf16 %v251_v21, %v249_v20  ;;  %v20_v24 = vld [vmem:[%s2773_s0] sm:$0x3]  ;;  %v21_v25 = vld [vmem:[%s2773_s0 + $0x2] sm:$0x3]  ;;  %v22_v26 = vld [vmem:[%s2773_s0 + $0x4] sm:$0x3]  ;;  %v2372_v27 = vsub.s32 %v45_v17, %v2334_v11 }
   0x6   :  { %2078 = vmatpush1.bf16.msra.mxu0 %v2077_v18  ;;  %v23_v28 = vld [vmem:[%s2773_s0 + $0x6] sm:$0x3]  ;;  %v58_v29 = vcombine.low %v20_v24, %v21_v25  ;;  %v24_v30 = vld [vmem:[%s2773_s0 + $0x8] sm:$0x3]  ;;  %v25_v31 = vld [vmem:[%s2773_s0 + $0xa] sm:$0x3] }
   0x7   :  { %2084 = vmatprep.subr.bf16.mxu1 %v2358_v22  ;;  %v59_v32 = vcombine.low %v22_v26, %v23_v28  ;;  %v26_v33 = vld [vmem:[%s2773_s0 + $0xc] sm:$0x3]  ;;  %v27_v34 = vld [vmem:[%s2773_s0 + $0xe] sm:$0x3]  ;;  %v75_v35 = vcombine.low %v24_v30, %v25_v31  ;;  %v2393_v36 = vld [vmem:[%s2774_s4] ss:$0 sm:$0xff]  ;;  %2088 = vmatprep.subr.bf16.mxu0 %v2323_v7 }
   0x8   :  { %v66_v37 = vrot.slane %v58_v29, %v2372_v27  ;;  %v76_v38 = vcombine.low %v26_v33, %v27_v34  ;;  %344 = vrot.lane.b32.xlu0 %v2393_v36, %s2279_s8  ;;  %v32_v46 = vld [vmem:[%s2775_s2] sm:$0x3]  ;;  %vm2431_vm3 = vmor %vm235_vm2, %vm234_vm1  ;;  %s2280_s2 = smov 96  }
   0x9   :  { %2086 = vmatpush1.bf16.msra.mxu1 %v2360_v23  ;;  %v73_v39 = vrot.slane %v59_v32, %v2372_v27  ;;  %v83_v40 = vrot.slane %v75_v35, %v2372_v27  ;;  %v37_v47 = vrot.slane %v32_v46, %v36_v44  ;;  %v41_v48 = vrot.slane %v32_v46, %v40_v45 }
   0xa   :  { %v90_v41 = vrot.slane %v76_v38, %v2372_v27  ;;  %2096 = vmatprep.subr.bf16.mxu1 %v2323_v7 }
   0xb   :  { %v74_v42 = vcombine.low %v66_v37, %v73_v39  ;;  %v42_v49 = vcombine.low %v37_v47, %v41_v48 }
   0xc   :  { %323 = vmatmul.mubr.f32.vlgmr.msra.gmra.mrb[0].mxu1 %v2277_v4  ;;  %v91_v43 = vcombine.low %v83_v40, %v90_v41 }
   0xd   :  { %2041 = vmatmul.mubr.msk.f32.vlgmr.msra.gmra.mrb[0].mxu0 %vm104_vm0, %v74_v42  ;;  %2098 = vmatpush1.bf16.msra.mxu1 %v2336_v12  ;;  %v49_v50 = vrot.slane %v42_v49, %v2372_v27 }
   0xe   :  { %179 = vmatprep.mubr.f32.mxu0 %v2277_v4  ;;  %2090 = vmatpush1.bf16.msra.mxu0 %v2336_v12 }
   0xf   :  { %2092 = vmatprep.subr.bf16.mxu0 %v2358_v22  ;;  %2100 = vmatprep.subr.bf16.mxu1 %v2358_v22  ;;  %v92_v51 = vcombine.low %v49_v50, %v49_v50 }
  0x10   :  { %755 = vmatprep.mubr.f32.mxu1 %v2277_v4 }
  0x11   :  { %2042 = vmatmul.mubr.msk.f32.gmra.mrb[2].mxu0 %vm104_vm0, %v91_v43  ;;  %2102 = vmatpush1.bf16.msra.mxu1 %v2360_v23  ;;  %v99_v52 = vrot.slane %v92_v51, %v2372_v27 }
  0x12   :  { %2094 = vmatpush1.bf16.msra.mxu0 %v2360_v23  ;;  %537 = vmatprep.mubr.f32.mxu0 %v2277_v4 }
  0x13   :  { %2104 = vmatprep.subr.bf16.mxu0 %v2323_v7  ;;  %2112 = vmatprep.subr.bf16.mxu1 %v2323_v7  ;;  %v100_v53 = vcombine.low %v99_v52, %v99_v52  ;;  %v101_v55 = vcombine.high %v99_v52, %v99_v52 }
  0x7a   :  { %v2423_v54 = vpop.permute.xlu0 %344 }
  0xdf   :  { %v324_v56 = vpop.f32.mrb[0].mxu1 }
  0xe0   :  { %v175_v57 = vpop.f32.mrb[0].mxu0  ;;  %v326_v58 = vpop.f32.mrb[1].mxu1  ;;  %v347_v59 = vadd.f32 %v2423_v54, %v324_v56  ;;  %v394_v25 = vrot.slane %v324_v56, %v2372_v27 }
  0xe1   :  { %v176_v60 = vadd.f32 %v175_v57, %v100_v53  ;;  %v177_v61 = vpop.f32.mrb[1].mxu0  ;;  %v425_v62 = vadd.f32 %v2393_v36, %v326_v58  ;;  %v414_v26 = vrot.slane %v326_v58, %v2372_v27 }
  0xe2   :  { %v178_v63 = vadd.f32 %v177_v61, %v101_v55  ;;  %v355_v0 = vrot.slane %v347_v59, %v2372_v27  ;;  %v395_v28 = vcombine.high %v394_v25, %v394_v25 }
  0xe3   :  { %v433_v1 = vrot.slane %v425_v62, %v2372_v27  ;;  %v415_v30 = vcombine.high %v414_v26, %v414_v26 }
  0xe4   :  { %v190_v2 = vcombine.low %v176_v60, %v178_v63  ;;  %v191_v3 = vcombine.high %v176_v60, %v178_v63  ;;  %v181_v5 = vpop.f32.mrb[2].mxu0  ;;  %356 = vrot.lane.b32.xlu1 %v355_v0, %s2279_s8 }
  0xe5   :  { %v182_v8 = vadd.f32 %v181_v5, %v100_v53  ;;  %v183_v9 = vpop.f32.mrb[3].mxu0  ;;  %v434_v10 = vcombine.high %v433_v1, %v433_v1 }
  0xe6   :  { %v198_v11 = vrot.slane %v190_v2, %v2372_v27  ;;  %v205_v13 = vrot.slane %v191_v3, %v2372_v27  ;;  %v184_v14 = vadd.f32 %v183_v9, %v101_v55 }
  0xe7   :  { %435 = vrot.lane.b32.xlu0 %v434_v10, %s2279_s8 }
  0xe8   :  { %v206_v15 = vcombine.high %v198_v11, %v198_v11  ;;  %v207_v16 = vcombine.high %v205_v13, %v205_v13  ;;  %237 = vst.msk [vmem:[#allocation2] sm:$0xf] %vm2431_vm3, %v198_v11  ;;  %239 = vst.msk [vmem:[#allocation2 + $0x8] sm:$0xf] %vm2431_vm3, %v205_v13  ;;  %v208_v17 = vcombine.low %v182_v8, %v184_v14 }
  0xe9   :  { %v209_v18 = vcombine.high %v182_v8, %v184_v14 }
  0xea   :  { %238 = vst.msk [vmem:[#allocation2 + $0x4] sm:$0xf] %vm2431_vm3, %v206_v15  ;;  %240 = vst.msk [vmem:[#allocation2 + $0xc] sm:$0xf] %vm2431_vm3, %v207_v16  ;;  %v216_v19 = vrot.slane %v208_v17, %v2372_v27 }
  0xeb   :  { %v223_v20 = vrot.slane %v209_v18, %v2372_v27 }
  0xec   :  { %v224_v21 = vcombine.high %v216_v19, %v216_v19  ;;  %241 = vst.msk [vmem:[#allocation2 + $0x10] sm:$0xf] %vm2431_vm3, %v216_v19 }
  0xed   :  { %v225_v24 = vcombine.high %v223_v20, %v223_v20  ;;  %243 = vst.msk [vmem:[#allocation2 + $0x18] sm:$0xf] %vm2431_vm3, %v223_v20 }
  0xee   :  { %242 = vst.msk [vmem:[#allocation2 + $0x14] sm:$0xf] %vm2431_vm3, %v224_v21 }
  0xef   :  { %244 = vst.msk [vmem:[#allocation2 + $0x1c] sm:$0xf] %vm2431_vm3, %v225_v24  ;;  %v329_v34 = vld [vmem:[#allocation2] sm:$0xf] }
  0xf0   :  { %v332_v35 = vadd.f32 %v329_v34, %v324_v56 }
  0xf1   :  { %v545_v26 = vld [vmem:[#allocation2 + $0x4] sm:$0xf] }
  0xf2   :  { %v2043_v37 = vmul.f32 -1.442695, %v332_v35 }
  0xf4   :  { %2148 = vpow2.f32 %v2043_v37  ;;  %v547_v24 = vld [vmem:[#allocation2 + $0x18] sm:$0xf] }
  0xf6   :  { %v331_v29 = vld [vmem:[#allocation2 + $0x1c] sm:$0xf] }
  0xf7   :  { %439 = vrot.lane.b32.xlu1 %v331_v29, %s2280_s2  ;;  %v397_v31 = vadd.f32 %v395_v28, %v331_v29  ;;  %v405_v32 = vrot.slane %v331_v29, 2 }
  0xf9   :  { %v417_v33 = vadd.f32 %v415_v30, %v405_v32  ;;  %v2045_v38 = vmul.f32 -1.442695, %v397_v31 }
  0xfb   :  { %2150 = vpow2.f32 %v2045_v38  ;;  %v2046_v49 = vmul.f32 -1.442695, %v417_v33 }
  0xfe   :  { %v2149_v39 = vpop.eup %2148 }
  0xff   :  { %v336_v41 = vadd.f32 1.0, %v2149_v39 }
 0x101   :  { %2152 = vrcp.f32 %v336_v41 }
 0x105   :  { %v2151_v40 = vpop.eup %2150 }
 0x106   :  { %v401_v42 = vadd.f32 1.0, %v2151_v40 }
 0x108   :  { %2154 = vrcp.f32 %v401_v42 }
 0x109   :  { %2156 = vpow2.f32 %v2046_v49 }
 0x10b   :  { %v2153_v43 = vpop.eup %2152 }
 0x10c   :  { %v366_v6 = vsub.f32 1.0, %v2153_v43  ;;  %v372_v9 = vmul.f32 0.0, %v2153_v43 }
 0x112   :  { %v2155_v46 = vpop.eup %2154 }
 0x113   :  { %v2157_v50 = vpop.eup %2156 }
 0x114   :  { %v421_v52 = vadd.f32 1.0, %v2157_v50 }
 0x116   :  { %2158 = vrcp.f32 %v421_v52 }
 0x120   :  { %v2159_v59 = vpop.eup %2158 }
 0x121   :  { %v449_v61 = vsub.f32 1.0, %v2159_v59  ;;  %v451_v0 = vmul.f32 0.0, %v2159_v59 }
 0x156   :  { %v357_v44 = vpop.permute.xlu1 %356 }
 0x157   :  { %v359_v45 = vmul.f32 %v2153_v43, %v357_v44 }
 0x159   :  { %v436_v47 = vpop.permute.xlu0 %435  ;;  %361 = vrot.lane.b32.xlu1 %v359_v45, %s2279_s8 }
 0x15a   :  { %v438_v48 = vmul.f32 %v2155_v46, %v436_v47 }
 0x15c   :  { %444 = vrot.lane.b32.xlu0 %v438_v48, %s2281_s10  ;;  %v613_v48 = vrot.slane %v547_v24, 2 }
 0x169   :  { %v440_v51 = vpop.permute.xlu1 %439 }
 0x16a   :  { %v441_v56 = vrot.slane %v440_v51, 2 }
 0x1cb   :  { %v362_v53 = vpop.permute.xlu1 %361 }
 0x1cc   :  { %v364_v55 = vadd.f32 %v362_v53, %v329_v34 }
 0x1ce   :  { %2160 = vtanh.f32 %v364_v55  ;;  %v445_v57 = vpop.permute.xlu0 %444 }
 0x1cf   :  { %v447_v58 = vadd.f32 %v445_v57, %v441_v56 }
 0x1d1   :  { %2162 = vtanh.f32 %v447_v58 }
 0x1d8   :  { %v2161_v60 = vpop.eup %2160 }
 0x1d9   :  { %368 = vrot.lane.b32.xlu0 %v2161_v60, %s2280_s2 }
 0x1db   :  { %v2163_v62 = vpop.eup %2162 }
 0x1dc   :  { %v450_v63 = vmul.f32 %v2163_v62, %v449_v61 }
 0x1de   :  { %v452_v1 = vadd.f32 %v451_v0, %v450_v63 }
 0x1e0   :  { %454 = vst.msk [vmem:[#allocation4 + $0xe] sm:$0x3] %vm385_vm4, %v452_v1  ;;  %v456_v2 = vcombine.low %v452_v1, %v452_v1 }
 0x1e2   :  { %v463_v3 = vrot.slane %v456_v2, %v2372_v27 }
 0x1e4   :  { %464 = vrot.lane.b32.xlu1 %v463_v3, %s2281_s10 }
 0x24b   :  { %v369_v5 = vpop.permute.xlu0 %368 }
 0x24c   :  { %v371_v8 = vmul.f32 %v369_v5, %v366_v6 }
 0x24e   :  { %v2465_v10 = vadd.f32 %v372_v9, %v371_v8 }
 0x256   :  { %v465_v11 = vpop.permute.xlu1 %464 }
 0x257   :  { %v2469_v13 = vsel %vm234_vm1, %v2465_v10, %v465_v11 }
 0x258   :  { %469 = vrot.lane.b32.xlu0 %v2469_v13, %s2280_s2  ;;  %v664_v43 = vrot.slane %v2469_v13, %v2372_v27 }
 0x25a   :  { %v665_v45 = vcombine.high %v664_v43, %v664_v43 }
 0x2ca   :  { %v470_v14 = vpop.permute.xlu0 %469 }
 0x2cb   :  { %2047 = vmatmul.mubr.msk.f32.vlgmr.msra.gmra.mrb[4].mxu0 %vm254_vm5, %v470_v14 }
 0x2cc   :  { %2106 = vmatpush1.bf16.msra.mxu0 %v2336_v12  ;;  %973 = vmatprep.mubr.f32.mxu0 %v2277_v4 }
 0x2cd   :  { %2108 = vmatprep.subr.bf16.mxu0 %v2358_v22 }
 0x2d0   :  { %2110 = vmatpush1.bf16.msra.mxu0 %v2360_v23 }
 0x2d1   :  { %2120 = vmatprep.subr.bf16.mxu0 %v2323_v7 }
 0x39e   :  { %v539_v15 = vpop.f32.mrb[4].mxu0 }
 0x39f   :  { %v555_v16 = vadd.f32 %v539_v15, %v2423_v54  ;;  %v541_v17 = vpop.f32.mrb[5].mxu0  ;;  %v602_v25 = vrot.slane %v539_v15, %v2372_v27  ;;  %v548_v29 = vadd.f32 %v545_v26, %v539_v15 }
 0x3a0   :  { %v632_v18 = vadd.f32 %v2393_v36, %v541_v17  ;;  %v622_v46 = vrot.slane %v541_v17, %v2372_v27 }
 0x3a1   :  { %v563_v19 = vrot.slane %v555_v16, %v2372_v27  ;;  %v603_v28 = vcombine.high %v602_v25, %v602_v25  ;;  %v2048_v31 = vmul.f32 -1.442695, %v548_v29 }
 0x3a2   :  { %v640_v20 = vrot.slane %v632_v18, %v2372_v27  ;;  %v623_v47 = vcombine.high %v622_v46, %v622_v46 }
 0x3a3   :  { %564 = vrot.lane.b32.xlu0 %v563_v19, %s2279_s8  ;;  %v605_v30 = vadd.f32 %v603_v28, %v547_v24  ;;  %2164 = vpow2.f32 %v2048_v31  ;;  %v765_v28 = vld [vmem:[#allocation2 + $0x14] sm:$0xf] }
 0x3a4   :  { %v641_v21 = vcombine.high %v640_v20, %v640_v20  ;;  %v625_v49 = vadd.f32 %v623_v47, %v613_v48 }
 0x3a5   :  { %v2049_v32 = vmul.f32 -1.442695, %v605_v30  ;;  %v763_v30 = vld [vmem:[#allocation2 + $0x8] sm:$0xf] }
 0x3a6   :  { %642 = vrot.lane.b32.xlu1 %v641_v21, %s2279_s8  ;;  %v2050_v50 = vmul.f32 -1.442695, %v625_v49 }
 0x3a7   :  { %2166 = vpow2.f32 %v2049_v32 }
 0x3aa   :  { %646 = vrot.lane.b32.xlu1 %v547_v24, %s2280_s2 }
 0x3ad   :  { %v2165_v33 = vpop.eup %2164 }
 0x3ae   :  { %v552_v35 = vadd.f32 1.0, %v2165_v33 }
 0x3b0   :  { %2168 = vrcp.f32 %v552_v35 }
 0x3b1   :  { %v2167_v34 = vpop.eup %2166 }
 0x3b2   :  { %v609_v37 = vadd.f32 1.0, %v2167_v34 }
 0x3b4   :  { %2170 = vrcp.f32 %v609_v37 }
 0x3b5   :  { %2172 = vpow2.f32 %v2050_v50 }
 0x3ba   :  { %v2169_v38 = vpop.eup %2168 }
 0x3bb   :  { %v574_v9 = vsub.f32 1.0, %v2169_v38  ;;  %v580_v14 = vmul.f32 %v2169_v38, %v2469_v13 }
 0x3be   :  { %v2171_v41 = vpop.eup %2170 }
 0x3bf   :  { %v2173_v51 = vpop.eup %2172 }
 0x3c0   :  { %v629_v53 = vadd.f32 1.0, %v2173_v51  ;;  %v831_v51 = vrot.slane %v765_v28, 2 }
 0x3c2   :  { %2174 = vrcp.f32 %v629_v53 }
 0x3cc   :  { %v2175_v60 = vpop.eup %2174 }
 0x3cd   :  { %v656_v63 = vsub.f32 1.0, %v2175_v60 }
 0x415   :  { %v565_v39 = vpop.permute.xlu0 %564 }
 0x416   :  { %v567_v40 = vmul.f32 %v2169_v38, %v565_v39 }
 0x418   :  { %v643_v42 = vpop.permute.xlu1 %642  ;;  %569 = vrot.lane.b32.xlu1 %v567_v40, %s2279_s8 }
 0x419   :  { %v645_v44 = vmul.f32 %v2171_v41, %v643_v42 }
 0x41b   :  { %651 = vrot.lane.b32.xlu0 %v645_v44, %s2281_s10 }
 0x41c   :  { %v647_v52 = vpop.permute.xlu1 %646 }
 0x41d   :  { %v648_v57 = vrot.slane %v647_v52, 2 }
 0x41f   :  { %666 = vrot.lane.b32.xlu0 %v665_v45, %s2280_s2 }
 0x48a   :  { %v570_v55 = vpop.permute.xlu1 %569 }
 0x48b   :  { %v572_v56 = vadd.f32 %v570_v55, %v545_v26 }
 0x48d   :  { %2176 = vtanh.f32 %v572_v56  ;;  %v652_v58 = vpop.permute.xlu0 %651 }
 0x48e   :  { %v654_v59 = vadd.f32 %v652_v58, %v648_v57 }
 0x490   :  { %2178 = vtanh.f32 %v654_v59 }
 0x491   :  { %v667_v62 = vpop.permute.xlu0 %666 }
 0x492   :  { %v669_v2 = vmul.f32 %v2175_v60, %v667_v62 }
 0x497   :  { %v2177_v61 = vpop.eup %2176 }
 0x498   :  { %576 = vrot.lane.b32.xlu1 %v2177_v61, %s2280_s2 }
 0x49a   :  { %v2179_v0 = vpop.eup %2178 }
 0x49b   :  { %v657_v1 = vmul.f32 %v2179_v0, %v656_v63 }
 0x49d   :  { %v670_v3 = vadd.f32 %v669_v2, %v657_v1 }
 0x49f   :  { %672 = vst.msk [vmem:[#allocation4 + $0xc] sm:$0x3] %vm385_vm4, %v670_v3  ;;  %v674_v5 = vcombine.low %v670_v3, %v670_v3 }
 0x4a1   :  { %v681_v6 = vrot.slane %v674_v5, %v2372_v27 }
 0x4a3   :  { %682 = vrot.lane.b32.xlu0 %v681_v6, %s2281_s10 }
 0x50a   :  { %v577_v8 = vpop.permute.xlu1 %576 }
 0x50b   :  { %v579_v11 = vmul.f32 %v577_v8, %v574_v9 }
 0x50d   :  { %v2498_v15 = vadd.f32 %v580_v14, %v579_v11 }
 0x515   :  { %v683_v16 = vpop.permute.xlu0 %682 }
 0x516   :  { %v2502_v17 = vsel %vm234_vm1, %v2498_v15, %v683_v16 }
 0x517   :  { %687 = vrot.lane.b32.xlu1 %v2502_v17, %s2280_s2  ;;  %v882_v46 = vrot.slane %v2502_v17, %v2372_v27 }
 0x519   :  { %v883_v48 = vcombine.high %v882_v46, %v882_v46 }
 0x589   :  { %v688_v18 = vpop.permute.xlu1 %687 }
 0x58a   :  { %2051 = vmatmul.mubr.msk.f32.vlgmr.msra.gmra.mrb[2].mxu1 %vm254_vm5, %v688_v18 }
 0x58b   :  { %2114 = vmatpush1.bf16.msra.mxu1 %v2336_v12  ;;  %1191 = vmatprep.mubr.f32.mxu1 %v2277_v4 }
 0x58c   :  { %2116 = vmatprep.subr.bf16.mxu1 %v2358_v22 }
 0x58f   :  { %2118 = vmatpush1.bf16.msra.mxu1 %v2360_v23 }
 0x590   :  { %2128 = vmatprep.subr.bf16.mxu1 %v2323_v7 }
 0x65d   :  { %v757_v13 = vpop.f32.mrb[2].mxu1 }
 0x65e   :  { %v773_v19 = vadd.f32 %v757_v13, %v2423_v54  ;;  %v759_v20 = vpop.f32.mrb[3].mxu1  ;;  %v820_v29 = vrot.slane %v757_v13, %v2372_v27  ;;  %v766_v32 = vadd.f32 %v763_v30, %v757_v13 }
 0x65f   :  { %v850_v21 = vadd.f32 %v2393_v36, %v759_v20  ;;  %v840_v49 = vrot.slane %v759_v20, %v2372_v27 }
 0x660   :  { %v781_v24 = vrot.slane %v773_v19, %v2372_v27  ;;  %v821_v31 = vcombine.high %v820_v29, %v820_v29  ;;  %v2052_v34 = vmul.f32 -1.442695, %v766_v32  ;;  %v983_v32 = vld [vmem:[#allocation2 + $0x10] sm:$0xf] }
 0x661   :  { %v858_v25 = vrot.slane %v850_v21, %v2372_v27  ;;  %v841_v50 = vcombine.high %v840_v49, %v840_v49 }
 0x662   :  { %782 = vrot.lane.b32.xlu1 %v781_v24, %s2279_s8  ;;  %v823_v33 = vadd.f32 %v821_v31, %v765_v28  ;;  %2180 = vpow2.f32 %v2052_v34 }
 0x663   :  { %v859_v26 = vcombine.high %v858_v25, %v858_v25  ;;  %v843_v52 = vadd.f32 %v841_v50, %v831_v51 }
 0x664   :  { %v2053_v35 = vmul.f32 -1.442695, %v823_v33  ;;  %v981_v33 = vld [vmem:[#allocation2 + $0xc] sm:$0xf] }
 0x665   :  { %860 = vrot.lane.b32.xlu0 %v859_v26, %s2279_s8  ;;  %v2054_v53 = vmul.f32 -1.442695, %v843_v52 }
 0x666   :  { %2182 = vpow2.f32 %v2053_v35 }
 0x669   :  { %864 = vrot.lane.b32.xlu0 %v765_v28, %s2280_s2 }
 0x66c   :  { %v2181_v37 = vpop.eup %2180 }
 0x66d   :  { %v770_v39 = vadd.f32 1.0, %v2181_v37 }
 0x66f   :  { %2184 = vrcp.f32 %v770_v39 }
 0x670   :  { %v2183_v38 = vpop.eup %2182 }
 0x671   :  { %v827_v40 = vadd.f32 1.0, %v2183_v38 }
 0x673   :  { %2186 = vrcp.f32 %v827_v40 }
 0x674   :  { %2188 = vpow2.f32 %v2054_v53 }
 0x679   :  { %v2185_v41 = vpop.eup %2184 }
 0x67a   :  { %v792_v16 = vsub.f32 1.0, %v2185_v41  ;;  %v798_v13 = vmul.f32 %v2185_v41, %v2502_v17 }
 0x67d   :  { %v2187_v44 = vpop.eup %2186 }
 0x67e   :  { %v2189_v55 = vpop.eup %2188 }
 0x67f   :  { %v847_v57 = vadd.f32 1.0, %v2189_v55  ;;  %v1049_v55 = vrot.slane %v983_v32, 2 }
 0x681   :  { %2190 = vrcp.f32 %v847_v57 }
 0x68b   :  { %v2191_v63 = vpop.eup %2190 }
 0x68c   :  { %v874_v2 = vsub.f32 1.0, %v2191_v63 }
 0x6d4   :  { %v783_v42 = vpop.permute.xlu1 %782 }
 0x6d5   :  { %v785_v43 = vmul.f32 %v2185_v41, %v783_v42 }
 0x6d7   :  { %787 = vrot.lane.b32.xlu0 %v785_v43, %s2279_s8  ;;  %v861_v45 = vpop.permute.xlu0 %860 }
 0x6d8   :  { %v863_v47 = vmul.f32 %v2187_v44, %v861_v45 }
 0x6da   :  { %869 = vrot.lane.b32.xlu1 %v863_v47, %s2281_s10 }
 0x6db   :  { %v865_v56 = vpop.permute.xlu0 %864 }
 0x6dc   :  { %v866_v60 = vrot.slane %v865_v56, 2 }
 0x6de   :  { %884 = vrot.lane.b32.xlu1 %v883_v48, %s2280_s2 }
 0x749   :  { %v788_v58 = vpop.permute.xlu0 %787 }
 0x74a   :  { %v790_v59 = vadd.f32 %v788_v58, %v763_v30 }
 0x74c   :  { %2192 = vtanh.f32 %v790_v59  ;;  %v870_v61 = vpop.permute.xlu1 %869 }
 0x74d   :  { %v872_v62 = vadd.f32 %v870_v61, %v866_v60 }
 0x74f   :  { %2194 = vtanh.f32 %v872_v62 }
 0x750   :  { %v885_v1 = vpop.permute.xlu1 %884 }
 0x751   :  { %v887_v6 = vmul.f32 %v2191_v63, %v885_v1 }
 0x756   :  { %v2193_v0 = vpop.eup %2192 }
 0x757   :  { %794 = vrot.lane.b32.xlu0 %v2193_v0, %s2280_s2 }
 0x759   :  { %v2195_v3 = vpop.eup %2194 }
 0x75a   :  { %v875_v5 = vmul.f32 %v2195_v3, %v874_v2 }
 0x75c   :  { %v888_v8 = vadd.f32 %v887_v6, %v875_v5 }
 0x75e   :  { %890 = vst.msk [vmem:[#allocation4 + $0xa] sm:$0x3] %vm385_vm4, %v888_v8  ;;  %v892_v9 = vcombine.low %v888_v8, %v888_v8 }
 0x760   :  { %v899_v11 = vrot.slane %v892_v9, %v2372_v27 }
 0x762   :  { %900 = vrot.lane.b32.xlu1 %v899_v11, %s2281_s10 }
 0x7c9   :  { %v795_v14 = vpop.permute.xlu0 %794 }
 0x7ca   :  { %v797_v18 = vmul.f32 %v795_v14, %v792_v16 }
 0x7cc   :  { %v2531_v19 = vadd.f32 %v798_v13, %v797_v18 }
 0x7d4   :  { %v901_v20 = vpop.permute.xlu1 %900 }
 0x7d5   :  { %v2535_v21 = vsel %vm234_vm1, %v2531_v19, %v901_v20 }
 0x7d6   :  { %905 = vrot.lane.b32.xlu0 %v2535_v21, %s2280_s2  ;;  %v1100_v49 = vrot.slane %v2535_v21, %v2372_v27 }
 0x7d8   :  { %v1101_v51 = vcombine.high %v1100_v49, %v1100_v49 }
 0x848   :  { %v906_v24 = vpop.permute.xlu0 %905 }
 0x849   :  { %2055 = vmatmul.mubr.msk.f32.vlgmr.msra.gmra.mrb[6].mxu0 %vm254_vm5, %v906_v24 }
 0x84a   :  { %2122 = vmatpush1.bf16.msra.mxu0 %v2336_v12  ;;  %1407 = vmatprep.mubr.f32.mxu0 %v2277_v4 }
 0x84b   :  { %2124 = vmatprep.subr.bf16.mxu0 %v2358_v22 }
 0x84e   :  { %2126 = vmatpush1.bf16.msra.mxu0 %v2360_v23 }
 0x84f   :  { %2136 = vmatprep.subr.bf16.mxu0 %v2323_v7 }
 0x91c   :  { %v975_v17 = vpop.f32.mrb[6].mxu0 }
 0x91d   :  { %v991_v25 = vadd.f32 %v975_v17, %v2423_v54  ;;  %v977_v26 = vpop.f32.mrb[7].mxu0  ;;  %v1038_v7 = vrot.slane %v975_v17, %v2372_v27  ;;  %v984_v35 = vadd.f32 %v981_v33, %v975_v17 }
 0x91e   :  { %v1068_v28 = vadd.f32 %v2393_v36, %v977_v26  ;;  %v1058_v52 = vrot.slane %v977_v26, %v2372_v27 }
 0x91f   :  { %v999_v29 = vrot.slane %v991_v25, %v2372_v27  ;;  %v1039_v34 = vcombine.high %v1038_v7, %v1038_v7  ;;  %v2056_v38 = vmul.f32 -1.442695, %v984_v35  ;;  %v1199_v35 = vld [vmem:[#allocation2 + $0xc] sm:$0xf] }
 0x920   :  { %v1076_v30 = vrot.slane %v1068_v28, %v2372_v27  ;;  %v1059_v53 = vcombine.high %v1058_v52, %v1058_v52 }
 0x921   :  { %1000 = vrot.lane.b32.xlu0 %v999_v29, %s2279_s8  ;;  %v1041_v37 = vadd.f32 %v1039_v34, %v983_v32  ;;  %2196 = vpow2.f32 %v2056_v38  ;;  %v1198_v38 = vld [vmem:[#allocation2 + $0x10] sm:$0xf] }
 0x922   :  { %v1077_v31 = vcombine.high %v1076_v30, %v1076_v30  ;;  %v1061_v56 = vadd.f32 %v1059_v53, %v1049_v55 }
 0x923   :  { %v2057_v39 = vmul.f32 -1.442695, %v1041_v37 }
 0x924   :  { %1078 = vrot.lane.b32.xlu1 %v1077_v31, %s2279_s8  ;;  %v2058_v57 = vmul.f32 -1.442695, %v1061_v56 }
 0x925   :  { %2198 = vpow2.f32 %v2057_v39 }
 0x928   :  { %1082 = vrot.lane.b32.xlu1 %v983_v32, %s2280_s2 }
 0x92b   :  { %v2197_v40 = vpop.eup %2196 }
 0x92c   :  { %v988_v42 = vadd.f32 1.0, %v2197_v40 }
 0x92e   :  { %2200 = vrcp.f32 %v988_v42 }
 0x92f   :  { %v2199_v41 = vpop.eup %2198 }
 0x930   :  { %v1045_v43 = vadd.f32 1.0, %v2199_v41 }
 0x932   :  { %2202 = vrcp.f32 %v1045_v43 }
 0x933   :  { %2204 = vpow2.f32 %v2058_v57 }
 0x938   :  { %v2201_v44 = vpop.eup %2200 }
 0x939   :  { %v1010_v20 = vsub.f32 1.0, %v2201_v44  ;;  %v1016_v17 = vmul.f32 %v2201_v44, %v2535_v21 }
 0x93c   :  { %v2203_v47 = vpop.eup %2202 }
 0x93d   :  { %v2205_v58 = vpop.eup %2204 }
 0x93e   :  { %v1065_v60 = vadd.f32 1.0, %v2205_v58 }
 0x940   :  { %2206 = vrcp.f32 %v1065_v60 }
 0x94a   :  { %v2207_v2 = vpop.eup %2206 }
 0x94b   :  { %v1092_v6 = vsub.f32 1.0, %v2207_v2 }
 0x993   :  { %v1001_v45 = vpop.permute.xlu0 %1000 }
 0x994   :  { %v1003_v46 = vmul.f32 %v2201_v44, %v1001_v45 }
 0x996   :  { %1005 = vrot.lane.b32.xlu1 %v1003_v46, %s2279_s8  ;;  %v1079_v48 = vpop.permute.xlu1 %1078 }
 0x997   :  { %v1081_v50 = vmul.f32 %v2203_v47, %v1079_v48 }
 0x999   :  { %1087 = vrot.lane.b32.xlu0 %v1081_v50, %s2281_s10 }
 0x99a   :  { %v1083_v59 = vpop.permute.xlu1 %1082 }
 0x99b   :  { %v1084_v63 = vrot.slane %v1083_v59, 2  ;;  %v1265_v59 = vrot.slane %v1199_v35, 2 }
 0x99d   :  { %1102 = vrot.lane.b32.xlu0 %v1101_v51, %s2280_s2 }
 0xa08   :  { %v1006_v61 = vpop.permute.xlu1 %1005 }
 0xa09   :  { %v1008_v62 = vadd.f32 %v1006_v61, %v981_v33 }
 0xa0b   :  { %2208 = vtanh.f32 %v1008_v62  ;;  %v1088_v0 = vpop.permute.xlu0 %1087 }
 0xa0c   :  { %v1090_v1 = vadd.f32 %v1088_v0, %v1084_v63 }
 0xa0e   :  { %2210 = vtanh.f32 %v1090_v1 }
 0xa0f   :  { %v1103_v5 = vpop.permute.xlu0 %1102 }
 0xa10   :  { %v1105_v11 = vmul.f32 %v2207_v2, %v1103_v5 }
 0xa15   :  { %v2209_v3 = vpop.eup %2208 }
 0xa16   :  { %1012 = vrot.lane.b32.xlu1 %v2209_v3, %s2280_s2 }
 0xa18   :  { %v2211_v8 = vpop.eup %2210 }
 0xa19   :  { %v1093_v9 = vmul.f32 %v2211_v8, %v1092_v6 }
 0xa1b   :  { %v1106_v14 = vadd.f32 %v1105_v11, %v1093_v9 }
 0xa1d   :  { %1108 = vst.msk [vmem:[#allocation4 + $0x8] sm:$0x3] %vm385_vm4, %v1106_v14  ;;  %v1110_v16 = vcombine.low %v1106_v14, %v1106_v14 }
 0xa1f   :  { %v1117_v18 = vrot.slane %v1110_v16, %v2372_v27 }
 0xa21   :  { %1118 = vrot.lane.b32.xlu0 %v1117_v18, %s2281_s10 }
 0xa88   :  { %v1013_v13 = vpop.permute.xlu1 %1012 }
 0xa89   :  { %v1015_v24 = vmul.f32 %v1013_v13, %v1010_v20 }
 0xa8b   :  { %v2564_v25 = vadd.f32 %v1016_v17, %v1015_v24 }
 0xa93   :  { %v1119_v26 = vpop.permute.xlu0 %1118 }
 0xa94   :  { %v2568_v28 = vsel %vm234_vm1, %v2564_v25, %v1119_v26 }
 0xa95   :  { %1123 = vrot.lane.b32.xlu1 %v2568_v28, %s2280_s2  ;;  %v1316_v53 = vrot.slane %v2568_v28, %v2372_v27 }
 0xa97   :  { %v1317_v56 = vcombine.high %v1316_v53, %v1316_v53 }
 0xb07   :  { %v1124_v29 = vpop.permute.xlu1 %1123 }
 0xb08   :  { %2059 = vmatmul.mubr.msk.f32.vlgmr.msra.gmra.mrb[4].mxu1 %vm254_vm5, %v1124_v29 }
 0xb09   :  { %2130 = vmatpush1.bf16.msra.mxu1 %v2336_v12  ;;  %1623 = vmatprep.mubr.f32.mxu1 %v2277_v4 }
 0xb0a   :  { %2132 = vmatprep.subr.bf16.mxu1 %v2358_v22 }
 0xb0d   :  { %2134 = vmatpush1.bf16.msra.mxu1 %v2360_v23 }
 0xbdb   :  { %v1193_v21 = vpop.f32.mrb[4].mxu1 }
 0xbdc   :  { %v1207_v30 = vadd.f32 %v1193_v21, %v2423_v54  ;;  %v1195_v31 = vpop.f32.mrb[5].mxu1  ;;  %v1254_v37 = vrot.slane %v1193_v21, %v2372_v27  ;;  %v1200_v40 = vadd.f32 %v1198_v38, %v1193_v21 }
 0xbdd   :  { %v1284_v32 = vadd.f32 %v2393_v36, %v1195_v31  ;;  %v1274_v57 = vrot.slane %v1195_v31, %v2372_v27 }
 0xbde   :  { %v1215_v7 = vrot.slane %v1207_v30, %v2372_v27  ;;  %v1255_v39 = vcombine.high %v1254_v37, %v1254_v37  ;;  %v2060_v42 = vmul.f32 -1.442695, %v1200_v40 }
 0xbdf   :  { %v1292_v33 = vrot.slane %v1284_v32, %v2372_v27  ;;  %v1275_v58 = vcombine.high %v1274_v57, %v1274_v57 }
 0xbe0   :  { %1216 = vrot.lane.b32.xlu1 %v1215_v7, %s2279_s8  ;;  %v1257_v41 = vadd.f32 %v1255_v39, %v1199_v35  ;;  %2212 = vpow2.f32 %v2060_v42 }
 0xbe1   :  { %v1293_v34 = vcombine.high %v1292_v33, %v1292_v33  ;;  %v1277_v60 = vadd.f32 %v1275_v58, %v1265_v59 }
 0xbe2   :  { %v2061_v43 = vmul.f32 -1.442695, %v1257_v41 }
 0xbe3   :  { %1294 = vrot.lane.b32.xlu0 %v1293_v34, %s2279_s8  ;;  %v2062_v61 = vmul.f32 -1.442695, %v1277_v60 }
 0xbe4   :  { %2214 = vpow2.f32 %v2061_v43 }
 0xbe7   :  { %1298 = vrot.lane.b32.xlu0 %v1199_v35, %s2280_s2 }
 0xbea   :  { %v2213_v44 = vpop.eup %2212 }
 0xbeb   :  { %v1204_v46 = vadd.f32 1.0, %v2213_v44 }
 0xbed   :  { %2216 = vrcp.f32 %v1204_v46 }
 0xbee   :  { %v2215_v45 = vpop.eup %2214 }
 0xbef   :  { %v1261_v47 = vadd.f32 1.0, %v2215_v45 }
 0xbf1   :  { %2218 = vrcp.f32 %v1261_v47 }
 0xbf2   :  { %2220 = vpow2.f32 %v2062_v61 }
 0xbf7   :  { %v2217_v48 = vpop.eup %2216 }
 0xbf8   :  { %v1226_v29 = vsub.f32 1.0, %v2217_v48  ;;  %v1232_v30 = vmul.f32 %v2217_v48, %v2568_v28 }
 0xbfb   :  { %v2219_v51 = vpop.eup %2218 }
 0xbfc   :  { %v2221_v62 = vpop.eup %2220 }
 0xbfd   :  { %v1281_v0 = vadd.f32 1.0, %v2221_v62 }
 0xbff   :  { %2222 = vrcp.f32 %v1281_v0 }
 0xc09   :  { %v2223_v8 = vpop.eup %2222 }
 0xc0a   :  { %v1308_v14 = vsub.f32 1.0, %v2223_v8 }
 0xc52   :  { %v1217_v49 = vpop.permute.xlu1 %1216 }
 0xc53   :  { %v1219_v50 = vmul.f32 %v2217_v48, %v1217_v49 }
 0xc55   :  { %1221 = vrot.lane.b32.xlu0 %v1219_v50, %s2279_s8  ;;  %v1295_v52 = vpop.permute.xlu0 %1294 }
 0xc56   :  { %v1297_v55 = vmul.f32 %v2219_v51, %v1295_v52 }
 0xc58   :  { %1303 = vrot.lane.b32.xlu1 %v1297_v55, %s2281_s10 }
 0xc59   :  { %v1299_v63 = vpop.permute.xlu0 %1298 }
 0xc5a   :  { %v1300_v3 = vrot.slane %v1299_v63, 2 }
 0xc5c   :  { %1318 = vrot.lane.b32.xlu1 %v1317_v56, %s2280_s2 }
 0xcc7   :  { %v1222_v1 = vpop.permute.xlu0 %1221 }
 0xcc8   :  { %v1224_v2 = vadd.f32 %v1222_v1, %v1198_v38 }
 0xcca   :  { %2224 = vtanh.f32 %v1224_v2  ;;  %v1304_v5 = vpop.permute.xlu1 %1303 }
 0xccb   :  { %v1306_v6 = vadd.f32 %v1304_v5, %v1300_v3 }
 0xccd   :  { %2226 = vtanh.f32 %v1306_v6 }
 0xcce   :  { %v1319_v11 = vpop.permute.xlu1 %1318 }
 0xccf   :  { %v1321_v13 = vmul.f32 %v2223_v8, %v1319_v11 }
 0xcd4   :  { %v2225_v9 = vpop.eup %2224 }
 0xcd5   :  { %1228 = vrot.lane.b32.xlu0 %v2225_v9, %s2280_s2 }
 0xcd7   :  { %v2227_v16 = vpop.eup %2226 }
 0xcd8   :  { %v1309_v18 = vmul.f32 %v2227_v16, %v1308_v14 }
 0xcda   :  { %v1322_v20 = vadd.f32 %v1321_v13, %v1309_v18 }
 0xcdc   :  { %1324 = vst.msk [vmem:[#allocation4 + $0x6] sm:$0x3] %vm385_vm4, %v1322_v20  ;;  %v1326_v24 = vcombine.low %v1322_v20, %v1322_v20 }
 0xcde   :  { %v1333_v17 = vrot.slane %v1326_v24, %v2372_v27 }
 0xce0   :  { %1334 = vrot.lane.b32.xlu1 %v1333_v17, %s2281_s10 }
 0xd47   :  { %v1229_v26 = vpop.permute.xlu0 %1228 }
 0xd48   :  { %v1231_v21 = vmul.f32 %v1229_v26, %v1226_v29 }
 0xd4a   :  { %v2596_v31 = vadd.f32 %v1232_v30, %v1231_v21 }
 0xd52   :  { %v1335_v32 = vpop.permute.xlu1 %1334 }
 0xd53   :  { %v2600_v7 = vsel %vm234_vm1, %v2596_v31, %v1335_v32 }
 0xd54   :  { %1339 = vrot.lane.b32.xlu0 %v2600_v7, %s2280_s2  ;;  %v1532_v53 = vrot.slane %v2600_v7, %v2372_v27 }
 0xd56   :  { %v1533_v56 = vcombine.high %v1532_v53, %v1532_v53 }
 0xdc6   :  { %v1340_v33 = vpop.permute.xlu0 %1339 }
 0xdc7   :  { %2063 = vmatmul.mubr.msk.f32.vlgmr.msra.gmra.mrb[8].mxu0 %vm254_vm5, %v1340_v33 }
 0xdc8   :  { %2138 = vmatpush1.bf16.msra.mxu0 %v2336_v12  ;;  %1839 = vmatprep.mubr.f32.mxu0 %v2277_v4  ;;  %v1415_v4 = vld [vmem:[#allocation2 + $0x8] sm:$0xf] }
 0xdc9   :  { %2140 = vmatprep.subr.bf16.mxu0 %v2358_v22  ;;  %v1414_v22 = vld [vmem:[#allocation2 + $0x14] sm:$0xf]  ;;  %v1481_v59 = vrot.slane %v1415_v4, 2 }
 0xdcc   :  { %2142 = vmatpush1.bf16.msra.mxu0 %v2360_v23 }
 0xe9a   :  { %v1409_v28 = vpop.f32.mrb[8].mxu0 }
 0xe9b   :  { %v1423_v34 = vadd.f32 %v1409_v28, %v2423_v54  ;;  %v1411_v35 = vpop.f32.mrb[9].mxu0  ;;  %v1470_v12 = vrot.slane %v1409_v28, %v2372_v27  ;;  %v1416_v41 = vadd.f32 %v1414_v22, %v1409_v28 }
 0xe9c   :  { %v1500_v37 = vadd.f32 %v2393_v36, %v1411_v35  ;;  %v1490_v57 = vrot.slane %v1411_v35, %v2372_v27 }
 0xe9d   :  { %v1431_v38 = vrot.slane %v1423_v34, %v2372_v27  ;;  %v1471_v23 = vcombine.high %v1470_v12, %v1470_v12  ;;  %v2064_v43 = vmul.f32 -1.442695, %v1416_v41  ;;  %v1630_v41 = vld [vmem:[#allocation2 + $0x18] sm:$0xf] }
 0xe9e   :  { %v1508_v39 = vrot.slane %v1500_v37, %v2372_v27  ;;  %v1491_v58 = vcombine.high %v1490_v57, %v1490_v57 }
 0xe9f   :  { %1432 = vrot.lane.b32.xlu0 %v1431_v38, %s2279_s8  ;;  %v1473_v42 = vadd.f32 %v1471_v23, %v1415_v4  ;;  %2228 = vpow2.f32 %v2064_v43 }
 0xea0   :  { %v1509_v40 = vcombine.high %v1508_v39, %v1508_v39  ;;  %v1493_v60 = vadd.f32 %v1491_v58, %v1481_v59 }
 0xea1   :  { %v2065_v36 = vmul.f32 -1.442695, %v1473_v42 }
 0xea2   :  { %1510 = vrot.lane.b32.xlu1 %v1509_v40, %s2279_s8  ;;  %v2066_v61 = vmul.f32 -1.442695, %v1493_v60 }
 0xea3   :  { %2230 = vpow2.f32 %v2065_v36 }
 0xea6   :  { %1514 = vrot.lane.b32.xlu1 %v1415_v4, %s2280_s2 }
 0xea9   :  { %v2229_v44 = vpop.eup %2228 }
 0xeaa   :  { %v1420_v46 = vadd.f32 1.0, %v2229_v44 }
 0xeac   :  { %2232 = vrcp.f32 %v1420_v46 }
 0xead   :  { %v2231_v45 = vpop.eup %2230 }
 0xeae   :  { %v1477_v47 = vadd.f32 1.0, %v2231_v45 }
 0xeb0   :  { %2234 = vrcp.f32 %v1477_v47 }
 0xeb1   :  { %2236 = vpow2.f32 %v2066_v61 }
 0xeb6   :  { %v2233_v48 = vpop.eup %2232 }
 0xeb7   :  { %v1442_v29 = vsub.f32 1.0, %v2233_v48  ;;  %v1448_v30 = vmul.f32 %v2233_v48, %v2600_v7  ;;  %v2641_v7 = vld [vmem:[%s2774_s4] ss:$0 sm:$0xff] }
 0xeba   :  { %v2235_v51 = vpop.eup %2234 }
 0xebb   :  { %v2237_v62 = vpop.eup %2236 }
 0xebc   :  { %v1497_v0 = vadd.f32 1.0, %v2237_v62 }
 0xebe   :  { %2238 = vrcp.f32 %v1497_v0 }
 0xec8   :  { %v2239_v8 = vpop.eup %2238 }
 0xec9   :  { %v1524_v14 = vsub.f32 1.0, %v2239_v8 }
 0xf11   :  { %v1433_v49 = vpop.permute.xlu0 %1432 }
 0xf12   :  { %v1435_v50 = vmul.f32 %v2233_v48, %v1433_v49 }
 0xf14   :  { %1437 = vrot.lane.b32.xlu1 %v1435_v50, %s2279_s8  ;;  %v1511_v52 = vpop.permute.xlu1 %1510 }
 0xf15   :  { %v1513_v55 = vmul.f32 %v2235_v51, %v1511_v52 }
 0xf17   :  { %1519 = vrot.lane.b32.xlu0 %v1513_v55, %s2281_s10 }
 0xf18   :  { %v1515_v63 = vpop.permute.xlu1 %1514 }
 0xf19   :  { %v1516_v3 = vrot.slane %v1515_v63, 2 }
 0xf1b   :  { %1534 = vrot.lane.b32.xlu0 %v1533_v56, %s2280_s2 }
 0xf86   :  { %v1438_v1 = vpop.permute.xlu1 %1437 }
 0xf87   :  { %v1440_v2 = vadd.f32 %v1438_v1, %v1414_v22  ;;  %v1631_v22 = vld [vmem:[#allocation2 + $0x4] sm:$0xf] }
 0xf88   :  { %v1697_v61 = vrot.slane %v1631_v22, 2 }
 0xf89   :  { %2240 = vtanh.f32 %v1440_v2  ;;  %v1520_v5 = vpop.permute.xlu0 %1519 }
 0xf8a   :  { %v1522_v6 = vadd.f32 %v1520_v5, %v1516_v3 }
 0xf8c   :  { %2242 = vtanh.f32 %v1522_v6 }
 0xf8d   :  { %v1535_v11 = vpop.permute.xlu0 %1534 }
 0xf8e   :  { %v1537_v13 = vmul.f32 %v2239_v8, %v1535_v11 }
 0xf93   :  { %v2241_v9 = vpop.eup %2240 }
 0xf94   :  { %1444 = vrot.lane.b32.xlu1 %v2241_v9, %s2280_s2 }
 0xf96   :  { %v2243_v16 = vpop.eup %2242 }
 0xf97   :  { %v1525_v18 = vmul.f32 %v2243_v16, %v1524_v14 }
 0xf99   :  { %v1538_v20 = vadd.f32 %v1537_v13, %v1525_v18 }
 0xf9b   :  { %1540 = vst.msk [vmem:[#allocation4 + $0x4] sm:$0x3] %vm385_vm4, %v1538_v20  ;;  %v1542_v24 = vcombine.low %v1538_v20, %v1538_v20 }
 0xf9d   :  { %v1549_v17 = vrot.slane %v1542_v24, %v2372_v27 }
 0xf9f   :  { %1550 = vrot.lane.b32.xlu0 %v1549_v17, %s2281_s10 }
0x1006   :  { %v1445_v26 = vpop.permute.xlu1 %1444 }
0x1007   :  { %v1447_v21 = vmul.f32 %v1445_v26, %v1442_v29 }
0x1009   :  { %v2628_v32 = vadd.f32 %v1448_v30, %v1447_v21 }
0x1011   :  { %v1551_v33 = vpop.permute.xlu0 %1550 }
0x1012   :  { %v2632_v28 = vsel %vm234_vm1, %v2628_v32, %v1551_v33 }
0x1013   :  { %1555 = vrot.lane.b32.xlu1 %v2632_v28, %s2280_s2  ;;  %v1748_v56 = vrot.slane %v2632_v28, %v2372_v27 }
0x1015   :  { %v1749_v58 = vcombine.high %v1748_v56, %v1748_v56 }
0x1085   :  { %v1556_v34 = vpop.permute.xlu1 %1555 }
0x1086   :  { %2067 = vmatmul.mubr.msk.f32.vlgmr.msra.gmra.mrb[6].mxu1 %vm254_vm5, %v1556_v34 }
0x1159   :  { %v1625_v35 = vpop.f32.mrb[6].mxu1 }
0x115a   :  { %v1639_v37 = vadd.f32 %v1625_v35, %v2423_v54  ;;  %v1627_v38 = vpop.f32.mrb[7].mxu1  ;;  %v1686_v23 = vrot.slane %v1625_v35, %v2372_v27  ;;  %v1632_v43 = vadd.f32 %v1630_v41, %v1625_v35 }
0x115b   :  { %v1716_v39 = vadd.f32 %v2641_v7, %v1627_v38  ;;  %v1706_v59 = vrot.slane %v1627_v38, %v2372_v27 }
0x115c   :  { %v1647_v40 = vrot.slane %v1639_v37, %v2372_v27  ;;  %v1687_v42 = vcombine.high %v1686_v23, %v1686_v23  ;;  %v2068_v44 = vmul.f32 -1.442695, %v1632_v43  ;;  %v1846_v43 = vld [vmem:[#allocation2 + $0x1c] sm:$0xf] }
0x115d   :  { %v1724_v4 = vrot.slane %v1716_v39, %v2372_v27  ;;  %v1707_v60 = vcombine.high %v1706_v59, %v1706_v59 }
0x115e   :  { %1648 = vrot.lane.b32.xlu1 %v1647_v40, %s2279_s8  ;;  %v1689_v36 = vadd.f32 %v1687_v42, %v1631_v22  ;;  %2244 = vpow2.f32 %v2068_v44 }
0x115f   :  { %v1725_v12 = vcombine.high %v1724_v4, %v1724_v4  ;;  %v1709_v62 = vadd.f32 %v1707_v60, %v1697_v61  ;;  %v589_v60 = vrot.slane %v2498_v15, %v2372_v27  ;;  %v1025_v61 = vrot.slane %v2564_v25, %v2372_v27 }
0x1160   :  { %v2069_v45 = vmul.f32 -1.442695, %v1689_v36 }
0x1161   :  { %1726 = vrot.lane.b32.xlu0 %v1725_v12, %s2279_s8  ;;  %v2070_v63 = vmul.f32 -1.442695, %v1709_v62  ;;  %v1457_v62 = vrot.slane %v2628_v32, %v2372_v27 }
0x1162   :  { %2246 = vpow2.f32 %v2069_v45  ;;  %v1847_v45 = vld [vmem:[#allocation2] sm:$0xf] }
0x1165   :  { %1730 = vrot.lane.b32.xlu0 %v1631_v22, %s2280_s2 }
0x1168   :  { %v2245_v46 = vpop.eup %2244 }
0x1169   :  { %v1636_v48 = vadd.f32 1.0, %v2245_v46 }
0x116b   :  { %2248 = vrcp.f32 %v1636_v48 }
0x116c   :  { %v2247_v47 = vpop.eup %2246 }
0x116d   :  { %v1693_v49 = vadd.f32 1.0, %v2247_v47 }
0x116f   :  { %2250 = vrcp.f32 %v1693_v49 }
0x1170   :  { %2252 = vpow2.f32 %v2070_v63 }
0x1175   :  { %v2249_v50 = vpop.eup %2248 }
0x1176   :  { %v1658_v30 = vsub.f32 1.0, %v2249_v50  ;;  %v1664_v34 = vmul.f32 %v2249_v50, %v2632_v28 }
0x1179   :  { %v2251_v53 = vpop.eup %2250 }
0x117a   :  { %v2253_v0 = vpop.eup %2252 }
0x117b   :  { %v1713_v2 = vadd.f32 1.0, %v2253_v0  ;;  %v1983_v0 = vld [vmem:[#allocation4 + $0x6] sm:$0x3] }
0x117d   :  { %2254 = vrcp.f32 %v1713_v2  ;;  %v1913_v2 = vrot.slane %v1847_v45, 2 }
0x1187   :  { %v2255_v11 = vpop.eup %2254 }
0x1188   :  { %v1740_v18 = vsub.f32 1.0, %v2255_v11 }
0x11d0   :  { %v1649_v51 = vpop.permute.xlu1 %1648 }
0x11d1   :  { %v1651_v52 = vmul.f32 %v2249_v50, %v1649_v51 }
0x11d3   :  { %1653 = vrot.lane.b32.xlu0 %v1651_v52, %s2279_s8  ;;  %v1727_v55 = vpop.permute.xlu0 %1726 }
0x11d4   :  { %v1729_v57 = vmul.f32 %v2251_v53, %v1727_v55 }
0x11d6   :  { %1735 = vrot.lane.b32.xlu1 %v1729_v57, %s2281_s10 }
0x11d7   :  { %v1731_v1 = vpop.permute.xlu0 %1730 }
0x11d8   :  { %v1732_v6 = vrot.slane %v1731_v1, 2 }
0x11da   :  { %1750 = vrot.lane.b32.xlu1 %v1749_v58, %s2280_s2 }
0x1245   :  { %v1654_v3 = vpop.permute.xlu0 %1653 }
0x1246   :  { %v1656_v5 = vadd.f32 %v1654_v3, %v1630_v41 }
0x1248   :  { %2256 = vtanh.f32 %v1656_v5  ;;  %v1736_v8 = vpop.permute.xlu1 %1735 }
0x1249   :  { %v1738_v9 = vadd.f32 %v1736_v8, %v1732_v6 }
0x124b   :  { %2258 = vtanh.f32 %v1738_v9 }
0x124c   :  { %v1751_v16 = vpop.permute.xlu1 %1750 }
0x124d   :  { %v1753_v24 = vmul.f32 %v2255_v11, %v1751_v16 }
0x1252   :  { %v2257_v14 = vpop.eup %2256 }
0x1253   :  { %1660 = vrot.lane.b32.xlu0 %v2257_v14, %s2280_s2 }
0x1255   :  { %v2259_v13 = vpop.eup %2258 }
0x1256   :  { %v1741_v20 = vmul.f32 %v2259_v13, %v1740_v18 }
0x1258   :  { %v1754_v17 = vadd.f32 %v1753_v24, %v1741_v20 }
0x125a   :  { %1756 = vst.msk [vmem:[#allocation4 + $0x2] sm:$0x3] %vm385_vm4, %v1754_v17  ;;  %v1758_v26 = vcombine.low %v1754_v17, %v1754_v17 }
0x125c   :  { %v1765_v29 = vrot.slane %v1758_v26, %v2372_v27  ;;  %v381_v26 = vrot.slane %v2465_v10, %v2372_v27 }
0x125e   :  { %1766 = vrot.lane.b32.xlu1 %v1765_v29, %s2281_s10 }
0x1261   :  { %v1981_v63 = vld [vmem:[#allocation4 + $0x2] sm:$0x3] }
0x12c5   :  { %v1661_v21 = vpop.permute.xlu0 %1660 }
0x12c6   :  { %v1663_v33 = vmul.f32 %v1661_v21, %v1658_v30 }
0x12c8   :  { %v2661_v35 = vadd.f32 %v1664_v34, %v1663_v33 }
0x12d0   :  { %v1767_v37 = vpop.permute.xlu1 %1766 }
0x12d1   :  { %v2665_v38 = vsel %vm234_vm1, %v2661_v35, %v1767_v37  ;;  %v807_v37 = vrot.slane %v2531_v19, %v2372_v27 }
0x12d2   :  { %1771 = vrot.lane.b32.xlu0 %v2665_v38, %s2280_s2  ;;  %v1964_v57 = vrot.slane %v2665_v38, %v2372_v27 }
0x12d4   :  { %v1965_v59 = vcombine.high %v1964_v57, %v1964_v57 }
0x1344   :  { %v1772_v39 = vpop.permute.xlu0 %1771 }
0x1345   :  { %2071 = vmatmul.mubr.msk.f32.vlgmr.msra.gmra.mrb[10].mxu0 %vm254_vm5, %v1772_v39 }
0x1418   :  { %v1841_v40 = vpop.f32.mrb[10].mxu0 }
0x1419   :  { %v1855_v4 = vadd.f32 %v1841_v40, %v2423_v54  ;;  %v1843_v12 = vpop.f32.mrb[11].mxu0  ;;  %v1902_v42 = vrot.slane %v1841_v40, %v2372_v27  ;;  %v1848_v36 = vadd.f32 %v1846_v43, %v1841_v40 }
0x141a   :  { %v1932_v22 = vadd.f32 %v2641_v7, %v1843_v12  ;;  %v1922_v15 = vrot.slane %v1843_v12, %v2372_v27 }
0x141b   :  { %v1863_v28 = vrot.slane %v1855_v4, %v2372_v27  ;;  %v1903_v44 = vcombine.high %v1902_v42, %v1902_v42  ;;  %v2072_v46 = vmul.f32 -1.442695, %v1848_v36  ;;  %v1241_v4 = vrot.slane %v2596_v31, %v2372_v27  ;;  %v1982_v31 = vld [vmem:[#allocation4 + $0x4] sm:$0x3] }
0x141c   :  { %v1940_v23 = vrot.slane %v1932_v22, %v2372_v27  ;;  %v1923_v1 = vcombine.high %v1922_v15, %v1922_v15 }
0x141d   :  { %1864 = vrot.lane.b32.xlu1 %v1863_v28, %s2279_s8  ;;  %v1905_v54 = vadd.f32 %v1903_v44, %v1847_v45  ;;  %2260 = vpow2.f32 %v2072_v46  ;;  %v1673_v28 = vrot.slane %v2661_v35, %v2372_v27 }
0x141e   :  { %v1941_v41 = vcombine.high %v1940_v23, %v1940_v23  ;;  %v1925_v3 = vadd.f32 %v1923_v1, %v1913_v2 }
0x141f   :  { %v2073_v47 = vmul.f32 -1.442695, %v1905_v54 }
0x1420   :  { %v2074_v5 = vmul.f32 -1.442695, %v1925_v3 }
0x1421   :  { %1942 = vrot.lane.b32.xlu1 %v1941_v41, %s2279_s8  ;;  %2262 = vpow2.f32 %v2073_v47  ;;  %v1984_v41 = vld [vmem:[#allocation4 + $0x8] sm:$0x3] }
0x1427   :  { %v2261_v7 = vpop.eup %2260 }
0x1428   :  { %v1852_v48 = vadd.f32 1.0, %v2261_v7 }
0x142a   :  { %2264 = vrcp.f32 %v1852_v48  ;;  %v1985_v48 = vld [vmem:[#allocation4 + $0xa] sm:$0x3] }
0x142b   :  { %v2263_v49 = vpop.eup %2262 }
0x142c   :  { %v1909_v50 = vadd.f32 1.0, %v2263_v49 }
0x142e   :  { %2266 = vrcp.f32 %v1909_v50  ;;  %v1987_v50 = vld [vmem:[#allocation4 + $0xe] sm:$0x3] }
0x142f   :  { %2268 = vpow2.f32 %v2074_v5 }
0x1434   :  { %v2677_v51 = vpop.eup %2264 }
0x1435   :  { %v1874_v35 = vsub.f32 1.0, %v2677_v51  ;;  %v1880_v44 = vmul.f32 %v2677_v51, %v2665_v38 }
0x1438   :  { %v2267_v55 = vpop.eup %2266 }
0x1439   :  { %v2269_v25 = vpop.eup %2268 }
0x143a   :  { %v1929_v9 = vadd.f32 1.0, %v2269_v25 }
0x148f   :  { %v1865_v52 = vpop.permute.xlu1 %1864 }
0x1490   :  { %v1867_v53 = vmul.f32 %v2677_v51, %v1865_v52 }
0x1492   :  { %1869 = vrot.lane.b32.xlu0 %v1867_v53, %s2279_s8 }
0x1493   :  { %v1943_v56 = vpop.permute.xlu1 %1942 }
0x1494   :  { %v1945_v58 = vmul.f32 %v2267_v55, %v1943_v56 }
0x1496   :  { %1946 = vrot.lane.b32.xlu0 %v1847_v45, %s2280_s2  ;;  %1951 = vrot.lane.b32.xlu1 %v1945_v58, %s2281_s10 }
0x149a   :  { %1966 = vrot.lane.b32.xlu1 %v1965_v59, %s2280_s2 }
0x149e   :  { %590 = vrot.lane.b32.xlu1 %v589_v60, %s2280_s2 }
0x14a2   :  { %1026 = vrot.lane.b32.xlu1 %v1025_v61, %s2280_s2 }
0x14a6   :  { %1458 = vrot.lane.b32.xlu1 %v1457_v62, %s2280_s2 }
0x14aa   :  { %1998 = vrot.lane.b32.xlu1 %v1981_v63, %s2281_s10 }
0x14ae   :  { %2002 = vrot.lane.b32.xlu1 %v1983_v0, %s2281_s10 }
0x1504   :  { %v1870_v6 = vpop.permute.xlu0 %1869 }
0x1505   :  { %v1872_v8 = vadd.f32 %v1870_v6, %v1846_v43  ;;  %v1986_v43 = vld [vmem:[#allocation4 + $0xc] sm:$0x3] }
0x1507   :  { %2270 = vtanh.f32 %v1872_v8 }
0x1508   :  { %v1947_v32 = vpop.permute.xlu0 %1946  ;;  %v1952_v11 = vpop.permute.xlu1 %1951  ;;  %2272 = vrcp.f32 %v1929_v9 }
0x1509   :  { %v1948_v14 = vrot.slane %v1947_v32, 2 }
0x150b   :  { %v1954_v16 = vadd.f32 %v1952_v11, %v1948_v14 }
0x150c   :  { %v1967_v18 = vpop.permute.xlu1 %1966 }
0x150d   :  { %2274 = vtanh.f32 %v1954_v16 }
0x1510   :  { %v591_v13 = vpop.permute.xlu1 %590 }
0x1511   :  { %v2271_v20 = vpop.eup %2270  ;;  %594 = vst.msk [vmem:[#allocation3 + $0x2] sm:$0x3] %vm385_vm4, %v591_v13 }
0x1512   :  { %1876 = vrot.lane.b32.xlu0 %v2271_v20, %s2280_s2  ;;  %v2273_v24 = vpop.eup %2272 }
0x1513   :  { %v1956_v29 = vsub.f32 1.0, %v2273_v24  ;;  %v1969_v33 = vmul.f32 %v2273_v24, %v1967_v18 }
0x1514   :  { %v1027_v17 = vpop.permute.xlu1 %1026 }
0x1515   :  { %1030 = vst.msk [vmem:[#allocation3 + $0x6] sm:$0x3] %vm385_vm4, %v1027_v17 }
0x1516   :  { %382 = vrot.lane.b32.xlu0 %v381_v26, %s2280_s2 }
0x1517   :  { %v2275_v21 = vpop.eup %2274 }
0x1518   :  { %v1957_v30 = vmul.f32 %v2275_v21, %v1956_v29  ;;  %v1459_v34 = vpop.permute.xlu1 %1458  ;;  %v1973_v10 = vld [vmem:[#allocation3 + $0x2] sm:$0x3] }
0x1519   :  { %1462 = vst.msk [vmem:[#allocation3 + $0xa] sm:$0x3] %vm385_vm4, %v1459_v34 }
0x151a   :  { %v1970_v39 = vadd.f32 %v1969_v33, %v1957_v30  ;;  %808 = vrot.lane.b32.xlu0 %v807_v37, %s2280_s2 }
0x151c   :  { %1971 = vst.msk [vmem:[#allocation4] sm:$0x3] %vm385_vm4, %v1970_v39  ;;  %v1999_v40 = vpop.permute.xlu1 %1998  ;;  %v1975_v19 = vld [vmem:[#allocation3 + $0x6] sm:$0x3] }
0x151d   :  { %v2021_v12 = vsel %vm254_vm5, %v1973_v10, %v1999_v40 }
0x151e   :  { %2030 = vst.msk [vmem:[%s2776_s5 + $0x2] sm:$0x3] %vm2028_vm6, %v2021_v12  ;;  %1242 = vrot.lane.b32.xlu0 %v1241_v4, %s2280_s2 }
0x1520   :  { %v2003_v22 = vpop.permute.xlu1 %2002  ;;  %v1977_v0 = vld [vmem:[#allocation3 + $0xa] sm:$0x3] }
0x1521   :  { %v2023_v23 = vsel %vm254_vm5, %v1975_v19, %v2003_v22 }
0x1522   :  { %2032 = vst.msk [vmem:[%s2776_s5 + $0x6] sm:$0x3] %vm2028_vm6, %v2023_v23  ;;  %1674 = vrot.lane.b32.xlu0 %v1673_v28, %s2280_s2 }
0x1523   :  { %v1980_v42 = vld [vmem:[#allocation4] sm:$0x3] }
0x1526   :  { %2000 = vrot.lane.b32.xlu0 %v1982_v31, %s2281_s10 }
0x152a   :  { %2004 = vrot.lane.b32.xlu0 %v1984_v41, %s2281_s10 }
0x152e   :  { %1996 = vrot.lane.b32.xlu0 %v1980_v42, %s2281_s10 }
0x1532   :  { %2008 = vrot.lane.b32.xlu0 %v1986_v43, %s2281_s10 }
0x1584   :  { %v1877_v36 = vpop.permute.xlu0 %1876 }
0x1585   :  { %v1879_v45 = vmul.f32 %v1877_v36, %v1874_v35 }
0x1587   :  { %v1881_v46 = vadd.f32 %v1880_v44, %v1879_v45 }
0x1588   :  { %v383_v54 = vpop.permute.xlu0 %382 }
0x1589   :  { %386 = vst.msk [vmem:[#allocation3] sm:$0x3] %vm385_vm4, %v383_v54  ;;  %v1889_v47 = vrot.slane %v1881_v46, %v2372_v27 }
0x158b   :  { %1890 = vrot.lane.b32.xlu1 %v1889_v47, %s2280_s2 }
0x158c   :  { %v809_v7 = vpop.permute.xlu0 %808 }
0x158d   :  { %812 = vst.msk [vmem:[#allocation3 + $0x4] sm:$0x3] %vm385_vm4, %v809_v7 }
0x158f   :  { %2006 = vrot.lane.b32.xlu1 %v1985_v48, %s2281_s10 }
0x1590   :  { %v1243_v49 = vpop.permute.xlu0 %1242  ;;  %v1972_v57 = vld [vmem:[#allocation3] sm:$0x3] }
0x1591   :  { %1246 = vst.msk [vmem:[#allocation3 + $0x8] sm:$0x3] %vm385_vm4, %v1243_v49 }
0x1593   :  { %2010 = vrot.lane.b32.xlu1 %v1987_v50, %s2281_s10 }
0x1594   :  { %v1675_v38 = vpop.permute.xlu0 %1674  ;;  %v1974_v51 = vld [vmem:[#allocation3 + $0x4] sm:$0x3] }
0x1595   :  { %1678 = vst.msk [vmem:[#allocation3 + $0xc] sm:$0x3] %vm385_vm4, %v1675_v38 }
0x1598   :  { %v2001_v52 = vpop.permute.xlu0 %2000  ;;  %v1976_v53 = vld [vmem:[#allocation3 + $0x8] sm:$0x3] }
0x1599   :  { %v2022_v27 = vsel %vm254_vm5, %v1974_v51, %v2001_v52 }
0x159a   :  { %2031 = vst.msk [vmem:[%s2776_s5 + $0x4] sm:$0x3] %vm2028_vm6, %v2022_v27 }
0x159c   :  { %v2005_v55 = vpop.permute.xlu0 %2004  ;;  %v1978_v60 = vld [vmem:[#allocation3 + $0xc] sm:$0x3] }
0x159d   :  { %v2024_v56 = vsel %vm254_vm5, %v1976_v53, %v2005_v55 }
0x159e   :  { %2033 = vst.msk [vmem:[%s2776_s5 + $0x8] sm:$0x3] %vm2028_vm6, %v2024_v56 }
0x15a0   :  { %v1997_v58 = vpop.permute.xlu0 %1996 }
0x15a1   :  { %v2020_v59 = vsel %vm254_vm5, %v1972_v57, %v1997_v58 }
0x15a2   :  { %2029 = vst.msk [vmem:[%s2776_s5] sm:$0x3] %vm2028_vm6, %v2020_v59 }
0x15a4   :  { %v2009_v61 = vpop.permute.xlu0 %2008 }
0x15a5   :  { %v2026_v62 = vsel %vm254_vm5, %v1978_v60, %v2009_v61 }
0x15a6   :  { %2035 = vst.msk [vmem:[%s2776_s5 + $0xc] sm:$0x3] %vm2028_vm6, %v2026_v62 }
0x15fd   :  { %v1891_v63 = vpop.permute.xlu1 %1890 }
0x15fe   :  { %1894 = vst.msk [vmem:[#allocation3 + $0xe] sm:$0x3] %vm385_vm4, %v1891_v63 }
0x1601   :  { %v2007_v15 = vpop.permute.xlu1 %2006 }
0x1602   :  { %v2025_v1 = vsel %vm254_vm5, %v1977_v0, %v2007_v15 }
0x1603   :  { %2034 = vst.msk [vmem:[%s2776_s5 + $0xa] sm:$0x3] %vm2028_vm6, %v2025_v1 }
0x1605   :  { %v1979_v2 = vld [vmem:[#allocation3 + $0xe] sm:$0x3]  ;;  %v2011_v3 = vpop.permute.xlu1 %2010 }
0x1606   :  { %v2027_v5 = vsel %vm254_vm5, %v1979_v2, %v2011_v3 }
0x1607   :  { %2036 = vst.msk [vmem:[%s2776_s5 + $0xe] sm:$0x3] %vm2028_vm6, %v2027_v5 }

// kernel: attentive_bigru_forward.4
= control target key start
LH: loop header
LB: loop body
LE: loop exit
PB: predicated region body
PF: predicated region fallthrough
CT: control target
= control target key end

     0   :  { %v46_v0 = vlaneseq  ;;  %v2301_v4 = vmov 0.0   ;;  %v2302_v5 = vmov 1983009808   ;;  %vm116_vm0 = vcmask 523264   ;;  %s2305_s8 = smov 32   ;;  %s2831_s1 = inlined_call_operand.vmem [shape: f32[64,192], index: 1, kind: input, shape index: {}]   ;;  %s2832_s3 = inlined_call_operand.vmem [shape: f32[32,192], index: 3, kind: input, shape index: {}]   ;;  %s2833_s0 = inlined_call_operand.vmem [shape: f32[8,2,64], index: 0, kind: input, shape index: {}]   ;;  %s2834_s4 = inlined_call_operand.vmem [shape: f32[1,64], index: 4, kind: input, shape index: {}]   ;;  %s2835_s2 = inlined_call_operand.vmem [shape: f32[1,192], index: 2, kind: input, shape index: {}]   ;;  %s2836_s5 = inlined_call_operand.vmem [shape: f32[8,2,64], index: 5, kind: output, shape index: {}]  }
   0x1   :  { %v29_v1 = vld [vmem:[%s2831_s1 + $0x8] sm:$0xff]  ;;  %v31_v2 = vld [vmem:[%s2831_s1 + $0x18] sm:$0xff]  ;;  %334 = vmatprep.mubr.f32.mxu1 %v2301_v4  ;;  %185 = vmatprep.mubr.f32.mxu0 %v2301_v4  ;;  %v56_v6 = vunpack.c.l.s4 %v2302_v5  ;;  %v28_v9 = vld [vmem:[%s2831_s1] sm:$0xff]  ;;  %vm246_vm1 = vcmask 1041408   ;;  %vm247_vm2 = vcmask 519170   ;;  %vm397_vm4 = vcmask 254976  }
   0x2   :  { %v258_v3 = vld [vmem:[%s2832_s3 + $0x8] sm:$0xff]  ;;  %v2087_v7 = vpack.c.bf16 %v31_v2, %v29_v1  ;;  %v260_v8 = vld [vmem:[%s2832_s3 + $0x18] sm:$0xff]  ;;  %v30_v10 = vld [vmem:[%s2831_s1 + $0x10] sm:$0xff]  ;;  %v2378_v20 = vshrl.u32 %v46_v0, 7  ;;  %vm266_vm5 = vcmask 261120   ;;  %vm2040_vm6 = vcmask 517120  }
   0x3   :  { %v2356_v11 = vpack.c.bf16 %v260_v8, %v258_v3  ;;  %v2089_v12 = vpack.c.bf16 %v30_v10, %v28_v9  ;;  %v257_v13 = vld [vmem:[%s2832_s3] sm:$0xff]  ;;  %v259_v14 = vld [vmem:[%s2832_s3 + $0x10] sm:$0xff]  ;;  %v33_v15 = vld [vmem:[%s2831_s1 + $0x28] sm:$0xff]  ;;  %v57_v21 = vunpack.c.0.s8 %v56_v6 }
   0x4   :  { %2088 = vmatprep.subr.bf16.mxu0 %v2087_v7  ;;  %v2367_v16 = vpack.c.bf16 %v259_v14, %v257_v13  ;;  %v35_v17 = vld [vmem:[%s2831_s1 + $0x38] sm:$0xff]  ;;  %v262_v18 = vld [vmem:[%s2832_s3 + $0x28] sm:$0xff]  ;;  %v32_v24 = vld [vmem:[%s2831_s1 + $0x20] sm:$0xff]  ;;  %v48_v62 = vsub.s32 0, %v2378_v20  ;;  %v52_v63 = vsub.s32 1, %v2378_v20 }
   0x5   :  { %v264_v19 = vld [vmem:[%s2832_s3 + $0x38] sm:$0xff]  ;;  %2104 = vmatprep.subr.bf16.mxu1 %v2356_v11  ;;  %2090 = vmatpush1.bf16.msra.mxu0 %v2089_v12  ;;  %v2091_v22 = vpack.c.bf16 %v35_v17, %v33_v15  ;;  %v34_v25 = vld [vmem:[%s2831_s1 + $0x30] sm:$0xff]  ;;  %v261_v26 = vld [vmem:[%s2832_s3 + $0x20] sm:$0xff]  ;;  %v2424_v39 = vsub.s32 %v57_v21, %v2378_v20 }
   0x6   :  { %v2381_v23 = vpack.c.bf16 %v264_v19, %v262_v18  ;;  %2106 = vmatpush1.bf16.msra.mxu1 %v2367_v16  ;;  %v2093_v27 = vpack.c.bf16 %v34_v25, %v32_v24  ;;  %v263_v28 = vld [vmem:[%s2832_s3 + $0x30] sm:$0xff]  ;;  %v37_v29 = vld [vmem:[%s2831_s1 + $0x48] sm:$0xff]  ;;  %v39_v30 = vld [vmem:[%s2831_s1 + $0x58] sm:$0xff]  ;;  %s2303_s3 = smov 64  }
   0x7   :  { %2092 = vmatprep.subr.bf16.mxu0 %v2091_v22  ;;  %v2403_v31 = vpack.c.bf16 %v263_v28, %v261_v26  ;;  %v2095_v32 = vpack.c.bf16 %v39_v30, %v37_v29  ;;  %v36_v33 = vld [vmem:[%s2831_s1 + $0x40] sm:$0xff]  ;;  %v38_v34 = vld [vmem:[%s2831_s1 + $0x50] sm:$0xff]  ;;  %v41_v35 = vld [vmem:[%s2831_s1 + $0x68] sm:$0xff] }
   0x8   :  { %2108 = vmatprep.subr.bf16.mxu1 %v2381_v23  ;;  %v43_v36 = vld [vmem:[%s2831_s1 + $0x78] sm:$0xff]  ;;  %v40_v37 = vld [vmem:[%s2831_s1 + $0x60] sm:$0xff]  ;;  %v42_v38 = vld [vmem:[%s2831_s1 + $0x70] sm:$0xff]  ;;  %v2097_v40 = vpack.c.bf16 %v38_v34, %v36_v33 }
   0x9   :  { %2094 = vmatpush1.bf16.msra.mxu0 %v2093_v27  ;;  %v20_v41 = vld [vmem:[%s2833_s0] sm:$0x3]  ;;  %v21_v42 = vld [vmem:[%s2833_s0 + $0x2] sm:$0x3]  ;;  %v22_v43 = vld [vmem:[%s2833_s0 + $0x4] sm:$0x3]  ;;  %v2099_v44 = vpack.c.bf16 %v43_v36, %v41_v35  ;;  %v2101_v56 = vpack.c.bf16 %v42_v38, %v40_v37 }
   0xa   :  { %2110 = vmatpush1.bf16.msra.mxu1 %v2403_v31  ;;  %2096 = vmatprep.subr.bf16.mxu0 %v2095_v32  ;;  %v23_v45 = vld [vmem:[%s2833_s0 + $0x6] sm:$0x3]  ;;  %v70_v46 = vcombine.low %v20_v41, %v21_v42  ;;  %v24_v47 = vld [vmem:[%s2833_s0 + $0x8] sm:$0x3]  ;;  %v25_v48 = vld [vmem:[%s2833_s0 + $0xa] sm:$0x3] }
   0xb   :  { %v71_v49 = vcombine.low %v22_v43, %v23_v45  ;;  %v26_v50 = vld [vmem:[%s2833_s0 + $0xc] sm:$0x3]  ;;  %v27_v51 = vld [vmem:[%s2833_s0 + $0xe] sm:$0x3]  ;;  %v2454_v52 = vld [vmem:[%s2834_s4] ss:$0 sm:$0xff]  ;;  %2112 = vmatprep.subr.bf16.mxu1 %v2356_v11  ;;  %v87_v54 = vcombine.low %v24_v47, %v25_v48 }
   0xc   :  { %v78_v53 = vrot.slane %v70_v46, %v2424_v39  ;;  %v88_v55 = vcombine.low %v26_v50, %v27_v51  ;;  %356 = vrot.lane.b32.xlu0 %v2454_v52, %s2303_s3  ;;  %v44_v0 = vld [vmem:[%s2835_s2] sm:$0x3]  ;;  %vm2492_vm3 = vmor %vm247_vm2, %vm246_vm1  ;;  %s2304_s2 = smov 96  }
   0xd   :  { %335 = vmatmul.mubr.f32.vlgmr.msra.gmra.mrb[0].mxu1 %v2301_v4  ;;  %2098 = vmatpush1.bf16.msra.mxu0 %v2097_v40  ;;  %v85_v57 = vrot.slane %v71_v49, %v2424_v39  ;;  %v95_v59 = vrot.slane %v87_v54, %v2424_v39  ;;  %v49_v1 = vrot.slane %v44_v0, %v48_v62 }
   0xe   :  { %2100 = vmatprep.subr.bf16.mxu0 %v2099_v44  ;;  %2114 = vmatpush1.bf16.msra.mxu1 %v2367_v16  ;;  %v102_v60 = vrot.slane %v88_v55, %v2424_v39  ;;  %v53_v2 = vrot.slane %v44_v0, %v52_v63 }
   0xf   :  { %2116 = vmatprep.subr.bf16.mxu1 %v2381_v23  ;;  %549 = vmatprep.mubr.f32.mxu1 %v2301_v4  ;;  %v86_v58 = vcombine.low %v78_v53, %v85_v57 }
  0x10   :  { %v103_v61 = vcombine.low %v95_v59, %v102_v60  ;;  %v54_v3 = vcombine.low %v49_v1, %v53_v2 }
  0x11   :  { %2102 = vmatpush1.bf16.msra.mxu0 %v2101_v56 }
  0x12   :  { %2118 = vmatpush1.bf16.msra.mxu1 %v2403_v31  ;;  %2120 = vmatprep.subr.bf16.mxu0 %v2356_v11  ;;  %v61_v5 = vrot.slane %v54_v3, %v2424_v39 }
  0x13   :  { %2128 = vmatprep.subr.bf16.mxu1 %v2356_v11 }
  0x14   :  { %2053 = vmatmul.mubr.msk.f32.vlgmr.msra.gmra.mrb[0].mxu0 %vm116_vm0, %v86_v58  ;;  %v104_v6 = vcombine.low %v61_v5, %v61_v5 }
  0x15   :  { %191 = vmatprep.mubr.f32.mxu0 %v2301_v4  ;;  %2122 = vmatpush1.bf16.msra.mxu0 %v2367_v16 }
  0x16   :  { %2124 = vmatprep.subr.bf16.mxu0 %v2381_v23  ;;  %v111_v9 = vrot.slane %v104_v6, %v2424_v39 }
  0x18   :  { %2054 = vmatmul.mubr.msk.f32.gmra.mrb[2].mxu0 %vm116_vm0, %v103_v61  ;;  %v112_v17 = vcombine.low %v111_v9, %v111_v9  ;;  %v113_v18 = vcombine.high %v111_v9, %v111_v9 }
  0x19   :  { %2126 = vmatpush1.bf16.msra.mxu0 %v2403_v31  ;;  %767 = vmatprep.mubr.f32.mxu0 %v2301_v4 }
  0x1a   :  { %2136 = vmatprep.subr.bf16.mxu0 %v2356_v11 }
  0x7e   :  { %v2482_v7 = vpop.permute.xlu0 %356 }
  0xe0   :  { %v336_v8 = vpop.f32.mrb[0].mxu1 }
  0xe1   :  { %v338_v10 = vpop.f32.mrb[1].mxu1  ;;  %v359_v12 = vadd.f32 %v2482_v7, %v336_v8  ;;  %v406_v44 = vrot.slane %v336_v8, %v2424_v39 }
  0xe2   :  { %v437_v13 = vadd.f32 %v2454_v52, %v338_v10  ;;  %v426_v45 = vrot.slane %v338_v10, %v2424_v39 }
  0xe3   :  { %v367_v14 = vrot.slane %v359_v12, %v2424_v39  ;;  %v407_v46 = vcombine.high %v406_v44, %v406_v44 }
  0xe4   :  { %v445_v15 = vrot.slane %v437_v13, %v2424_v39  ;;  %v427_v48 = vcombine.high %v426_v45, %v426_v45 }
  0xe5   :  { %368 = vrot.lane.b32.xlu1 %v367_v14, %s2303_s3 }
  0xe6   :  { %v446_v19 = vcombine.high %v445_v15, %v445_v15 }
  0xe7   :  { %v187_v20 = vpop.f32.mrb[0].mxu0 }
  0xe8   :  { %447 = vrot.lane.b32.xlu0 %v446_v19, %s2303_s3  ;;  %v188_v21 = vadd.f32 %v187_v20, %v112_v17  ;;  %v189_v22 = vpop.f32.mrb[1].mxu0 }
  0xe9   :  { %v190_v24 = vadd.f32 %v189_v22, %v113_v18 }
  0xeb   :  { %v202_v25 = vcombine.low %v188_v21, %v190_v24  ;;  %v203_v26 = vcombine.high %v188_v21, %v190_v24  ;;  %v193_v27 = vpop.f32.mrb[2].mxu0 }
  0xec   :  { %v194_v29 = vadd.f32 %v193_v27, %v112_v17  ;;  %v195_v30 = vpop.f32.mrb[3].mxu0 }
  0xed   :  { %v210_v32 = vrot.slane %v202_v25, %v2424_v39  ;;  %v217_v33 = vrot.slane %v203_v26, %v2424_v39  ;;  %v196_v34 = vadd.f32 %v195_v30, %v113_v18 }
  0xef   :  { %v218_v35 = vcombine.high %v210_v32, %v210_v32  ;;  %v219_v36 = vcombine.high %v217_v33, %v217_v33  ;;  %249 = vst.msk [vmem:[#allocation2] sm:$0xf] %vm2492_vm3, %v210_v32  ;;  %251 = vst.msk [vmem:[#allocation2 + $0x8] sm:$0xf] %vm2492_vm3, %v217_v33  ;;  %v220_v37 = vcombine.low %v194_v29, %v196_v34 }
  0xf0   :  { %v221_v38 = vcombine.high %v194_v29, %v196_v34 }
  0xf1   :  { %250 = vst.msk [vmem:[#allocation2 + $0x4] sm:$0xf] %vm2492_vm3, %v218_v35  ;;  %252 = vst.msk [vmem:[#allocation2 + $0xc] sm:$0xf] %vm2492_vm3, %v219_v36  ;;  %v228_v40 = vrot.slane %v220_v37, %v2424_v39 }
  0xf2   :  { %v235_v41 = vrot.slane %v221_v38, %v2424_v39 }
  0xf3   :  { %v236_v42 = vcombine.high %v228_v40, %v228_v40  ;;  %253 = vst.msk [vmem:[#allocation2 + $0x10] sm:$0xf] %vm2492_vm3, %v228_v40 }
  0xf4   :  { %v237_v43 = vcombine.high %v235_v41, %v235_v41  ;;  %255 = vst.msk [vmem:[#allocation2 + $0x18] sm:$0xf] %vm2492_vm3, %v235_v41 }
  0xf5   :  { %254 = vst.msk [vmem:[#allocation2 + $0x14] sm:$0xf] %vm2492_vm3, %v236_v42 }
  0xf6   :  { %256 = vst.msk [vmem:[#allocation2 + $0x1c] sm:$0xf] %vm2492_vm3, %v237_v43  ;;  %v341_v53 = vld [vmem:[#allocation2] sm:$0xf] }
  0xf7   :  { %v344_v54 = vadd.f32 %v341_v53, %v336_v8 }
  0xf8   :  { %v557_v45 = vld [vmem:[#allocation2 + $0x4] sm:$0xf] }
  0xf9   :  { %v2055_v55 = vmul.f32 -1.442695, %v344_v54 }
  0xfb   :  { %2172 = vpow2.f32 %v2055_v55  ;;  %v559_v43 = vld [vmem:[#allocation2 + $0x18] sm:$0xf] }
  0xfd   :  { %v343_v47 = vld [vmem:[#allocation2 + $0x1c] sm:$0xf] }
  0xfe   :  { %451 = vrot.lane.b32.xlu1 %v343_v47, %s2304_s2  ;;  %v409_v49 = vadd.f32 %v407_v46, %v343_v47  ;;  %v417_v50 = vrot.slane %v343_v47, 2 }
 0x100   :  { %v429_v51 = vadd.f32 %v427_v48, %v417_v50  ;;  %v2057_v56 = vmul.f32 -1.442695, %v409_v49 }
 0x102   :  { %2174 = vpow2.f32 %v2057_v56  ;;  %v2058_v3 = vmul.f32 -1.442695, %v429_v51 }
 0x105   :  { %v2173_v57 = vpop.eup %2172 }
 0x106   :  { %v348_v59 = vadd.f32 1.0, %v2173_v57 }
 0x108   :  { %2176 = vrcp.f32 %v348_v59 }
 0x10c   :  { %v2175_v58 = vpop.eup %2174 }
 0x10d   :  { %v413_v60 = vadd.f32 1.0, %v2175_v58 }
 0x10f   :  { %2178 = vrcp.f32 %v413_v60 }
 0x110   :  { %2180 = vpow2.f32 %v2058_v3 }
 0x112   :  { %v2177_v61 = vpop.eup %2176 }
 0x113   :  { %v378_v27 = vsub.f32 1.0, %v2177_v61  ;;  %v384_v29 = vmul.f32 0.0, %v2177_v61 }
 0x119   :  { %v2179_v0 = vpop.eup %2178 }
 0x11a   :  { %v2181_v5 = vpop.eup %2180 }
 0x11b   :  { %v433_v8 = vadd.f32 1.0, %v2181_v5 }
 0x11d   :  { %2182 = vrcp.f32 %v433_v8 }
 0x127   :  { %v2183_v15 = vpop.eup %2182 }
 0x128   :  { %v461_v18 = vsub.f32 1.0, %v2183_v15  ;;  %v463_v21 = vmul.f32 0.0, %v2183_v15 }
 0x157   :  { %v369_v62 = vpop.permute.xlu1 %368 }
 0x158   :  { %v371_v63 = vmul.f32 %v2177_v61, %v369_v62 }
 0x15a   :  { %v448_v1 = vpop.permute.xlu0 %447  ;;  %373 = vrot.lane.b32.xlu1 %v371_v63, %s2303_s3 }
 0x15b   :  { %v450_v2 = vmul.f32 %v2179_v0, %v448_v1 }
 0x15d   :  { %456 = vrot.lane.b32.xlu0 %v450_v2, %s2305_s8  ;;  %v625_v2 = vrot.slane %v559_v43, 2 }
 0x170   :  { %v452_v6 = vpop.permute.xlu1 %451 }
 0x171   :  { %v453_v12 = vrot.slane %v452_v6, 2 }
 0x1cc   :  { %v374_v9 = vpop.permute.xlu1 %373 }
 0x1cd   :  { %v376_v10 = vadd.f32 %v374_v9, %v341_v53 }
 0x1cf   :  { %2184 = vtanh.f32 %v376_v10  ;;  %v457_v13 = vpop.permute.xlu0 %456 }
 0x1d0   :  { %v459_v14 = vadd.f32 %v457_v13, %v453_v12 }
 0x1d2   :  { %2186 = vtanh.f32 %v459_v14 }
 0x1d9   :  { %v2185_v17 = vpop.eup %2184 }
 0x1da   :  { %380 = vrot.lane.b32.xlu0 %v2185_v17, %s2304_s2 }
 0x1dc   :  { %v2187_v19 = vpop.eup %2186 }
 0x1dd   :  { %v462_v20 = vmul.f32 %v2187_v19, %v461_v18 }
 0x1df   :  { %v464_v22 = vadd.f32 %v463_v21, %v462_v20 }
 0x1e1   :  { %466 = vst.msk [vmem:[#allocation4 + $0xe] sm:$0x3] %vm397_vm4, %v464_v22  ;;  %v468_v24 = vcombine.low %v464_v22, %v464_v22 }
 0x1e3   :  { %v475_v25 = vrot.slane %v468_v24, %v2424_v39 }
 0x1e5   :  { %476 = vrot.lane.b32.xlu1 %v475_v25, %s2305_s8 }
 0x24c   :  { %v381_v26 = vpop.permute.xlu0 %380 }
 0x24d   :  { %v383_v28 = vmul.f32 %v381_v26, %v378_v27 }
 0x24f   :  { %v2525_v30 = vadd.f32 %v384_v29, %v383_v28 }
 0x257   :  { %v477_v32 = vpop.permute.xlu1 %476 }
 0x258   :  { %v2529_v33 = vsel %vm246_vm1, %v2525_v30, %v477_v32 }
 0x259   :  { %481 = vrot.lane.b32.xlu0 %v2529_v33, %s2304_s2  ;;  %v676_v61 = vrot.slane %v2529_v33, %v2424_v39 }
 0x25b   :  { %v677_v63 = vcombine.high %v676_v61, %v676_v61 }
 0x2cb   :  { %v482_v34 = vpop.permute.xlu0 %481 }
 0x2cc   :  { %2059 = vmatmul.mubr.msk.f32.vlgmr.msra.gmra.mrb[2].mxu1 %vm266_vm5, %v482_v34 }
 0x2cd   :  { %2130 = vmatpush1.bf16.msra.mxu1 %v2367_v16  ;;  %985 = vmatprep.mubr.f32.mxu1 %v2301_v4 }
 0x2ce   :  { %2132 = vmatprep.subr.bf16.mxu1 %v2381_v23 }
 0x2d1   :  { %2134 = vmatpush1.bf16.msra.mxu1 %v2403_v31 }
 0x2d2   :  { %2144 = vmatprep.subr.bf16.mxu1 %v2356_v11 }
 0x39f   :  { %v551_v35 = vpop.f32.mrb[2].mxu1 }
 0x3a0   :  { %v567_v36 = vadd.f32 %v551_v35, %v2482_v7  ;;  %v553_v37 = vpop.f32.mrb[3].mxu1  ;;  %v614_v44 = vrot.slane %v551_v35, %v2424_v39  ;;  %v560_v47 = vadd.f32 %v557_v45, %v551_v35 }
 0x3a1   :  { %v644_v38 = vadd.f32 %v2454_v52, %v553_v37  ;;  %v634_v0 = vrot.slane %v553_v37, %v2424_v39 }
 0x3a2   :  { %v575_v40 = vrot.slane %v567_v36, %v2424_v39  ;;  %v615_v46 = vcombine.high %v614_v44, %v614_v44  ;;  %v2060_v49 = vmul.f32 -1.442695, %v560_v47 }
 0x3a3   :  { %v652_v41 = vrot.slane %v644_v38, %v2424_v39  ;;  %v635_v1 = vcombine.high %v634_v0, %v634_v0 }
 0x3a4   :  { %576 = vrot.lane.b32.xlu0 %v575_v40, %s2303_s3  ;;  %v617_v48 = vadd.f32 %v615_v46, %v559_v43  ;;  %2188 = vpow2.f32 %v2060_v49  ;;  %v777_v46 = vld [vmem:[#allocation2 + $0x14] sm:$0xf] }
 0x3a5   :  { %v653_v42 = vcombine.high %v652_v41, %v652_v41  ;;  %v637_v3 = vadd.f32 %v635_v1, %v625_v2 }
 0x3a6   :  { %v2061_v50 = vmul.f32 -1.442695, %v617_v48  ;;  %v775_v48 = vld [vmem:[#allocation2 + $0x8] sm:$0xf] }
 0x3a7   :  { %654 = vrot.lane.b32.xlu1 %v653_v42, %s2303_s3  ;;  %v2062_v5 = vmul.f32 -1.442695, %v637_v3 }
 0x3a8   :  { %2190 = vpow2.f32 %v2061_v50 }
 0x3ab   :  { %658 = vrot.lane.b32.xlu1 %v559_v43, %s2304_s2 }
 0x3ae   :  { %v2189_v51 = vpop.eup %2188 }
 0x3af   :  { %v564_v54 = vadd.f32 1.0, %v2189_v51 }
 0x3b1   :  { %2192 = vrcp.f32 %v564_v54 }
 0x3b2   :  { %v2191_v53 = vpop.eup %2190 }
 0x3b3   :  { %v621_v55 = vadd.f32 1.0, %v2191_v53 }
 0x3b5   :  { %2194 = vrcp.f32 %v621_v55 }
 0x3b6   :  { %2196 = vpow2.f32 %v2062_v5 }
 0x3bb   :  { %v2193_v56 = vpop.eup %2192 }
 0x3bc   :  { %v586_v29 = vsub.f32 1.0, %v2193_v56  ;;  %v592_v34 = vmul.f32 %v2193_v56, %v2529_v33 }
 0x3bf   :  { %v2195_v59 = vpop.eup %2194 }
 0x3c0   :  { %v2197_v6 = vpop.eup %2196 }
 0x3c1   :  { %v641_v9 = vadd.f32 1.0, %v2197_v6  ;;  %v843_v6 = vrot.slane %v777_v46, 2 }
 0x3c3   :  { %2198 = vrcp.f32 %v641_v9 }
 0x3cd   :  { %v2199_v17 = vpop.eup %2198 }
 0x3ce   :  { %v668_v20 = vsub.f32 1.0, %v2199_v17 }
 0x416   :  { %v577_v57 = vpop.permute.xlu0 %576 }
 0x417   :  { %v579_v58 = vmul.f32 %v2193_v56, %v577_v57 }
 0x419   :  { %v655_v60 = vpop.permute.xlu1 %654  ;;  %581 = vrot.lane.b32.xlu1 %v579_v58, %s2303_s3 }
 0x41a   :  { %v657_v62 = vmul.f32 %v2195_v59, %v655_v60 }
 0x41c   :  { %663 = vrot.lane.b32.xlu0 %v657_v62, %s2305_s8 }
 0x41d   :  { %v659_v8 = vpop.permute.xlu1 %658 }
 0x41e   :  { %v660_v13 = vrot.slane %v659_v8, 2 }
 0x420   :  { %678 = vrot.lane.b32.xlu0 %v677_v63, %s2304_s2 }
 0x48b   :  { %v582_v10 = vpop.permute.xlu1 %581 }
 0x48c   :  { %v584_v12 = vadd.f32 %v582_v10, %v557_v45 }
 0x48e   :  { %2200 = vtanh.f32 %v584_v12  ;;  %v664_v14 = vpop.permute.xlu0 %663 }
 0x48f   :  { %v666_v15 = vadd.f32 %v664_v14, %v660_v13 }
 0x491   :  { %2202 = vtanh.f32 %v666_v15 }
 0x492   :  { %v679_v19 = vpop.permute.xlu0 %678 }
 0x493   :  { %v681_v24 = vmul.f32 %v2199_v17, %v679_v19 }
 0x498   :  { %v2201_v18 = vpop.eup %2200 }
 0x499   :  { %588 = vrot.lane.b32.xlu1 %v2201_v18, %s2304_s2 }
 0x49b   :  { %v2203_v21 = vpop.eup %2202 }
 0x49c   :  { %v669_v22 = vmul.f32 %v2203_v21, %v668_v20 }
 0x49e   :  { %v682_v25 = vadd.f32 %v681_v24, %v669_v22 }
 0x4a0   :  { %684 = vst.msk [vmem:[#allocation4 + $0xc] sm:$0x3] %vm397_vm4, %v682_v25  ;;  %v686_v26 = vcombine.low %v682_v25, %v682_v25 }
 0x4a2   :  { %v693_v27 = vrot.slane %v686_v26, %v2424_v39 }
 0x4a4   :  { %694 = vrot.lane.b32.xlu0 %v693_v27, %s2305_s8 }
 0x50b   :  { %v589_v28 = vpop.permute.xlu1 %588 }
 0x50c   :  { %v591_v32 = vmul.f32 %v589_v28, %v586_v29 }
 0x50e   :  { %v2558_v35 = vadd.f32 %v592_v34, %v591_v32 }
 0x516   :  { %v695_v36 = vpop.permute.xlu0 %694 }
 0x517   :  { %v2562_v37 = vsel %vm246_vm1, %v2558_v35, %v695_v36 }
 0x518   :  { %699 = vrot.lane.b32.xlu1 %v2562_v37, %s2304_s2  ;;  %v894_v0 = vrot.slane %v2562_v37, %v2424_v39 }
 0x51a   :  { %v895_v2 = vcombine.high %v894_v0, %v894_v0 }
 0x58a   :  { %v700_v38 = vpop.permute.xlu1 %699 }
 0x58b   :  { %2063 = vmatmul.mubr.msk.f32.vlgmr.msra.gmra.mrb[4].mxu0 %vm266_vm5, %v700_v38 }
 0x58c   :  { %2138 = vmatpush1.bf16.msra.mxu0 %v2367_v16  ;;  %1203 = vmatprep.mubr.f32.mxu0 %v2301_v4 }
 0x58d   :  { %2140 = vmatprep.subr.bf16.mxu0 %v2381_v23 }
 0x590   :  { %2142 = vmatpush1.bf16.msra.mxu0 %v2403_v31 }
 0x591   :  { %2152 = vmatprep.subr.bf16.mxu0 %v2356_v11 }
 0x65e   :  { %v769_v33 = vpop.f32.mrb[4].mxu0 }
 0x65f   :  { %v785_v40 = vadd.f32 %v769_v33, %v2482_v7  ;;  %v771_v41 = vpop.f32.mrb[5].mxu0  ;;  %v832_v47 = vrot.slane %v769_v33, %v2424_v39  ;;  %v778_v50 = vadd.f32 %v775_v48, %v769_v33 }
 0x660   :  { %v862_v42 = vadd.f32 %v2454_v52, %v771_v41  ;;  %v852_v3 = vrot.slane %v771_v41, %v2424_v39 }
 0x661   :  { %v793_v43 = vrot.slane %v785_v40, %v2424_v39  ;;  %v833_v49 = vcombine.high %v832_v47, %v832_v47  ;;  %v2064_v53 = vmul.f32 -1.442695, %v778_v50  ;;  %v995_v50 = vld [vmem:[#allocation2 + $0x10] sm:$0xf] }
 0x662   :  { %v870_v44 = vrot.slane %v862_v42, %v2424_v39  ;;  %v853_v5 = vcombine.high %v852_v3, %v852_v3 }
 0x663   :  { %794 = vrot.lane.b32.xlu1 %v793_v43, %s2303_s3  ;;  %v835_v51 = vadd.f32 %v833_v49, %v777_v46  ;;  %2204 = vpow2.f32 %v2064_v53 }
 0x664   :  { %v871_v45 = vcombine.high %v870_v44, %v870_v44  ;;  %v855_v8 = vadd.f32 %v853_v5, %v843_v6 }
 0x665   :  { %v2065_v54 = vmul.f32 -1.442695, %v835_v51  ;;  %v993_v51 = vld [vmem:[#allocation2 + $0xc] sm:$0xf] }
 0x666   :  { %872 = vrot.lane.b32.xlu0 %v871_v45, %s2303_s3  ;;  %v2066_v9 = vmul.f32 -1.442695, %v855_v8 }
 0x667   :  { %2206 = vpow2.f32 %v2065_v54 }
 0x66a   :  { %876 = vrot.lane.b32.xlu0 %v777_v46, %s2304_s2 }
 0x66d   :  { %v2205_v55 = vpop.eup %2204 }
 0x66e   :  { %v782_v57 = vadd.f32 1.0, %v2205_v55 }
 0x670   :  { %2208 = vrcp.f32 %v782_v57 }
 0x671   :  { %v2207_v56 = vpop.eup %2206 }
 0x672   :  { %v839_v58 = vadd.f32 1.0, %v2207_v56 }
 0x674   :  { %2210 = vrcp.f32 %v839_v58 }
 0x675   :  { %2212 = vpow2.f32 %v2066_v9 }
 0x67a   :  { %v2209_v59 = vpop.eup %2208 }
 0x67b   :  { %v804_v36 = vsub.f32 1.0, %v2209_v59  ;;  %v810_v33 = vmul.f32 %v2209_v59, %v2562_v37 }
 0x67e   :  { %v2211_v62 = vpop.eup %2210 }
 0x67f   :  { %v2213_v10 = vpop.eup %2212 }
 0x680   :  { %v859_v13 = vadd.f32 1.0, %v2213_v10  ;;  %v1061_v10 = vrot.slane %v995_v50, 2 }
 0x682   :  { %2214 = vrcp.f32 %v859_v13 }
 0x68c   :  { %v2215_v20 = vpop.eup %2214 }
 0x68d   :  { %v886_v24 = vsub.f32 1.0, %v2215_v20 }
 0x6d5   :  { %v795_v60 = vpop.permute.xlu1 %794 }
 0x6d6   :  { %v797_v61 = vmul.f32 %v2209_v59, %v795_v60 }
 0x6d8   :  { %799 = vrot.lane.b32.xlu0 %v797_v61, %s2303_s3  ;;  %v873_v63 = vpop.permute.xlu0 %872 }
 0x6d9   :  { %v875_v1 = vmul.f32 %v2211_v62, %v873_v63 }
 0x6db   :  { %881 = vrot.lane.b32.xlu1 %v875_v1, %s2305_s8 }
 0x6dc   :  { %v877_v12 = vpop.permute.xlu0 %876 }
 0x6dd   :  { %v878_v17 = vrot.slane %v877_v12, 2 }
 0x6df   :  { %896 = vrot.lane.b32.xlu1 %v895_v2, %s2304_s2 }
 0x74a   :  { %v800_v14 = vpop.permute.xlu0 %799 }
 0x74b   :  { %v802_v15 = vadd.f32 %v800_v14, %v775_v48 }
 0x74d   :  { %2216 = vtanh.f32 %v802_v15  ;;  %v882_v18 = vpop.permute.xlu1 %881 }
 0x74e   :  { %v884_v19 = vadd.f32 %v882_v18, %v878_v17 }
 0x750   :  { %2218 = vtanh.f32 %v884_v19 }
 0x751   :  { %v897_v22 = vpop.permute.xlu1 %896 }
 0x752   :  { %v899_v27 = vmul.f32 %v2215_v20, %v897_v22 }
 0x757   :  { %v2217_v21 = vpop.eup %2216 }
 0x758   :  { %806 = vrot.lane.b32.xlu0 %v2217_v21, %s2304_s2 }
 0x75a   :  { %v2219_v25 = vpop.eup %2218 }
 0x75b   :  { %v887_v26 = vmul.f32 %v2219_v25, %v886_v24 }
 0x75d   :  { %v900_v28 = vadd.f32 %v899_v27, %v887_v26 }
 0x75f   :  { %902 = vst.msk [vmem:[#allocation4 + $0xa] sm:$0x3] %vm397_vm4, %v900_v28  ;;  %v904_v29 = vcombine.low %v900_v28, %v900_v28 }
 0x761   :  { %v911_v32 = vrot.slane %v904_v29, %v2424_v39 }
 0x763   :  { %912 = vrot.lane.b32.xlu1 %v911_v32, %s2305_s8 }
 0x7ca   :  { %v807_v34 = vpop.permute.xlu0 %806 }
 0x7cb   :  { %v809_v38 = vmul.f32 %v807_v34, %v804_v36 }
 0x7cd   :  { %v2591_v40 = vadd.f32 %v810_v33, %v809_v38 }
 0x7d5   :  { %v913_v41 = vpop.permute.xlu1 %912 }
 0x7d6   :  { %v2595_v42 = vsel %vm246_vm1, %v2591_v40, %v913_v41 }
 0x7d7   :  { %917 = vrot.lane.b32.xlu0 %v2595_v42, %s2304_s2  ;;  %v1112_v3 = vrot.slane %v2595_v42, %v2424_v39 }
 0x7d9   :  { %v1113_v6 = vcombine.high %v1112_v3, %v1112_v3 }
 0x849   :  { %v918_v43 = vpop.permute.xlu0 %917 }
 0x84a   :  { %2067 = vmatmul.mubr.msk.f32.vlgmr.msra.gmra.mrb[4].mxu1 %vm266_vm5, %v918_v43 }
 0x84b   :  { %2146 = vmatpush1.bf16.msra.mxu1 %v2367_v16  ;;  %1419 = vmatprep.mubr.f32.mxu1 %v2301_v4 }
 0x84c   :  { %2148 = vmatprep.subr.bf16.mxu1 %v2381_v23 }
 0x84f   :  { %2150 = vmatpush1.bf16.msra.mxu1 %v2403_v31 }
 0x850   :  { %2160 = vmatprep.subr.bf16.mxu1 %v2356_v11 }
 0x91d   :  { %v987_v37 = vpop.f32.mrb[4].mxu1 }
 0x91e   :  { %v1003_v44 = vadd.f32 %v987_v37, %v2482_v7  ;;  %v989_v45 = vpop.f32.mrb[5].mxu1  ;;  %v1050_v11 = vrot.slane %v987_v37, %v2424_v39  ;;  %v996_v54 = vadd.f32 %v993_v51, %v987_v37 }
 0x91f   :  { %v1080_v46 = vadd.f32 %v2454_v52, %v989_v45  ;;  %v1070_v8 = vrot.slane %v989_v45, %v2424_v39 }
 0x920   :  { %v1011_v47 = vrot.slane %v1003_v44, %v2424_v39  ;;  %v1051_v53 = vcombine.high %v1050_v11, %v1050_v11  ;;  %v2068_v56 = vmul.f32 -1.442695, %v996_v54  ;;  %v1211_v54 = vld [vmem:[#allocation2 + $0xc] sm:$0xf] }
 0x921   :  { %v1088_v48 = vrot.slane %v1080_v46, %v2424_v39  ;;  %v1071_v9 = vcombine.high %v1070_v8, %v1070_v8 }
 0x922   :  { %1012 = vrot.lane.b32.xlu0 %v1011_v47, %s2303_s3  ;;  %v1053_v55 = vadd.f32 %v1051_v53, %v995_v50  ;;  %2220 = vpow2.f32 %v2068_v56  ;;  %v1210_v56 = vld [vmem:[#allocation2 + $0x10] sm:$0xf] }
 0x923   :  { %v1089_v49 = vcombine.high %v1088_v48, %v1088_v48  ;;  %v1073_v12 = vadd.f32 %v1071_v9, %v1061_v10 }
 0x924   :  { %v2069_v57 = vmul.f32 -1.442695, %v1053_v55 }
 0x925   :  { %1090 = vrot.lane.b32.xlu1 %v1089_v49, %s2303_s3  ;;  %v2070_v13 = vmul.f32 -1.442695, %v1073_v12 }
 0x926   :  { %2222 = vpow2.f32 %v2069_v57 }
 0x929   :  { %1094 = vrot.lane.b32.xlu1 %v995_v50, %s2304_s2 }
 0x92c   :  { %v2221_v58 = vpop.eup %2220 }
 0x92d   :  { %v1000_v60 = vadd.f32 1.0, %v2221_v58 }
 0x92f   :  { %2224 = vrcp.f32 %v1000_v60 }
 0x930   :  { %v2223_v59 = vpop.eup %2222 }
 0x931   :  { %v1057_v61 = vadd.f32 1.0, %v2223_v59 }
 0x933   :  { %2226 = vrcp.f32 %v1057_v61 }
 0x934   :  { %2228 = vpow2.f32 %v2070_v13 }
 0x939   :  { %v2225_v62 = vpop.eup %2224 }
 0x93a   :  { %v1022_v41 = vsub.f32 1.0, %v2225_v62  ;;  %v1028_v37 = vmul.f32 %v2225_v62, %v2595_v42 }
 0x93d   :  { %v2227_v1 = vpop.eup %2226 }
 0x93e   :  { %v2229_v14 = vpop.eup %2228 }
 0x93f   :  { %v1077_v17 = vadd.f32 1.0, %v2229_v14 }
 0x941   :  { %2230 = vrcp.f32 %v1077_v17 }
 0x94b   :  { %v2231_v24 = vpop.eup %2230 }
 0x94c   :  { %v1104_v27 = vsub.f32 1.0, %v2231_v24 }
 0x994   :  { %v1013_v63 = vpop.permute.xlu0 %1012 }
 0x995   :  { %v1015_v0 = vmul.f32 %v2225_v62, %v1013_v63 }
 0x997   :  { %1017 = vrot.lane.b32.xlu1 %v1015_v0, %s2303_s3  ;;  %v1091_v2 = vpop.permute.xlu1 %1090 }
 0x998   :  { %v1093_v5 = vmul.f32 %v2227_v1, %v1091_v2 }
 0x99a   :  { %1099 = vrot.lane.b32.xlu0 %v1093_v5, %s2305_s8 }
 0x99b   :  { %v1095_v15 = vpop.permute.xlu1 %1094 }
 0x99c   :  { %v1096_v20 = vrot.slane %v1095_v15, 2  ;;  %v1277_v15 = vrot.slane %v1211_v54, 2 }
 0x99e   :  { %1114 = vrot.lane.b32.xlu0 %v1113_v6, %s2304_s2 }
 0xa09   :  { %v1018_v18 = vpop.permute.xlu1 %1017 }
 0xa0a   :  { %v1020_v19 = vadd.f32 %v1018_v18, %v993_v51 }
 0xa0c   :  { %2232 = vtanh.f32 %v1020_v19  ;;  %v1100_v21 = vpop.permute.xlu0 %1099 }
 0xa0d   :  { %v1102_v22 = vadd.f32 %v1100_v21, %v1096_v20 }
 0xa0f   :  { %2234 = vtanh.f32 %v1102_v22 }
 0xa10   :  { %v1115_v26 = vpop.permute.xlu0 %1114 }
 0xa11   :  { %v1117_v32 = vmul.f32 %v2231_v24, %v1115_v26 }
 0xa16   :  { %v2233_v25 = vpop.eup %2232 }
 0xa17   :  { %1024 = vrot.lane.b32.xlu1 %v2233_v25, %s2304_s2 }
 0xa19   :  { %v2235_v28 = vpop.eup %2234 }
 0xa1a   :  { %v1105_v29 = vmul.f32 %v2235_v28, %v1104_v27 }
 0xa1c   :  { %v1118_v34 = vadd.f32 %v1117_v32, %v1105_v29 }
 0xa1e   :  { %1120 = vst.msk [vmem:[#allocation4 + $0x8] sm:$0x3] %vm397_vm4, %v1118_v34  ;;  %v1122_v36 = vcombine.low %v1118_v34, %v1118_v34 }
 0xa20   :  { %v1129_v38 = vrot.slane %v1122_v36, %v2424_v39 }
 0xa22   :  { %1130 = vrot.lane.b32.xlu0 %v1129_v38, %s2305_s8 }
 0xa89   :  { %v1025_v33 = vpop.permute.xlu1 %1024 }
 0xa8a   :  { %v1027_v43 = vmul.f32 %v1025_v33, %v1022_v41 }
 0xa8c   :  { %v2624_v44 = vadd.f32 %v1028_v37, %v1027_v43 }
 0xa94   :  { %v1131_v45 = vpop.permute.xlu0 %1130 }
 0xa95   :  { %v2628_v46 = vsel %vm246_vm1, %v2624_v44, %v1131_v45 }
 0xa96   :  { %1135 = vrot.lane.b32.xlu1 %v2628_v46, %s2304_s2  ;;  %v1328_v9 = vrot.slane %v2628_v46, %v2424_v39 }
 0xa98   :  { %v1329_v12 = vcombine.high %v1328_v9, %v1328_v9 }
 0xb08   :  { %v1136_v47 = vpop.permute.xlu1 %1135 }
 0xb09   :  { %2071 = vmatmul.mubr.msk.f32.vlgmr.msra.gmra.mrb[6].mxu0 %vm266_vm5, %v1136_v47 }
 0xb0a   :  { %2154 = vmatpush1.bf16.msra.mxu0 %v2367_v16  ;;  %1635 = vmatprep.mubr.f32.mxu0 %v2301_v4 }
 0xb0b   :  { %2156 = vmatprep.subr.bf16.mxu0 %v2381_v23 }
 0xb0e   :  { %2158 = vmatpush1.bf16.msra.mxu0 %v2403_v31 }
 0xbdc   :  { %v1205_v42 = vpop.f32.mrb[6].mxu0 }
 0xbdd   :  { %v1219_v48 = vadd.f32 %v1205_v42, %v2482_v7  ;;  %v1207_v49 = vpop.f32.mrb[7].mxu0  ;;  %v1266_v55 = vrot.slane %v1205_v42, %v2424_v39  ;;  %v1212_v58 = vadd.f32 %v1210_v56, %v1205_v42 }
 0xbde   :  { %v1296_v50 = vadd.f32 %v2454_v52, %v1207_v49  ;;  %v1286_v13 = vrot.slane %v1207_v49, %v2424_v39 }
 0xbdf   :  { %v1227_v11 = vrot.slane %v1219_v48, %v2424_v39  ;;  %v1267_v57 = vcombine.high %v1266_v55, %v1266_v55  ;;  %v2072_v60 = vmul.f32 -1.442695, %v1212_v58 }
 0xbe0   :  { %v1304_v51 = vrot.slane %v1296_v50, %v2424_v39  ;;  %v1287_v14 = vcombine.high %v1286_v13, %v1286_v13 }
 0xbe1   :  { %1228 = vrot.lane.b32.xlu1 %v1227_v11, %s2303_s3  ;;  %v1269_v59 = vadd.f32 %v1267_v57, %v1211_v54  ;;  %2236 = vpow2.f32 %v2072_v60 }
 0xbe2   :  { %v1305_v53 = vcombine.high %v1304_v51, %v1304_v51  ;;  %v1289_v17 = vadd.f32 %v1287_v14, %v1277_v15 }
 0xbe3   :  { %v2073_v61 = vmul.f32 -1.442695, %v1269_v59 }
 0xbe4   :  { %1306 = vrot.lane.b32.xlu0 %v1305_v53, %s2303_s3  ;;  %v2074_v18 = vmul.f32 -1.442695, %v1289_v17 }
 0xbe5   :  { %2238 = vpow2.f32 %v2073_v61 }
 0xbe8   :  { %1310 = vrot.lane.b32.xlu0 %v1211_v54, %s2304_s2 }
 0xbeb   :  { %v2237_v62 = vpop.eup %2236 }
 0xbec   :  { %v1216_v0 = vadd.f32 1.0, %v2237_v62 }
 0xbee   :  { %2240 = vrcp.f32 %v1216_v0 }
 0xbef   :  { %v2239_v63 = vpop.eup %2238 }
 0xbf0   :  { %v1273_v1 = vadd.f32 1.0, %v2239_v63 }
 0xbf2   :  { %2242 = vrcp.f32 %v1273_v1 }
 0xbf3   :  { %2244 = vpow2.f32 %v2074_v18 }
 0xbf8   :  { %v2241_v2 = vpop.eup %2240 }
 0xbf9   :  { %v1238_v47 = vsub.f32 1.0, %v2241_v2  ;;  %v1244_v48 = vmul.f32 %v2241_v2, %v2628_v46 }
 0xbfc   :  { %v2243_v6 = vpop.eup %2242 }
 0xbfd   :  { %v2245_v19 = vpop.eup %2244 }
 0xbfe   :  { %v1293_v21 = vadd.f32 1.0, %v2245_v19 }
 0xc00   :  { %2246 = vrcp.f32 %v1293_v21 }
 0xc0a   :  { %v2247_v28 = vpop.eup %2246 }
 0xc0b   :  { %v1320_v34 = vsub.f32 1.0, %v2247_v28 }
 0xc53   :  { %v1229_v3 = vpop.permute.xlu1 %1228 }
 0xc54   :  { %v1231_v5 = vmul.f32 %v2241_v2, %v1229_v3 }
 0xc56   :  { %1233 = vrot.lane.b32.xlu0 %v1231_v5, %s2303_s3  ;;  %v1307_v8 = vpop.permute.xlu0 %1306 }
 0xc57   :  { %v1309_v10 = vmul.f32 %v2243_v6, %v1307_v8 }
 0xc59   :  { %1315 = vrot.lane.b32.xlu1 %v1309_v10, %s2305_s8 }
 0xc5a   :  { %v1311_v20 = vpop.permute.xlu0 %1310 }
 0xc5b   :  { %v1312_v25 = vrot.slane %v1311_v20, 2 }
 0xc5d   :  { %1330 = vrot.lane.b32.xlu1 %v1329_v12, %s2304_s2 }
 0xcc8   :  { %v1234_v22 = vpop.permute.xlu0 %1233 }
 0xcc9   :  { %v1236_v24 = vadd.f32 %v1234_v22, %v1210_v56 }
 0xccb   :  { %2248 = vtanh.f32 %v1236_v24  ;;  %v1316_v26 = vpop.permute.xlu1 %1315 }
 0xccc   :  { %v1318_v27 = vadd.f32 %v1316_v26, %v1312_v25 }
 0xcce   :  { %2250 = vtanh.f32 %v1318_v27 }
 0xccf   :  { %v1331_v32 = vpop.permute.xlu1 %1330 }
 0xcd0   :  { %v1333_v33 = vmul.f32 %v2247_v28, %v1331_v32 }
 0xcd5   :  { %v2249_v29 = vpop.eup %2248 }
 0xcd6   :  { %1240 = vrot.lane.b32.xlu0 %v2249_v29, %s2304_s2 }
 0xcd8   :  { %v2251_v36 = vpop.eup %2250 }
 0xcd9   :  { %v1321_v38 = vmul.f32 %v2251_v36, %v1320_v34 }
 0xcdb   :  { %v1334_v41 = vadd.f32 %v1333_v33, %v1321_v38 }
 0xcdd   :  { %1336 = vst.msk [vmem:[#allocation4 + $0x6] sm:$0x3] %vm397_vm4, %v1334_v41  ;;  %v1338_v43 = vcombine.low %v1334_v41, %v1334_v41 }
 0xcdf   :  { %v1345_v37 = vrot.slane %v1338_v43, %v2424_v39 }
 0xce1   :  { %1346 = vrot.lane.b32.xlu1 %v1345_v37, %s2305_s8 }
 0xd48   :  { %v1241_v45 = vpop.permute.xlu0 %1240 }
 0xd49   :  { %v1243_v42 = vmul.f32 %v1241_v45, %v1238_v47 }
 0xd4b   :  { %v2656_v49 = vadd.f32 %v1244_v48, %v1243_v42 }
 0xd53   :  { %v1347_v50 = vpop.permute.xlu1 %1346 }
 0xd54   :  { %v2660_v11 = vsel %vm246_vm1, %v2656_v49, %v1347_v50 }
 0xd55   :  { %1351 = vrot.lane.b32.xlu0 %v2660_v11, %s2304_s2  ;;  %v1544_v9 = vrot.slane %v2660_v11, %v2424_v39 }
 0xd57   :  { %v1545_v12 = vcombine.high %v1544_v9, %v1544_v9 }
 0xdc7   :  { %v1352_v51 = vpop.permute.xlu0 %1351 }
 0xdc8   :  { %2075 = vmatmul.mubr.msk.f32.vlgmr.msra.gmra.mrb[6].mxu1 %vm266_vm5, %v1352_v51 }
 0xdc9   :  { %2162 = vmatpush1.bf16.msra.mxu1 %v2367_v16  ;;  %1851 = vmatprep.mubr.f32.mxu1 %v2301_v4  ;;  %v1427_v4 = vld [vmem:[#allocation2 + $0x8] sm:$0xf] }
 0xdca   :  { %2164 = vmatprep.subr.bf16.mxu1 %v2381_v23  ;;  %v1426_v23 = vld [vmem:[#allocation2 + $0x14] sm:$0xf]  ;;  %v1493_v15 = vrot.slane %v1427_v4, 2 }
 0xdcd   :  { %2166 = vmatpush1.bf16.msra.mxu1 %v2403_v31 }
 0xe9b   :  { %v1421_v46 = vpop.f32.mrb[6].mxu1 }
 0xe9c   :  { %v1435_v53 = vadd.f32 %v1421_v46, %v2482_v7  ;;  %v1423_v54 = vpop.f32.mrb[7].mxu1  ;;  %v1482_v16 = vrot.slane %v1421_v46, %v2424_v39  ;;  %v1428_v59 = vadd.f32 %v1426_v23, %v1421_v46 }
 0xe9d   :  { %v1512_v55 = vadd.f32 %v2454_v52, %v1423_v54  ;;  %v1502_v13 = vrot.slane %v1423_v54, %v2424_v39 }
 0xe9e   :  { %v1443_v56 = vrot.slane %v1435_v53, %v2424_v39  ;;  %v1483_v31 = vcombine.high %v1482_v16, %v1482_v16  ;;  %v2076_v61 = vmul.f32 -1.442695, %v1428_v59  ;;  %v1642_v59 = vld [vmem:[#allocation2 + $0x18] sm:$0xf] }
 0xe9f   :  { %v1520_v57 = vrot.slane %v1512_v55, %v2424_v39  ;;  %v1503_v14 = vcombine.high %v1502_v13, %v1502_v13 }
 0xea0   :  { %1444 = vrot.lane.b32.xlu0 %v1443_v56, %s2303_s3  ;;  %v1485_v60 = vadd.f32 %v1483_v31, %v1427_v4  ;;  %2252 = vpow2.f32 %v2076_v61 }
 0xea1   :  { %v1521_v58 = vcombine.high %v1520_v57, %v1520_v57  ;;  %v1505_v17 = vadd.f32 %v1503_v14, %v1493_v15 }
 0xea2   :  { %v2077_v52 = vmul.f32 -1.442695, %v1485_v60 }
 0xea3   :  { %1522 = vrot.lane.b32.xlu1 %v1521_v58, %s2303_s3  ;;  %v2078_v18 = vmul.f32 -1.442695, %v1505_v17 }
 0xea4   :  { %2254 = vpow2.f32 %v2077_v52 }
 0xea7   :  { %1526 = vrot.lane.b32.xlu1 %v1427_v4, %s2304_s2 }
 0xeaa   :  { %v2253_v62 = vpop.eup %2252 }
 0xeab   :  { %v1432_v0 = vadd.f32 1.0, %v2253_v62 }
 0xead   :  { %2256 = vrcp.f32 %v1432_v0 }
 0xeae   :  { %v2255_v63 = vpop.eup %2254 }
 0xeaf   :  { %v1489_v1 = vadd.f32 1.0, %v2255_v63 }
 0xeb1   :  { %2258 = vrcp.f32 %v1489_v1 }
 0xeb2   :  { %2260 = vpow2.f32 %v2078_v18 }
 0xeb7   :  { %v2257_v2 = vpop.eup %2256 }
 0xeb8   :  { %v1454_v47 = vsub.f32 1.0, %v2257_v2  ;;  %v1460_v48 = vmul.f32 %v2257_v2, %v2660_v11  ;;  %v2701_v11 = vld [vmem:[%s2834_s4] ss:$0 sm:$0xff] }
 0xebb   :  { %v2259_v6 = vpop.eup %2258 }
 0xebc   :  { %v2261_v19 = vpop.eup %2260 }
 0xebd   :  { %v1509_v21 = vadd.f32 1.0, %v2261_v19 }
 0xebf   :  { %2262 = vrcp.f32 %v1509_v21 }
 0xec9   :  { %v2263_v28 = vpop.eup %2262 }
 0xeca   :  { %v1536_v34 = vsub.f32 1.0, %v2263_v28 }
 0xf12   :  { %v1445_v3 = vpop.permute.xlu0 %1444 }
 0xf13   :  { %v1447_v5 = vmul.f32 %v2257_v2, %v1445_v3 }
 0xf15   :  { %1449 = vrot.lane.b32.xlu1 %v1447_v5, %s2303_s3  ;;  %v1523_v8 = vpop.permute.xlu1 %1522 }
 0xf16   :  { %v1525_v10 = vmul.f32 %v2259_v6, %v1523_v8 }
 0xf18   :  { %1531 = vrot.lane.b32.xlu0 %v1525_v10, %s2305_s8 }
 0xf19   :  { %v1527_v20 = vpop.permute.xlu1 %1526 }
 0xf1a   :  { %v1528_v25 = vrot.slane %v1527_v20, 2 }
 0xf1c   :  { %1546 = vrot.lane.b32.xlu0 %v1545_v12, %s2304_s2 }
 0xf87   :  { %v1450_v22 = vpop.permute.xlu1 %1449 }
 0xf88   :  { %v1452_v24 = vadd.f32 %v1450_v22, %v1426_v23  ;;  %v1643_v23 = vld [vmem:[#allocation2 + $0x4] sm:$0xf] }
 0xf89   :  { %v1709_v18 = vrot.slane %v1643_v23, 2 }
 0xf8a   :  { %2264 = vtanh.f32 %v1452_v24  ;;  %v1532_v26 = vpop.permute.xlu0 %1531 }
 0xf8b   :  { %v1534_v27 = vadd.f32 %v1532_v26, %v1528_v25 }
 0xf8d   :  { %2266 = vtanh.f32 %v1534_v27 }
 0xf8e   :  { %v1547_v32 = vpop.permute.xlu0 %1546 }
 0xf8f   :  { %v1549_v33 = vmul.f32 %v2263_v28, %v1547_v32 }
 0xf94   :  { %v2265_v29 = vpop.eup %2264 }
 0xf95   :  { %1456 = vrot.lane.b32.xlu1 %v2265_v29, %s2304_s2 }
 0xf97   :  { %v2267_v36 = vpop.eup %2266 }
 0xf98   :  { %v1537_v38 = vmul.f32 %v2267_v36, %v1536_v34 }
 0xf9a   :  { %v1550_v41 = vadd.f32 %v1549_v33, %v1537_v38 }
 0xf9c   :  { %1552 = vst.msk [vmem:[#allocation4 + $0x4] sm:$0x3] %vm397_vm4, %v1550_v41  ;;  %v1554_v43 = vcombine.low %v1550_v41, %v1550_v41 }
 0xf9e   :  { %v1561_v37 = vrot.slane %v1554_v43, %v2424_v39 }
 0xfa0   :  { %1562 = vrot.lane.b32.xlu0 %v1561_v37, %s2305_s8 }
0x1007   :  { %v1457_v45 = vpop.permute.xlu1 %1456 }
0x1008   :  { %v1459_v42 = vmul.f32 %v1457_v45, %v1454_v47 }
0x100a   :  { %v2688_v50 = vadd.f32 %v1460_v48, %v1459_v42 }
0x1012   :  { %v1563_v51 = vpop.permute.xlu0 %1562 }
0x1013   :  { %v2692_v46 = vsel %vm246_vm1, %v2688_v50, %v1563_v51 }
0x1014   :  { %1567 = vrot.lane.b32.xlu1 %v2692_v46, %s2304_s2  ;;  %v1760_v12 = vrot.slane %v2692_v46, %v2424_v39 }
0x1016   :  { %v1761_v14 = vcombine.high %v1760_v12, %v1760_v12 }
0x1086   :  { %v1568_v53 = vpop.permute.xlu1 %1567 }
0x1087   :  { %2079 = vmatmul.mubr.msk.f32.vlgmr.msra.gmra.mrb[8].mxu0 %vm266_vm5, %v1568_v53 }
0x115a   :  { %v1637_v54 = vpop.f32.mrb[8].mxu0 }
0x115b   :  { %v1651_v55 = vadd.f32 %v1637_v54, %v2482_v7  ;;  %v1639_v56 = vpop.f32.mrb[9].mxu0  ;;  %v1698_v31 = vrot.slane %v1637_v54, %v2424_v39  ;;  %v1644_v61 = vadd.f32 %v1642_v59, %v1637_v54 }
0x115c   :  { %v1728_v57 = vadd.f32 %v2701_v11, %v1639_v56  ;;  %v1718_v15 = vrot.slane %v1639_v56, %v2424_v39 }
0x115d   :  { %v1659_v58 = vrot.slane %v1651_v55, %v2424_v39  ;;  %v1699_v60 = vcombine.high %v1698_v31, %v1698_v31  ;;  %v2080_v62 = vmul.f32 -1.442695, %v1644_v61  ;;  %v1858_v61 = vld [vmem:[#allocation2 + $0x1c] sm:$0xf] }
0x115e   :  { %v1736_v4 = vrot.slane %v1728_v57, %v2424_v39  ;;  %v1719_v17 = vcombine.high %v1718_v15, %v1718_v15 }
0x115f   :  { %1660 = vrot.lane.b32.xlu1 %v1659_v58, %s2303_s3  ;;  %v1701_v52 = vadd.f32 %v1699_v60, %v1643_v23  ;;  %2268 = vpow2.f32 %v2080_v62 }
0x1160   :  { %v1737_v16 = vcombine.high %v1736_v4, %v1736_v4  ;;  %v1721_v19 = vadd.f32 %v1719_v17, %v1709_v18  ;;  %v601_v17 = vrot.slane %v2558_v35, %v2424_v39  ;;  %v1037_v18 = vrot.slane %v2624_v44, %v2424_v39 }
0x1161   :  { %v2081_v63 = vmul.f32 -1.442695, %v1701_v52 }
0x1162   :  { %1738 = vrot.lane.b32.xlu0 %v1737_v16, %s2303_s3  ;;  %v2082_v20 = vmul.f32 -1.442695, %v1721_v19  ;;  %v1469_v19 = vrot.slane %v2688_v50, %v2424_v39 }
0x1163   :  { %2270 = vpow2.f32 %v2081_v63  ;;  %v1859_v63 = vld [vmem:[#allocation2] sm:$0xf] }
0x1166   :  { %1742 = vrot.lane.b32.xlu0 %v1643_v23, %s2304_s2 }
0x1169   :  { %v2269_v0 = vpop.eup %2268 }
0x116a   :  { %v1648_v2 = vadd.f32 1.0, %v2269_v0 }
0x116c   :  { %2272 = vrcp.f32 %v1648_v2 }
0x116d   :  { %v2271_v1 = vpop.eup %2270 }
0x116e   :  { %v1705_v3 = vadd.f32 1.0, %v2271_v1 }
0x1170   :  { %2274 = vrcp.f32 %v1705_v3 }
0x1171   :  { %2276 = vpow2.f32 %v2082_v20 }
0x1176   :  { %v2273_v5 = vpop.eup %2272 }
0x1177   :  { %v1670_v48 = vsub.f32 1.0, %v2273_v5  ;;  %v1676_v53 = vmul.f32 %v2273_v5, %v2692_v46 }
0x117a   :  { %v2275_v9 = vpop.eup %2274 }
0x117b   :  { %v2277_v21 = vpop.eup %2276 }
0x117c   :  { %v1725_v24 = vadd.f32 1.0, %v2277_v21  ;;  %v1995_v21 = vld [vmem:[#allocation4 + $0x6] sm:$0x3] }
0x117e   :  { %2278 = vrcp.f32 %v1725_v24  ;;  %v1925_v24 = vrot.slane %v1859_v63, 2 }
0x1188   :  { %v2279_v32 = vpop.eup %2278 }
0x1189   :  { %v1752_v38 = vsub.f32 1.0, %v2279_v32 }
0x11d1   :  { %v1661_v6 = vpop.permute.xlu1 %1660 }
0x11d2   :  { %v1663_v8 = vmul.f32 %v2273_v5, %v1661_v6 }
0x11d4   :  { %1665 = vrot.lane.b32.xlu0 %v1663_v8, %s2303_s3  ;;  %v1739_v10 = vpop.permute.xlu0 %1738 }
0x11d5   :  { %v1741_v13 = vmul.f32 %v2275_v9, %v1739_v10 }
0x11d7   :  { %1747 = vrot.lane.b32.xlu1 %v1741_v13, %s2305_s8 }
0x11d8   :  { %v1743_v22 = vpop.permute.xlu0 %1742 }
0x11d9   :  { %v1744_v27 = vrot.slane %v1743_v22, 2 }
0x11db   :  { %1762 = vrot.lane.b32.xlu1 %v1761_v14, %s2304_s2 }
0x1246   :  { %v1666_v25 = vpop.permute.xlu0 %1665 }
0x1247   :  { %v1668_v26 = vadd.f32 %v1666_v25, %v1642_v59 }
0x1249   :  { %2280 = vtanh.f32 %v1668_v26  ;;  %v1748_v28 = vpop.permute.xlu1 %1747 }
0x124a   :  { %v1750_v29 = vadd.f32 %v1748_v28, %v1744_v27 }
0x124c   :  { %2282 = vtanh.f32 %v1750_v29 }
0x124d   :  { %v1763_v36 = vpop.permute.xlu1 %1762 }
0x124e   :  { %v1765_v43 = vmul.f32 %v2279_v32, %v1763_v36 }
0x1253   :  { %v2281_v34 = vpop.eup %2280 }
0x1254   :  { %1672 = vrot.lane.b32.xlu0 %v2281_v34, %s2304_s2 }
0x1256   :  { %v2283_v33 = vpop.eup %2282 }
0x1257   :  { %v1753_v41 = vmul.f32 %v2283_v33, %v1752_v38 }
0x1259   :  { %v1766_v37 = vadd.f32 %v1765_v43, %v1753_v41 }
0x125b   :  { %1768 = vst.msk [vmem:[#allocation4 + $0x2] sm:$0x3] %vm397_vm4, %v1766_v37  ;;  %v1770_v45 = vcombine.low %v1766_v37, %v1766_v37 }
0x125d   :  { %v1777_v47 = vrot.slane %v1770_v45, %v2424_v39  ;;  %v393_v45 = vrot.slane %v2525_v30, %v2424_v39 }
0x125f   :  { %1778 = vrot.lane.b32.xlu1 %v1777_v47, %s2305_s8 }
0x1262   :  { %v1993_v20 = vld [vmem:[#allocation4 + $0x2] sm:$0x3] }
0x12c6   :  { %v1673_v42 = vpop.permute.xlu0 %1672 }
0x12c7   :  { %v1675_v51 = vmul.f32 %v1673_v42, %v1670_v48 }
0x12c9   :  { %v2721_v54 = vadd.f32 %v1676_v53, %v1675_v51 }
0x12d1   :  { %v1779_v55 = vpop.permute.xlu1 %1778 }
0x12d2   :  { %v2725_v56 = vsel %vm246_vm1, %v2721_v54, %v1779_v55  ;;  %v819_v55 = vrot.slane %v2591_v40, %v2424_v39 }
0x12d3   :  { %1783 = vrot.lane.b32.xlu0 %v2725_v56, %s2304_s2  ;;  %v1976_v13 = vrot.slane %v2725_v56, %v2424_v39 }
0x12d5   :  { %v1977_v15 = vcombine.high %v1976_v13, %v1976_v13 }
0x1345   :  { %v1784_v57 = vpop.permute.xlu0 %1783 }
0x1346   :  { %2083 = vmatmul.mubr.msk.f32.vlgmr.msra.gmra.mrb[8].mxu1 %vm266_vm5, %v1784_v57 }
0x1419   :  { %v1853_v58 = vpop.f32.mrb[8].mxu1 }
0x141a   :  { %v1867_v4 = vadd.f32 %v1853_v58, %v2482_v7  ;;  %v1855_v16 = vpop.f32.mrb[9].mxu1  ;;  %v1914_v60 = vrot.slane %v1853_v58, %v2424_v39  ;;  %v1860_v52 = vadd.f32 %v1858_v61, %v1853_v58 }
0x141b   :  { %v1944_v23 = vadd.f32 %v2701_v11, %v1855_v16  ;;  %v1934_v35 = vrot.slane %v1855_v16, %v2424_v39 }
0x141c   :  { %v1875_v46 = vrot.slane %v1867_v4, %v2424_v39  ;;  %v1915_v62 = vcombine.high %v1914_v60, %v1914_v60  ;;  %v2084_v0 = vmul.f32 -1.442695, %v1860_v52  ;;  %v1253_v4 = vrot.slane %v2656_v49, %v2424_v39  ;;  %v1994_v49 = vld [vmem:[#allocation4 + $0x4] sm:$0x3] }
0x141d   :  { %v1952_v31 = vrot.slane %v1944_v23, %v2424_v39  ;;  %v1935_v22 = vcombine.high %v1934_v35, %v1934_v35 }
0x141e   :  { %1876 = vrot.lane.b32.xlu1 %v1875_v46, %s2303_s3  ;;  %v1917_v7 = vadd.f32 %v1915_v62, %v1859_v63  ;;  %2284 = vpow2.f32 %v2084_v0  ;;  %v1685_v46 = vrot.slane %v2721_v54, %v2424_v39 }
0x141f   :  { %v1953_v59 = vcombine.high %v1952_v31, %v1952_v31  ;;  %v1937_v25 = vadd.f32 %v1935_v22, %v1925_v24 }
0x1420   :  { %v2085_v1 = vmul.f32 -1.442695, %v1917_v7 }
0x1421   :  { %v2086_v26 = vmul.f32 -1.442695, %v1937_v25 }
0x1422   :  { %1954 = vrot.lane.b32.xlu1 %v1953_v59, %s2303_s3  ;;  %2286 = vpow2.f32 %v2085_v1  ;;  %v1996_v59 = vld [vmem:[#allocation4 + $0x8] sm:$0x3] }
0x1428   :  { %v2285_v11 = vpop.eup %2284 }
0x1429   :  { %v1864_v2 = vadd.f32 1.0, %v2285_v11 }
0x142b   :  { %2288 = vrcp.f32 %v1864_v2  ;;  %v1997_v2 = vld [vmem:[#allocation4 + $0xa] sm:$0x3] }
0x142c   :  { %v2287_v3 = vpop.eup %2286 }
0x142d   :  { %v1921_v5 = vadd.f32 1.0, %v2287_v3 }
0x142f   :  { %2290 = vrcp.f32 %v1921_v5  ;;  %v1999_v5 = vld [vmem:[#allocation4 + $0xe] sm:$0x3] }
0x1430   :  { %2292 = vpow2.f32 %v2086_v26 }
0x1435   :  { %v2737_v6 = vpop.eup %2288 }
0x1436   :  { %v1886_v54 = vsub.f32 1.0, %v2737_v6  ;;  %v1892_v62 = vmul.f32 %v2737_v6, %v2725_v56 }
0x1439   :  { %v2291_v10 = vpop.eup %2290 }
0x143a   :  { %v2293_v44 = vpop.eup %2292 }
0x143b   :  { %v1941_v29 = vadd.f32 1.0, %v2293_v44 }
0x1490   :  { %v1877_v8 = vpop.permute.xlu1 %1876 }
0x1491   :  { %v1879_v9 = vmul.f32 %v2737_v6, %v1877_v8 }
0x1493   :  { %1881 = vrot.lane.b32.xlu0 %v1879_v9, %s2303_s3 }
0x1494   :  { %v1955_v12 = vpop.permute.xlu1 %1954 }
0x1495   :  { %v1957_v14 = vmul.f32 %v2291_v10, %v1955_v12 }
0x1497   :  { %1958 = vrot.lane.b32.xlu0 %v1859_v63, %s2304_s2  ;;  %1963 = vrot.lane.b32.xlu1 %v1957_v14, %s2305_s8 }
0x149b   :  { %1978 = vrot.lane.b32.xlu1 %v1977_v15, %s2304_s2 }
0x149f   :  { %602 = vrot.lane.b32.xlu1 %v601_v17, %s2304_s2 }
0x14a3   :  { %1038 = vrot.lane.b32.xlu1 %v1037_v18, %s2304_s2 }
0x14a7   :  { %1470 = vrot.lane.b32.xlu1 %v1469_v19, %s2304_s2 }
0x14ab   :  { %2010 = vrot.lane.b32.xlu1 %v1993_v20, %s2305_s8 }
0x14af   :  { %2014 = vrot.lane.b32.xlu1 %v1995_v21, %s2305_s8 }
0x1505   :  { %v1882_v27 = vpop.permute.xlu0 %1881 }
0x1506   :  { %v1884_v28 = vadd.f32 %v1882_v27, %v1858_v61  ;;  %v1998_v61 = vld [vmem:[#allocation4 + $0xc] sm:$0x3] }
0x1508   :  { %2294 = vtanh.f32 %v1884_v28 }
0x1509   :  { %v1959_v50 = vpop.permute.xlu0 %1958  ;;  %v1964_v32 = vpop.permute.xlu1 %1963  ;;  %2296 = vrcp.f32 %v1941_v29 }
0x150a   :  { %v1960_v34 = vrot.slane %v1959_v50, 2 }
0x150c   :  { %v1966_v36 = vadd.f32 %v1964_v32, %v1960_v34 }
0x150d   :  { %v1979_v38 = vpop.permute.xlu1 %1978 }
0x150e   :  { %2298 = vtanh.f32 %v1966_v36 }
0x1511   :  { %v603_v33 = vpop.permute.xlu1 %602 }
0x1512   :  { %v2295_v41 = vpop.eup %2294  ;;  %606 = vst.msk [vmem:[#allocation3 + $0x2] sm:$0x3] %vm397_vm4, %v603_v33 }
0x1513   :  { %1888 = vrot.lane.b32.xlu0 %v2295_v41, %s2304_s2  ;;  %v2297_v43 = vpop.eup %2296 }
0x1514   :  { %v1968_v47 = vsub.f32 1.0, %v2297_v43  ;;  %v1981_v51 = vmul.f32 %v2297_v43, %v1979_v38 }
0x1515   :  { %v1039_v37 = vpop.permute.xlu1 %1038 }
0x1516   :  { %1042 = vst.msk [vmem:[#allocation3 + $0x6] sm:$0x3] %vm397_vm4, %v1039_v37 }
0x1517   :  { %394 = vrot.lane.b32.xlu0 %v393_v45, %s2304_s2 }
0x1518   :  { %v2299_v42 = vpop.eup %2298 }
0x1519   :  { %v1969_v48 = vmul.f32 %v2299_v42, %v1968_v47  ;;  %v1471_v53 = vpop.permute.xlu1 %1470  ;;  %v1985_v30 = vld [vmem:[#allocation3 + $0x2] sm:$0x3] }
0x151a   :  { %1474 = vst.msk [vmem:[#allocation3 + $0xa] sm:$0x3] %vm397_vm4, %v1471_v53 }
0x151b   :  { %v1982_v57 = vadd.f32 %v1981_v51, %v1969_v48  ;;  %820 = vrot.lane.b32.xlu0 %v819_v55, %s2304_s2 }
0x151d   :  { %1983 = vst.msk [vmem:[#allocation4] sm:$0x3] %vm397_vm4, %v1982_v57  ;;  %v2011_v58 = vpop.permute.xlu1 %2010  ;;  %v1987_v40 = vld [vmem:[#allocation3 + $0x6] sm:$0x3] }
0x151e   :  { %v2033_v16 = vsel %vm266_vm5, %v1985_v30, %v2011_v58 }
0x151f   :  { %2042 = vst.msk [vmem:[%s2836_s5 + $0x2] sm:$0x3] %vm2040_vm6, %v2033_v16  ;;  %1254 = vrot.lane.b32.xlu0 %v1253_v4, %s2304_s2 }
0x1521   :  { %v2015_v23 = vpop.permute.xlu1 %2014  ;;  %v1989_v21 = vld [vmem:[#allocation3 + $0xa] sm:$0x3] }
0x1522   :  { %v2035_v31 = vsel %vm266_vm5, %v1987_v40, %v2015_v23 }
0x1523   :  { %2044 = vst.msk [vmem:[%s2836_s5 + $0x6] sm:$0x3] %vm2040_vm6, %v2035_v31  ;;  %1686 = vrot.lane.b32.xlu0 %v1685_v46, %s2304_s2 }
0x1524   :  { %v1992_v60 = vld [vmem:[#allocation4] sm:$0x3] }
0x1527   :  { %2012 = vrot.lane.b32.xlu0 %v1994_v49, %s2305_s8 }
0x152b   :  { %2016 = vrot.lane.b32.xlu0 %v1996_v59, %s2305_s8 }
0x152f   :  { %2008 = vrot.lane.b32.xlu0 %v1992_v60, %s2305_s8 }
0x1533   :  { %2020 = vrot.lane.b32.xlu0 %v1998_v61, %s2305_s8 }
0x1585   :  { %v1889_v52 = vpop.permute.xlu0 %1888 }
0x1586   :  { %v1891_v63 = vmul.f32 %v1889_v52, %v1886_v54 }
0x1588   :  { %v1893_v0 = vadd.f32 %v1892_v62, %v1891_v63 }
0x1589   :  { %v395_v7 = vpop.permute.xlu0 %394 }
0x158a   :  { %398 = vst.msk [vmem:[#allocation3] sm:$0x3] %vm397_vm4, %v395_v7  ;;  %v1901_v1 = vrot.slane %v1893_v0, %v2424_v39 }
0x158c   :  { %1902 = vrot.lane.b32.xlu1 %v1901_v1, %s2304_s2 }
0x158d   :  { %v821_v11 = vpop.permute.xlu0 %820 }
0x158e   :  { %824 = vst.msk [vmem:[#allocation3 + $0x4] sm:$0x3] %vm397_vm4, %v821_v11 }
0x1590   :  { %2018 = vrot.lane.b32.xlu1 %v1997_v2, %s2305_s8 }
0x1591   :  { %v1255_v3 = vpop.permute.xlu0 %1254  ;;  %v1984_v13 = vld [vmem:[#allocation3] sm:$0x3] }
0x1592   :  { %1258 = vst.msk [vmem:[#allocation3 + $0x8] sm:$0x3] %vm397_vm4, %v1255_v3 }
0x1594   :  { %2022 = vrot.lane.b32.xlu1 %v1999_v5, %s2305_s8 }
0x1595   :  { %v1687_v56 = vpop.permute.xlu0 %1686  ;;  %v1986_v6 = vld [vmem:[#allocation3 + $0x4] sm:$0x3] }
0x1596   :  { %1690 = vst.msk [vmem:[#allocation3 + $0xc] sm:$0x3] %vm397_vm4, %v1687_v56 }
0x1599   :  { %v2013_v8 = vpop.permute.xlu0 %2012  ;;  %v1988_v9 = vld [vmem:[#allocation3 + $0x8] sm:$0x3] }
0x159a   :  { %v2034_v39 = vsel %vm266_vm5, %v1986_v6, %v2013_v8 }
0x159b   :  { %2043 = vst.msk [vmem:[%s2836_s5 + $0x4] sm:$0x3] %vm2040_vm6, %v2034_v39 }
0x159d   :  { %v2017_v10 = vpop.permute.xlu0 %2016  ;;  %v1990_v17 = vld [vmem:[#allocation3 + $0xc] sm:$0x3] }
0x159e   :  { %v2036_v12 = vsel %vm266_vm5, %v1988_v9, %v2017_v10 }
0x159f   :  { %2045 = vst.msk [vmem:[%s2836_s5 + $0x8] sm:$0x3] %vm2040_vm6, %v2036_v12 }
0x15a1   :  { %v2009_v14 = vpop.permute.xlu0 %2008 }
0x15a2   :  { %v2032_v15 = vsel %vm266_vm5, %v1984_v13, %v2009_v14 }
0x15a3   :  { %2041 = vst.msk [vmem:[%s2836_s5] sm:$0x3] %vm2040_vm6, %v2032_v15 }
0x15a5   :  { %v2021_v18 = vpop.permute.xlu0 %2020 }
0x15a6   :  { %v2038_v19 = vsel %vm266_vm5, %v1990_v17, %v2021_v18 }
0x15a7   :  { %2047 = vst.msk [vmem:[%s2836_s5 + $0xc] sm:$0x3] %vm2040_vm6, %v2038_v19 }
0x15fe   :  { %v1903_v20 = vpop.permute.xlu1 %1902 }
0x15ff   :  { %1906 = vst.msk [vmem:[#allocation3 + $0xe] sm:$0x3] %vm397_vm4, %v1903_v20 }
0x1602   :  { %v2019_v35 = vpop.permute.xlu1 %2018 }
0x1603   :  { %v2037_v22 = vsel %vm266_vm5, %v1989_v21, %v2019_v35 }
0x1604   :  { %2046 = vst.msk [vmem:[%s2836_s5 + $0xa] sm:$0x3] %vm2040_vm6, %v2037_v22 }
0x1606   :  { %v1991_v24 = vld [vmem:[#allocation3 + $0xe] sm:$0x3]  ;;  %v2023_v25 = vpop.permute.xlu1 %2022 }
0x1607   :  { %v2039_v26 = vsel %vm266_vm5, %v1991_v24, %v2023_v25 }
0x1608   :  { %2048 = vst.msk [vmem:[%s2836_s5 + $0xe] sm:$0x3] %vm2040_vm6, %v2039_v26 }

</bundles_post_ra>
